<compile_context>
chip_gen: v6e
topology: v6e:2x2x1
jax: 0.10.0
libtpu: 0.0.40
codegen_flags: <defaults>
</compile_context>

<pallas_src>
import functools

import jax
import jax.numpy as jnp
from jax.experimental import pallas as pl
from jax.experimental.pallas import tpu as pltpu


def _round_up(x, m):
    return (x + m - 1) // m * m


def _pick_row_tile(m, target=256):
    """Largest multiple of 8 that divides m and is <= target (fallback: m)."""
    tm = min(m, target)
    tm -= tm % 8
    while tm >= 8 and m % tm:
        tm -= 8
    return tm if tm >= 8 else m


# ------------------ pass 1: conv (shifted matmuls) + BN stats ------------------

def _conv_stats_kernel(xp_ref, w_ref, y_ref, stats_ref, acc_ref, *, H, W, KH, KW):
    # xp_ref:    (1, Hp, Wp, Cp) bf16  padded NHWC image (one batch element)
    # w_ref:     (KH*KW, Cp, Op) bf16  per-tap flattened weight (resident)
    # y_ref:     (1, H, W, Op)   f32   conv output for this image
    # stats_ref: (1, 2, Op)      f32   per-image [sum, sum of squares] per channel
    # acc_ref:   (H*W, Op)       f32   VMEM accumulator scratch
    Cp = xp_ref.shape[-1]
    Op = w_ref.shape[-1]

    acc_ref[...] = jnp.zeros_like(acc_ref)
    for t in range(KH * KW):                       # unrolled: KH*KW shifted matmuls
        dh, dw = t // KW, t % KW
        xwin = xp_ref[:, dh:dh + H, dw:dw + W, :]  # (1, H, W, Cp), static offsets
        xwin = xwin.reshape(H * W, Cp)
        acc_ref[...] += jnp.dot(xwin, w_ref[t],
                                preferred_element_type=jnp.float32)

    acc = acc_ref[...]
    y_ref[...] = acc.reshape(1, H, W, Op)
    stats_ref[...] = jnp.concatenate(
        [jnp.sum(acc, axis=0, keepdims=True),
         jnp.sum(acc * acc, axis=0, keepdims=True)], axis=0)[None]


def conv_bn_stats(xp, w_taps, *, H, W, KH, KW):
    N, Hp, Wp, Cp = xp.shape
    T, _, Op = w_taps.shape

    flops = 2 * N * H * W * Cp * Op * T
    bytes_accessed = (xp.size * 2 + w_taps.size * 2
                      + N * H * W * Op * 4 + N * 2 * Op * 4)

    kernel = functools.partial(_conv_stats_kernel, H=H, W=W, KH=KH, KW=KW)
    return pl.pallas_call(
        kernel,
        out_shape=(jax.ShapeDtypeStruct((N, H, W, Op), jnp.float32),
                   jax.ShapeDtypeStruct((N, 2, Op), jnp.float32)),
        grid_spec=pltpu.PrefetchScalarGridSpec(
            num_scalar_prefetch=0,
            grid=(N,),
            in_specs=[
                pl.BlockSpec((1, Hp, Wp, Cp), lambda n: (n, 0, 0, 0)),
                pl.BlockSpec((T, Cp, Op), lambda n: (0, 0, 0)),   # resident
            ],
            out_specs=(
                pl.BlockSpec((1, H, W, Op), lambda n: (n, 0, 0, 0)),
                pl.BlockSpec((1, 2, Op), lambda n: (n, 0, 0)),
            ),
            scratch_shapes=[pltpu.VMEM((H * W, Op), jnp.float32)],
        ),
        compiler_params=pltpu.CompilerParams(
            dimension_semantics=("parallel",),          # shards batch across TCs on v7x
            vmem_limit_bytes=32 * 1024 * 1024),
        cost_estimate=pl.CostEstimate(flops=flops, transcendentals=0,
                                      bytes_accessed=bytes_accessed),
    )(xp, w_taps)


# --------------------- pass 2: tiled normalize + ReLU ---------------------

def _bn_relu_kernel(y_ref, scale_ref, shift_ref, o_ref):
    y = y_ref[...]                                              # (tm, Op) f32
    o_ref[...] = jnp.maximum(y * scale_ref[...] + shift_ref[...], 0.0)


def bn_relu_apply(y2d, scale, shift):
    M, Op = y2d.shape
    tm = _pick_row_tile(M, target=256)   # raise toward 512-1024 at large M
    grid = (M // tm,)

    flops = 3 * M * Op
    bytes_accessed = y2d.size * 4 + M * Op * 4 + 2 * Op * 4

    return pl.pallas_call(
        _bn_relu_kernel,
        out_shape=jax.ShapeDtypeStruct((M, Op), jnp.float32),
        grid_spec=pltpu.PrefetchScalarGridSpec(
            num_scalar_prefetch=0,
            grid=grid,
            in_specs=[
                pl.BlockSpec((tm, Op), lambda i: (i, 0)),
                pl.BlockSpec((1, Op), lambda i: (0, 0)),
                pl.BlockSpec((1, Op), lambda i: (0, 0)),
            ],
            out_specs=pl.BlockSpec((tm, Op), lambda i: (i, 0)),
        ),
        compiler_params=pltpu.CompilerParams(
            dimension_semantics=("parallel",),
            vmem_limit_bytes=32 * 1024 * 1024),
        cost_estimate=pl.CostEstimate(flops=flops, transcendentals=0,
                                      bytes_accessed=bytes_accessed),
    )(y2d, scale, shift)


# ------------------------------- module forward -------------------------------

def basic_conv2d_forward(x, w, gamma, beta, *, eps=1e-5):
    """x: [N, C, H, W]; w: [O, C, KH, KW] (Conv2d bias=False, stride 1, 'same')."""
    N, C, H, W = x.shape
    O, C2, KH, KW = w.shape
    assert C2 == C and KH % 2 == 1 and KW % 2 == 1
    # TODO(synk): stride != 1 and even/asymmetric kernels (used by other Inception
    # blocks) are not handled by this stride-1 'same' lowering.
    ph, pw = (KH - 1) // 2, (KW - 1) // 2

    Cp = _round_up(C, 128)
    Op = _round_up(O, 128)

    # NCHW -> padded NHWC, channel-padded, bf16 (MXU operands).
    xt = jnp.transpose(x, (0, 2, 3, 1))
    xp = jnp.pad(xt, ((0, 0), (ph, ph), (pw, pw), (0, Cp - C))).astype(jnp.bfloat16)

    # (O, C, KH, KW) -> (KH*KW, Cp, Op), zero-padded, bf16.
    wt = jnp.transpose(w, (2, 3, 1, 0)).reshape(KH * KW, C, O)
    wt = jnp.pad(wt, ((0, 0), (0, Cp - C), (0, Op - O))).astype(jnp.bfloat16)

    # Pass 1 (Pallas): conv + fused per-image BN partial stats.
    y, stats = conv_bn_stats(xp, wt, H=H, W=W, KH=KH, KW=KW)

    # Tiny [N, 2, Op] reduction -> per-channel scale/shift (f32).
    M = N * H * W
    s = stats[:, 0, :].sum(axis=0)
    ss = stats[:, 1, :].sum(axis=0)
    mean = s / M
    var = ss / M - mean * mean                       # biased (training-mode BN)
    gamma_p = jnp.pad(gamma.astype(jnp.float32), (0, Op - O))   # zero-padded ->
    beta_p = jnp.pad(beta.astype(jnp.float32), (0, Op - O))     # padded chans stay 0
    scale = gamma_p * jax.lax.rsqrt(var + eps)
    shift = beta_p - mean * scale

    # Pass 2 (Pallas): tiled y*scale+shift, ReLU.
    out2d = bn_relu_apply(y.reshape(M, Op), scale.reshape(1, Op), shift.reshape(1, Op))

    out = out2d.reshape(N, H, W, Op)[..., :O]
    return jnp.transpose(out, (0, 3, 1, 2))          # back to NCHW module layout


# --------------------------------- reference ---------------------------------

def reference(x, w, gamma, beta, eps=1e-5):
    # Same numerics contract as the kernel path: bf16 conv operands, f32 accum/BN.
    y = jax.lax.conv_general_dilated(
        x.astype(jnp.bfloat16), w.astype(jnp.bfloat16),
        window_strides=(1, 1), padding="SAME",
        dimension_numbers=("NCHW", "OIHW", "NCHW"),
        preferred_element_type=jnp.float32)
    mean = y.mean(axis=(0, 2, 3), keepdims=True)
    var = ((y - mean) ** 2).mean(axis=(0, 2, 3), keepdims=True)
    yn = (y - mean) * jax.lax.rsqrt(var + eps) * gamma.reshape(1, -1, 1, 1) \
         + beta.reshape(1, -1, 1, 1)
    return jnp.maximum(yn, 0.0)


if __name__ == "__main__":
    key = jax.random.PRNGKey(0)
    N, C, H, W = 2, 4, 16, 16        # input NCHW
    O_CH, KH, KW = 8, 3, 3           # BasicConv2d(4, 8, kernel_size=3, padding=1)

    k1, k2, k3, k4 = jax.random.split(key, 4)
    x = jax.random.normal(k1, (N, C, H, W), jnp.float32)

    # Conv2d(bias=False) weight: kaiming-uniform-style init.
    fan_in = C * KH * KW
    bound = (1.0 / fan_in) ** 0.5
    w = jax.random.uniform(k2, (O_CH, C, KH, KW), jnp.float32, -bound, bound)

    # BatchNorm2d affine params (defaults are 1/0; use non-trivial values to
    # exercise the scale/shift path).
    gamma = 1.0 + 0.1 * jax.random.normal(k3, (O_CH,), jnp.float32)
    beta = 0.1 * jax.random.normal(k4, (O_CH,), jnp.float32)

    out = jax.block_until_ready(basic_conv2d_forward(x, w, gamma, beta))
    assert out.shape == (N, O_CH, H, W)

    ref = jax.block_until_ready(reference(x, w, gamma, beta))
    err = float(jnp.max(jnp.abs(out - ref)))
    assert err < 2e-3, f"mismatch vs JAX reference: {err}"

    print("KERNEL_OK")
</pallas_src>

<mosaic_0001>
module attributes {stable_mosaic.version = 11 : i64} {
  func.func @_conv_stats_kernel(%arg0: i32, %arg1: memref<1x18x18x128xbf16, #tpu.memory_space<vmem>>, %arg2: memref<9x128x128xbf16, #tpu.memory_space<vmem>>, %arg3: memref<1x16x16x128xf32, #tpu.memory_space<vmem>>, %arg4: memref<1x2x128xf32, #tpu.memory_space<vmem>>, %arg5: memref<256x128xf32, #tpu.memory_space<vmem>>) attributes {dimension_semantics = [#tpu.dimension_semantics<parallel>], iteration_bounds = array<i64: 2>, scalar_prefetch = 0 : i64, scratch_operands = 1 : i64, tpu.core_type = #tpu.core_type<tc>, window_params = [{transform_indices = @transform_0, window_bounds = array<i64: 1, 18, 18, 128>}, {pipeline_mode = #tpu.pipeline_mode<synchronous>, transform_indices = @transform_1, window_bounds = array<i64: 9, 128, 128>}, {transform_indices = @transform_2, window_bounds = array<i64: 1, 16, 16, 128>}, {transform_indices = @transform_3, window_bounds = array<i64: 1, 2, 128>}]} {
    %cst = arith.constant 0.000000e+00 : f32
    %0 = vector.broadcast %cst : f32 to vector<256x128xf32>
    %c0 = arith.constant 0 : index
    %c0_0 = arith.constant 0 : index
    %1 = vector.load %arg5[%c0, %c0_0] : memref<256x128xf32, #tpu.memory_space<vmem>>, vector<256x128xf32>
    tpu.vector_store %arg5[%c0, %c0_0], %0 {strides = array<i32>} : memref<256x128xf32, #tpu.memory_space<vmem>>, vector<256x128xf32>,
    %c0_1 = arith.constant 0 : index
    %c0_2 = arith.constant 0 : index
    %c0_3 = arith.constant 0 : index
    %c0_4 = arith.constant 0 : index
    %2 = vector.load %arg1[%c0_1, %c0_2, %c0_3, %c0_4] : memref<1x18x18x128xbf16, #tpu.memory_space<vmem>>, vector<1x16x16x128xbf16>
    %3 = vector.shape_cast %2 : vector<1x16x16x128xbf16> to vector<256x128xbf16>
    %c0_5 = arith.constant 0 : index
    %c0_6 = arith.constant 0 : index
    %4 = vector.load %arg5[%c0_5, %c0_6] : memref<256x128xf32, #tpu.memory_space<vmem>>, vector<256x128xf32>
    %c0_7 = arith.constant 0 : index
    %c0_8 = arith.constant 0 : index
    %c0_9 = arith.constant 0 : index
    %5 = vector.load %arg2[%c0_7, %c0_8, %c0_9] : memref<9x128x128xbf16, #tpu.memory_space<vmem>>, vector<1x128x128xbf16>
    %6 = vector.shape_cast %5 : vector<1x128x128xbf16> to vector<128x128xbf16>
    %cst_10 = arith.constant dense<0.000000e+00> : vector<256x128xf32>
    %7 = tpu.matmul %3, %6, %cst_10 {dimension_numbers = #tpu.dot_dimension_numbers<[1], [0], [0], [1], [0, 0, 1, 1], [], []>} : vector<256x128xbf16>, vector<128x128xbf16>, vector<256x128xf32> -> vector<256x128xf32>
    %8 = arith.addf %4, %7 : vector<256x128xf32>
    %c0_11 = arith.constant 0 : index
    %c0_12 = arith.constant 0 : index
    %9 = vector.load %arg5[%c0_11, %c0_12] : memref<256x128xf32, #tpu.memory_space<vmem>>, vector<256x128xf32>
    tpu.vector_store %arg5[%c0_11, %c0_12], %8 {strides = array<i32>} : memref<256x128xf32, #tpu.memory_space<vmem>>, vector<256x128xf32>,
    %c0_13 = arith.constant 0 : index
    %c0_14 = arith.constant 0 : index
    %c1 = arith.constant 1 : index
    %c0_15 = arith.constant 0 : index
    %10 = vector.load %arg1[%c0_13, %c0_14, %c1, %c0_15] : memref<1x18x18x128xbf16, #tpu.memory_space<vmem>>, vector<1x16x16x128xbf16>
    %11 = vector.shape_cast %10 : vector<1x16x16x128xbf16> to vector<256x128xbf16>
    %c0_16 = arith.constant 0 : index
    %c0_17 = arith.constant 0 : index
    %12 = vector.load %arg5[%c0_16, %c0_17] : memref<256x128xf32, #tpu.memory_space<vmem>>, vector<256x128xf32>
    %c1_18 = arith.constant 1 : index
    %c0_19 = arith.constant 0 : index
    %c0_20 = arith.constant 0 : index
    %13 = vector.load %arg2[%c1_18, %c0_19, %c0_20] : memref<9x128x128xbf16, #tpu.memory_space<vmem>>, vector<1x128x128xbf16>
    %14 = vector.shape_cast %13 : vector<1x128x128xbf16> to vector<128x128xbf16>
    %cst_21 = arith.constant dense<0.000000e+00> : vector<256x128xf32>
    %15 = tpu.matmul %11, %14, %cst_21 {dimension_numbers = #tpu.dot_dimension_numbers<[1], [0], [0], [1], [0, 0, 1, 1], [], []>} : vector<256x128xbf16>, vector<128x128xbf16>, vector<256x128xf32> -> vector<256x128xf32>
    %16 = arith.addf %12, %15 : vector<256x128xf32>
    %c0_22 = arith.constant 0 : index
    %c0_23 = arith.constant 0 : index
    %17 = vector.load %arg5[%c0_22, %c0_23] : memref<256x128xf32, #tpu.memory_space<vmem>>, vector<256x128xf32>
    tpu.vector_store %arg5[%c0_22, %c0_23], %16 {strides = array<i32>} : memref<256x128xf32, #tpu.memory_space<vmem>>, vector<256x128xf32>,
    %c0_24 = arith.constant 0 : index
    %c0_25 = arith.constant 0 : index
    %c2 = arith.constant 2 : index
    %c0_26 = arith.constant 0 : index
    %18 = vector.load %arg1[%c0_24, %c0_25, %c2, %c0_26] : memref<1x18x18x128xbf16, #tpu.memory_space<vmem>>, vector<1x16x16x128xbf16>
    %19 = vector.shape_cast %18 : vector<1x16x16x128xbf16> to vector<256x128xbf16>
    %c0_27 = arith.constant 0 : index
    %c0_28 = arith.constant 0 : index
    %20 = vector.load %arg5[%c0_27, %c0_28] : memref<256x128xf32, #tpu.memory_space<vmem>>, vector<256x128xf32>
    %c2_29 = arith.constant 2 : index
    %c0_30 = arith.constant 0 : index
    %c0_31 = arith.constant 0 : index
    %21 = vector.load %arg2[%c2_29, %c0_30, %c0_31] : memref<9x128x128xbf16, #tpu.memory_space<vmem>>, vector<1x128x128xbf16>
    %22 = vector.shape_cast %21 : vector<1x128x128xbf16> to vector<128x128xbf16>
    %cst_32 = arith.constant dense<0.000000e+00> : vector<256x128xf32>
    %23 = tpu.matmul %19, %22, %cst_32 {dimension_numbers = #tpu.dot_dimension_numbers<[1], [0], [0], [1], [0, 0, 1, 1], [], []>} : vector<256x128xbf16>, vector<128x128xbf16>, vector<256x128xf32> -> vector<256x128xf32>
    %24 = arith.addf %20, %23 : vector<256x128xf32>
    %c0_33 = arith.constant 0 : index
    %c0_34 = arith.constant 0 : index
    %25 = vector.load %arg5[%c0_33, %c0_34] : memref<256x128xf32, #tpu.memory_space<vmem>>, vector<256x128xf32>
    tpu.vector_store %arg5[%c0_33, %c0_34], %24 {strides = array<i32>} : memref<256x128xf32, #tpu.memory_space<vmem>>, vector<256x128xf32>,
    %c0_35 = arith.constant 0 : index
    %c1_36 = arith.constant 1 : index
    %c0_37 = arith.constant 0 : index
    %c0_38 = arith.constant 0 : index
    %26 = vector.load %arg1[%c0_35, %c1_36, %c0_37, %c0_38] : memref<1x18x18x128xbf16, #tpu.memory_space<vmem>>, vector<1x16x16x128xbf16>
    %27 = vector.shape_cast %26 : vector<1x16x16x128xbf16> to vector<256x128xbf16>
    %c0_39 = arith.constant 0 : index
    %c0_40 = arith.constant 0 : index
    %28 = vector.load %arg5[%c0_39, %c0_40] : memref<256x128xf32, #tpu.memory_space<vmem>>, vector<256x128xf32>
    %c3 = arith.constant 3 : index
    %c0_41 = arith.constant 0 : index
    %c0_42 = arith.constant 0 : index
    %29 = vector.load %arg2[%c3, %c0_41, %c0_42] : memref<9x128x128xbf16, #tpu.memory_space<vmem>>, vector<1x128x128xbf16>
    %30 = vector.shape_cast %29 : vector<1x128x128xbf16> to vector<128x128xbf16>
    %cst_43 = arith.constant dense<0.000000e+00> : vector<256x128xf32>
    %31 = tpu.matmul %27, %30, %cst_43 {dimension_numbers = #tpu.dot_dimension_numbers<[1], [0], [0], [1], [0, 0, 1, 1], [], []>} : vector<256x128xbf16>, vector<128x128xbf16>, vector<256x128xf32> -> vector<256x128xf32>
    %32 = arith.addf %28, %31 : vector<256x128xf32>
    %c0_44 = arith.constant 0 : index
    %c0_45 = arith.constant 0 : index
    %33 = vector.load %arg5[%c0_44, %c0_45] : memref<256x128xf32, #tpu.memory_space<vmem>>, vector<256x128xf32>
    tpu.vector_store %arg5[%c0_44, %c0_45], %32 {strides = array<i32>} : memref<256x128xf32, #tpu.memory_space<vmem>>, vector<256x128xf32>,
    %c0_46 = arith.constant 0 : index
    %c1_47 = arith.constant 1 : index
    %c1_48 = arith.constant 1 : index
    %c0_49 = arith.constant 0 : index
    %34 = vector.load %arg1[%c0_46, %c1_47, %c1_48, %c0_49] : memref<1x18x18x128xbf16, #tpu.memory_space<vmem>>, vector<1x16x16x128xbf16>
    %35 = vector.shape_cast %34 : vector<1x16x16x128xbf16> to vector<256x128xbf16>
    %c0_50 = arith.constant 0 : index
    %c0_51 = arith.constant 0 : index
    %36 = vector.load %arg5[%c0_50, %c0_51] : memref<256x128xf32, #tpu.memory_space<vmem>>, vector<256x128xf32>
    %c4 = arith.constant 4 : index
    %c0_52 = arith.constant 0 : index
    %c0_53 = arith.constant 0 : index
    %37 = vector.load %arg2[%c4, %c0_52, %c0_53] : memref<9x128x128xbf16, #tpu.memory_space<vmem>>, vector<1x128x128xbf16>
    %38 = vector.shape_cast %37 : vector<1x128x128xbf16> to vector<128x128xbf16>
    %cst_54 = arith.constant dense<0.000000e+00> : vector<256x128xf32>
    %39 = tpu.matmul %35, %38, %cst_54 {dimension_numbers = #tpu.dot_dimension_numbers<[1], [0], [0], [1], [0, 0, 1, 1], [], []>} : vector<256x128xbf16>, vector<128x128xbf16>, vector<256x128xf32> -> vector<256x128xf32>
    %40 = arith.addf %36, %39 : vector<256x128xf32>
    %c0_55 = arith.constant 0 : index
    %c0_56 = arith.constant 0 : index
    %41 = vector.load %arg5[%c0_55, %c0_56] : memref<256x128xf32, #tpu.memory_space<vmem>>, vector<256x128xf32>
    tpu.vector_store %arg5[%c0_55, %c0_56], %40 {strides = array<i32>} : memref<256x128xf32, #tpu.memory_space<vmem>>, vector<256x128xf32>,
    %c0_57 = arith.constant 0 : index
    %c1_58 = arith.constant 1 : index
    %c2_59 = arith.constant 2 : index
    %c0_60 = arith.constant 0 : index
    %42 = vector.load %arg1[%c0_57, %c1_58, %c2_59, %c0_60] : memref<1x18x18x128xbf16, #tpu.memory_space<vmem>>, vector<1x16x16x128xbf16>
    %43 = vector.shape_cast %42 : vector<1x16x16x128xbf16> to vector<256x128xbf16>
    %c0_61 = arith.constant 0 : index
    %c0_62 = arith.constant 0 : index
    %44 = vector.load %arg5[%c0_61, %c0_62] : memref<256x128xf32, #tpu.memory_space<vmem>>, vector<256x128xf32>
    %c5 = arith.constant 5 : index
    %c0_63 = arith.constant 0 : index
    %c0_64 = arith.constant 0 : index
    %45 = vector.load %arg2[%c5, %c0_63, %c0_64] : memref<9x128x128xbf16, #tpu.memory_space<vmem>>, vector<1x128x128xbf16>
    %46 = vector.shape_cast %45 : vector<1x128x128xbf16> to vector<128x128xbf16>
    %cst_65 = arith.constant dense<0.000000e+00> : vector<256x128xf32>
    %47 = tpu.matmul %43, %46, %cst_65 {dimension_numbers = #tpu.dot_dimension_numbers<[1], [0], [0], [1], [0, 0, 1, 1], [], []>} : vector<256x128xbf16>, vector<128x128xbf16>, vector<256x128xf32> -> vector<256x128xf32>
    %48 = arith.addf %44, %47 : vector<256x128xf32>
    %c0_66 = arith.constant 0 : index
    %c0_67 = arith.constant 0 : index
    %49 = vector.load %arg5[%c0_66, %c0_67] : memref<256x128xf32, #tpu.memory_space<vmem>>, vector<256x128xf32>
    tpu.vector_store %arg5[%c0_66, %c0_67], %48 {strides = array<i32>} : memref<256x128xf32, #tpu.memory_space<vmem>>, vector<256x128xf32>,
    %c0_68 = arith.constant 0 : index
    %c2_69 = arith.constant 2 : index
    %c0_70 = arith.constant 0 : index
    %c0_71 = arith.constant 0 : index
    %50 = vector.load %arg1[%c0_68, %c2_69, %c0_70, %c0_71] : memref<1x18x18x128xbf16, #tpu.memory_space<vmem>>, vector<1x16x16x128xbf16>
    %51 = vector.shape_cast %50 : vector<1x16x16x128xbf16> to vector<256x128xbf16>
    %c0_72 = arith.constant 0 : index
    %c0_73 = arith.constant 0 : index
    %52 = vector.load %arg5[%c0_72, %c0_73] : memref<256x128xf32, #tpu.memory_space<vmem>>, vector<256x128xf32>
    %c6 = arith.constant 6 : index
    %c0_74 = arith.constant 0 : index
    %c0_75 = arith.constant 0 : index
    %53 = vector.load %arg2[%c6, %c0_74, %c0_75] : memref<9x128x128xbf16, #tpu.memory_space<vmem>>, vector<1x128x128xbf16>
    %54 = vector.shape_cast %53 : vector<1x128x128xbf16> to vector<128x128xbf16>
    %cst_76 = arith.constant dense<0.000000e+00> : vector<256x128xf32>
    %55 = tpu.matmul %51, %54, %cst_76 {dimension_numbers = #tpu.dot_dimension_numbers<[1], [0], [0], [1], [0, 0, 1, 1], [], []>} : vector<256x128xbf16>, vector<128x128xbf16>, vector<256x128xf32> -> vector<256x128xf32>
    %56 = arith.addf %52, %55 : vector<256x128xf32>
    %c0_77 = arith.constant 0 : index
    %c0_78 = arith.constant 0 : index
    %57 = vector.load %arg5[%c0_77, %c0_78] : memref<256x128xf32, #tpu.memory_space<vmem>>, vector<256x128xf32>
    tpu.vector_store %arg5[%c0_77, %c0_78], %56 {strides = array<i32>} : memref<256x128xf32, #tpu.memory_space<vmem>>, vector<256x128xf32>,
    %c0_79 = arith.constant 0 : index
    %c2_80 = arith.constant 2 : index
    %c1_81 = arith.constant 1 : index
    %c0_82 = arith.constant 0 : index
    %58 = vector.load %arg1[%c0_79, %c2_80, %c1_81, %c0_82] : memref<1x18x18x128xbf16, #tpu.memory_space<vmem>>, vector<1x16x16x128xbf16>
    %59 = vector.shape_cast %58 : vector<1x16x16x128xbf16> to vector<256x128xbf16>
    %c0_83 = arith.constant 0 : index
    %c0_84 = arith.constant 0 : index
    %60 = vector.load %arg5[%c0_83, %c0_84] : memref<256x128xf32, #tpu.memory_space<vmem>>, vector<256x128xf32>
    %c7 = arith.constant 7 : index
    %c0_85 = arith.constant 0 : index
    %c0_86 = arith.constant 0 : index
    %61 = vector.load %arg2[%c7, %c0_85, %c0_86] : memref<9x128x128xbf16, #tpu.memory_space<vmem>>, vector<1x128x128xbf16>
    %62 = vector.shape_cast %61 : vector<1x128x128xbf16> to vector<128x128xbf16>
    %cst_87 = arith.constant dense<0.000000e+00> : vector<256x128xf32>
    %63 = tpu.matmul %59, %62, %cst_87 {dimension_numbers = #tpu.dot_dimension_numbers<[1], [0], [0], [1], [0, 0, 1, 1], [], []>} : vector<256x128xbf16>, vector<128x128xbf16>, vector<256x128xf32> -> vector<256x128xf32>
    %64 = arith.addf %60, %63 : vector<256x128xf32>
    %c0_88 = arith.constant 0 : index
    %c0_89 = arith.constant 0 : index
    %65 = vector.load %arg5[%c0_88, %c0_89] : memref<256x128xf32, #tpu.memory_space<vmem>>, vector<256x128xf32>
    tpu.vector_store %arg5[%c0_88, %c0_89], %64 {strides = array<i32>} : memref<256x128xf32, #tpu.memory_space<vmem>>, vector<256x128xf32>,
    %c0_90 = arith.constant 0 : index
    %c2_91 = arith.constant 2 : index
    %c2_92 = arith.constant 2 : index
    %c0_93 = arith.constant 0 : index
    %66 = vector.load %arg1[%c0_90, %c2_91, %c2_92, %c0_93] : memref<1x18x18x128xbf16, #tpu.memory_space<vmem>>, vector<1x16x16x128xbf16>
    %67 = vector.shape_cast %66 : vector<1x16x16x128xbf16> to vector<256x128xbf16>
    %c0_94 = arith.constant 0 : index
    %c0_95 = arith.constant 0 : index
    %68 = vector.load %arg5[%c0_94, %c0_95] : memref<256x128xf32, #tpu.memory_space<vmem>>, vector<256x128xf32>
    %c8 = arith.constant 8 : index
    %c0_96 = arith.constant 0 : index
    %c0_97 = arith.constant 0 : index
    %69 = vector.load %arg2[%c8, %c0_96, %c0_97] : memref<9x128x128xbf16, #tpu.memory_space<vmem>>, vector<1x128x128xbf16>
    %70 = vector.shape_cast %69 : vector<1x128x128xbf16> to vector<128x128xbf16>
    %cst_98 = arith.constant dense<0.000000e+00> : vector<256x128xf32>
    %71 = tpu.matmul %67, %70, %cst_98 {dimension_numbers = #tpu.dot_dimension_numbers<[1], [0], [0], [1], [0, 0, 1, 1], [], []>} : vector<256x128xbf16>, vector<128x128xbf16>, vector<256x128xf32> -> vector<256x128xf32>
    %72 = arith.addf %68, %71 : vector<256x128xf32>
    %c0_99 = arith.constant 0 : index
    %c0_100 = arith.constant 0 : index
    %73 = vector.load %arg5[%c0_99, %c0_100] : memref<256x128xf32, #tpu.memory_space<vmem>>, vector<256x128xf32>
    tpu.vector_store %arg5[%c0_99, %c0_100], %72 {strides = array<i32>} : memref<256x128xf32, #tpu.memory_space<vmem>>, vector<256x128xf32>,
    %c0_101 = arith.constant 0 : index
    %c0_102 = arith.constant 0 : index
    %74 = vector.load %arg5[%c0_101, %c0_102] : memref<256x128xf32, #tpu.memory_space<vmem>>, vector<256x128xf32>
    %75 = vector.shape_cast %74 : vector<256x128xf32> to vector<1x16x16x128xf32>
    %c0_103 = arith.constant 0 : index
    %c0_104 = arith.constant 0 : index
    %c0_105 = arith.constant 0 : index
    %c0_106 = arith.constant 0 : index
    %76 = vector.load %arg3[%c0_103, %c0_104, %c0_105, %c0_106] : memref<1x16x16x128xf32, #tpu.memory_space<vmem>>, vector<1x16x16x128xf32>
    tpu.vector_store %arg3[%c0_103, %c0_104, %c0_105, %c0_106], %75 {strides = array<i32>} : memref<1x16x16x128xf32, #tpu.memory_space<vmem>>, vector<1x16x16x128xf32>,
    %cst_107 = arith.constant dense<0.000000e+00> : vector<128xf32>
    %77 = vector.multi_reduction <add>, %74, %cst_107 [0] : vector<256x128xf32> to vector<128xf32>
    %78 = vector.shape_cast %77 : vector<128xf32> to vector<1x128xf32>
    %79 = arith.mulf %74, %74 : vector<256x128xf32>
    %cst_108 = arith.constant dense<0.000000e+00> : vector<128xf32>
    %80 = vector.multi_reduction <add>, %79, %cst_108 [0] : vector<256x128xf32> to vector<128xf32>
    %81 = vector.shape_cast %80 : vector<128xf32> to vector<1x128xf32>
    %82 = tpu.concatenate %78, %81 in 0 : vector<1x128xf32>, vector<1x128xf32> -> vector<2x128xf32>
    %83 = vector.shape_cast %82 : vector<2x128xf32> to vector<1x2x128xf32>
    %c0_109 = arith.constant 0 : index
    %c0_110 = arith.constant 0 : index
    %c0_111 = arith.constant 0 : index
    %84 = vector.load %arg4[%c0_109, %c0_110, %c0_111] : memref<1x2x128xf32, #tpu.memory_space<vmem>>, vector<1x2x128xf32>
    tpu.vector_store %arg4[%c0_109, %c0_110, %c0_111], %83 {strides = array<i32>} : memref<1x2x128xf32, #tpu.memory_space<vmem>>, vector<1x2x128xf32>,
    return
  }
  func.func @transform_0(%arg0: i32) -> (i32, i32, i32, i32) {
    %c0_i32 = arith.constant 0 : i32
    %c0_i32_0 = arith.constant 0 : i32
    %c0_i32_1 = arith.constant 0 : i32
    %c0_i32_2 = arith.constant 0 : i32
    return %arg0, %c0_i32, %c0_i32_0, %c0_i32_1 : i32, i32, i32, i32
  }
  func.func @transform_1(%arg0: i32) -> (i32, i32, i32) {
    %c0_i32 = arith.constant 0 : i32
    %c0_i32_0 = arith.constant 0 : i32
    %c0_i32_1 = arith.constant 0 : i32
    %c0_i32_2 = arith.constant 0 : i32
    return %c0_i32, %c0_i32_0, %c0_i32_1 : i32, i32, i32
  }
  func.func @transform_2(%arg0: i32) -> (i32, i32, i32, i32) {
    %c0_i32 = arith.constant 0 : i32
    %c0_i32_0 = arith.constant 0 : i32
    %c0_i32_1 = arith.constant 0 : i32
    %c0_i32_2 = arith.constant 0 : i32
    return %arg0, %c0_i32, %c0_i32_0, %c0_i32_1 : i32, i32, i32, i32
  }
  func.func @transform_3(%arg0: i32) -> (i32, i32, i32) {
    %c0_i32 = arith.constant 0 : i32
    %c0_i32_0 = arith.constant 0 : i32
    %c0_i32_1 = arith.constant 0 : i32
    return %arg0, %c0_i32, %c0_i32_0 : i32, i32, i32
  }
}

</mosaic_0001>

<bundles_post_ra>
// kernel: tpu_custom_call.1
= control target key start
LH: loop header
LB: loop body
LE: loop exit
PB: predicated region body
PF: predicated region fallthrough
CT: control target
= control target key end

     0   :  { %9 = vsyncpa [#allocation4], 0  ;;  %s9623_s0 = inlined_call_operand.vmem [shape: bf16[2,18,18,128], index: 0, kind: input, shape index: {}]   ;;  %s9624_s1 = inlined_call_operand.vmem [shape: bf16[9,128,128], index: 1, kind: input, shape index: {}]   ;;  %s9625_s2 = inlined_call_operand.hbm [shape: f32[2,16,16,128], index: 2, kind: output, shape index: {0}]   ;;  %s9626_s3 = inlined_call_operand.hbm [shape: f32[2,2,128], index: 3, kind: output, shape index: {1}]  }
   0x1   :  { %11 = vsyncpa [#allocation4 + $0x1], 0 }
   0x2   :  { %12 = vsyncpa [#allocation6], 0 }
   0x3   :  { %14 = vsyncpa [#allocation6 + $0x1], 0  ;;  %s7715_s12 = smov 0   ;;  %s7717_s13 = smov 0  }
   0x4   :  { %s7719_s14 = smov 0   ;;  %s7721_s15 = smov 0  }
   0x5 LB: > { %s7736_s16 = sadd.s32 4294967295, %s7689_s15   ;;  %s6105_s17 = sadd.s32 4294967294, %s7689_s15   ;;  %s7689_s15 = sphi %s7721_s15, %s9727_s15   ;;  %s7685_s14 = sphi %s7719_s14, %s9726_s14   ;;  %s7681_s13 = sphi %s7717_s13, %s9725_s13   ;;  %s7677_s12 = sphi %s7715_s12, %s9724_s12  }
   0x6   : > { %s7740_s18 = sadd.s32 1, %s7689_s15   ;;  %s74_s19 = sadd.s32 1, %s7685_s14 }
   0x7   : > { %s71_s20 = ssub.s32 %s7689_s15, %s7740_s18  ;;  %p84_p0 = scmp.ne.s32.totalorder %s7685_s14, %s7681_s13 }
   0x8   : > { %p72_p1 = scmp.eq.s32.totalorder %s71_s20, 0  ;;  %p85_p2 = scmp.eq.s32.totalorder %s7736_s16, 1 }
   0x9   : > { %p90_p3 = scmp.ne.s32.totalorder %s7681_s13, %s7677_s12  ;;  %p91_p4 = scmp.eq.s32.totalorder %s6105_s17, 1 }
   0xa   : > { %s7751_s21 = scalar_select %p72_p1, %s7685_s14, %s74_s19  }
   0xb   : > { %p7753_p5 = por %p85_p2, %p84_p0  ;;  %p7757_p6 = por %p91_p4, %p90_p3 }
   0xc   : > { %p6108_p7 = scmp.ge.s32.totalorder %s7689_s15, 1  ;;  %p146_p8 = scmp.lt.s32.totalorder %s7689_s15, 3 }
   0xe   : > { %p147_p9 = pnand %p6108_p7, %p146_p8 }
  0x10   : > { %150 = sbr.rel (%p147_p9) target bundleno = 641 (0x281), region = 28 }
  0x15   : > { %v7479_v0 = vld [vmem:[%s9624_s1 + $0x38] sm:$0xff]   ;;  %p175_p10 = scmp.lt.s32.totalorder %s7736_s16, 1  ;;  %v7480_v1 = vld [vmem:[%s9624_s1 + $0x30] sm:$0xff]   ;;  %v7481_v2 = vld [vmem:[%s9624_s1 + $0x28] sm:$0xff]   ;;  %vm1579_vm0 = vcmask 1042432   ;;  %vm1580_vm1 = vcmask 1046532  }
  0x16   : > { %6984 = vmatprep.subr.bf16.mxu0 %v7479_v0  ;;  %7416 = vmatprep.subr.bf16.mxu1 %v7479_v0  ;;  %v7482_v3 = vld [vmem:[%s9624_s1 + $0x20] sm:$0xff]   ;;  %v7483_v6 = vld [vmem:[%s9624_s1 + $0x18] sm:$0xff]   ;;  %v7484_v7 = vld [vmem:[%s9624_s1 + $0x10] sm:$0xff]   ;;  %vm710_vm2 = vsmask.f32 3328  ;;  %s6767_s17 = sshll.u32 %s7736_s16, 12 }
  0x17   : > { %s176_s28 = scalar_select %p175_p10, %s7736_s16, 1  ;;  %6985 = vmatpush3.bf16.msra.mxu0 %v7479_v0  ;;  %7424 = vmatpush3.bf16.msra.mxu1 %v7479_v0  ;;  %v7485_v8 = vld [vmem:[%s9624_s1 + $0x8] sm:$0xff]   ;;  %v7486_v9 = vld [vmem:[%s9624_s1] sm:$0xff]   ;;  %v7491_v10 = vld [vmem:[%s9624_s1 + $0x78] sm:$0xff]   ;;  %vm711_vm3 = vsmask.f32 7440 }
  0x18   : > { %6986 = vmatprep.subr.bf16.mxu0 %v7480_v1  ;;  %7417 = vmatprep.subr.bf16.mxu1 %v7480_v1  ;;  %v7492_v12 = vld [vmem:[%s9624_s1 + $0xb8] sm:$0xff]   ;;  %v7493_v14 = vld [vmem:[%s9624_s1 + $0x70] sm:$0xff]   ;;  %v7499_v18 = vld [vmem:[%s9624_s1 + $0x68] sm:$0xff]   ;;  %s9553_s25 = scalar_lea.hbm %s9625_s2, %s6767_s17 }
  0x19   : > { %s7432_s4 = smul.u32 216, %s176_s28  ;;  %v7494_v15 = vld [vmem:[%s9624_s1 + $0xb0] sm:$0xff]   ;;  %v7500_v20 = vld [vmem:[%s9624_s1 + $0xa8] sm:$0xff]   ;;  %v7501_v22 = vld [vmem:[%s9624_s1 + $0x60] sm:$0xff]   ;;  %s7691_s28 = smov [#allocation3]  }
  0x1a   : > { %v7502_v23 = vld [vmem:[%s9624_s1 + $0xa0] sm:$0xff]   ;;  %v7834_v31 = vld [vmem:[%s9624_s1 + $0x58] sm:$0xff]   ;;  %vm7848_vm4 = vmor %vm1579_vm0, %vm1580_vm1  ;;  %s7603_s29 = sshll.u32 %s7691_s28, 4  ;;  %s7604_s29 = int_to_ptr.vmem [resolvable:$false] %s7603_s29 }
  0x1b   : > { %s7777_s7 = scalar_lea.vmem %s9623_s0, %s7432_s4  ;;  %6987 = vmatpush3.bf16.msra.mxu0 %v7480_v1  ;;  %7425 = vmatpush3.bf16.msra.mxu1 %v7480_v1  ;;  %v7839_v32 = vld [vmem:[%s9624_s1 + $0x98] sm:$0xff]   ;;  %v7858_v54 = vld [vmem:[%s9624_s1 + $0x50] sm:$0xff]   ;;  %vm7867_vm5 = vmor %vm710_vm2, %vm711_vm3  ;;  %s7605_s30 = scalar_lea.vmem %s7604_s29, 8192 }
  0x1c   : > { %6988 = vmatprep.subr.bf16.mxu0 %v7481_v2  ;;  %7418 = vmatprep.subr.bf16.mxu1 %v7481_v2  ;;  %v7487_v4 = vld [vmem:[%s7777_s7] sm:$0xff]   ;;  %v7489_v11 = vld [vmem:[%s7777_s7 + $0xc] sm:$0xff]   ;;  %v7495_v16 = vld [vmem:[%s7777_s7 + $0x18] sm:$0xff]  }
  0x1d   : > { %v7488_v5 = vld [vmem:[%s7777_s7 + $0x60] sm:$0xff]   ;;  %7000 = vmatprep.mubr.bf16.mxu0 %v7487_v4  ;;  %v7490_v13 = vld [vmem:[%s7777_s7 + $0x6c] sm:$0xff]   ;;  %v7496_v17 = vld [vmem:[%s7777_s7 + $0x78] sm:$0xff]  }
  0x1e   : > { %7016 = vmatprep.mubr.bf16.mxu1 %v7488_v5  ;;  %v7497_v19 = vld [vmem:[%s7777_s7 + $0x24] sm:$0xff]   ;;  %v7503_v24 = vld [vmem:[%s7777_s7 + $0x30] sm:$0xff]   ;;  %v662_v26 = vld [vmem:[%s7777_s7] sm:$0xf] }
  0x1f   : > { %6989 = vmatpush3.bf16.msra.mxu0 %v7481_v2  ;;  %7426 = vmatpush3.bf16.msra.mxu1 %v7481_v2  ;;  %v7498_v21 = vld [vmem:[%s7777_s7 + $0x84] sm:$0xff]   ;;  %v7504_v25 = vld [vmem:[%s7777_s7 + $0x90] sm:$0xff]   ;;  %v714_v29 = vshrl.u32 %v662_v26, 16  ;;  %v717_v30 = vshll.u32 %v662_v26, 16  ;;  %v1483_v36 = vld [vmem:[%s7777_s7] sm:$0xe] }
  0x20   : > { %6990 = vmatprep.subr.bf16.mxu0 %v7482_v3  ;;  %7419 = vmatprep.subr.bf16.mxu1 %v7482_v3  ;;  %v663_v27 = vld [vmem:[%s7777_s7 + $0x4] sm:$0xf]  ;;  %v664_v28 = vld [vmem:[%s7777_s7 + $0x8] sm:$0x1]  ;;  %v7505_v41 = vld [vmem:[%s7777_s7 + $0x3c] sm:$0xff]   ;;  %v6176_v47 = vrot.slane %v1483_v36, 9 }
  0x21   : > { %v723_v33 = vshll.u32 %v663_v27, 16  ;;  %v727_v34 = vshrl.u32 %v663_v27, 16  ;;  %v733_v35 = vshll.u32 %v664_v28, 16  ;;  %v716_v37 = vrot.slane %v714_v29, 4  ;;  %v1484_v39 = vld [vmem:[%s7777_s7 + $0x4] sm:$0xf] }
  0x22   : > { %v719_v38 = vrot.slane %v717_v30, 5  ;;  %v1485_v40 = vld [vmem:[%s7777_s7 + $0x8] sm:$0x1]  ;;  %v7506_v42 = vld [vmem:[%s7777_s7 + $0x9c] sm:$0xff]   ;;  %v665_v48 = vld [vmem:[%s7777_s7 + $0xc] sm:$0xf] }
  0x23   : > { %6991 = vmatpush3.bf16.msra.mxu0 %v7482_v3  ;;  %7427 = vmatpush3.bf16.msra.mxu1 %v7482_v3  ;;  %v725_v43 = vrot.slane %v723_v33, 5  ;;  %v729_v44 = vrot.slane %v727_v34, 4  ;;  %v735_v45 = vrot.slane %v733_v35, 5  ;;  %v1584_v50 = vrot.slane %v1484_v39, 5  ;;  %v666_v52 = vld [vmem:[%s7777_s7 + $0x10] sm:$0xf] }
  0x24   : > { %6992 = vmatprep.subr.bf16.mxu0 %v7483_v6  ;;  %7420 = vmatprep.subr.bf16.mxu1 %v7483_v6  ;;  %v720_v49 = vor.u32 %v719_v38, %v716_v37  ;;  %v1587_v51 = vrot.slane %v1485_v40, 5  ;;  %v667_v53 = vld [vmem:[%s7777_s7 + $0x14] sm:$0x1]  ;;  %v738_v58 = vshrl.u32 %v665_v48, 16  ;;  %v741_v59 = vshll.u32 %v665_v48, 16  ;;  %v7511_v62 = vld [vmem:[%s7777_s7 + $0x48] sm:$0xff]  }
  0x25   : > { %v7863_v55 = vld [vmem:[%s9624_s1 + $0x90] sm:$0xff]   ;;  %v730_v57 = vor.u32 %v729_v44, %v725_v43  ;;  %v747_v60 = vshll.u32 %v666_v52, 16  ;;  %v1486_v61 = vld [vmem:[%s7777_s7 + $0xc] sm:$0xe]  ;;  %v7876_v1 = vsel %vm7848_vm4, %v6176_v47, %v1584_v50  ;;  %v1586_v2 = vrot.slane %v1584_v50, 4  ;;  %v7517_v38 = vld [vmem:[%s9624_s1 + $0x40] sm:$0xff]  }
  0x26   : > { %v7512_v63 = vld [vmem:[%s7777_s7 + $0xa8] sm:$0xff]   ;;  %v721_v0 = vrot.slane %v720_v49, 4  ;;  %v751_v3 = vshrl.u32 %v666_v52, 16  ;;  %v1487_v4 = vld [vmem:[%s7777_s7 + $0x10] sm:$0xf]  ;;  %v7513_v26 = vld [vmem:[%s7777_s7 + $0x54] sm:$0xff]  }
  0x27   : > { %6993 = vmatpush3.bf16.msra.mxu0 %v7483_v6  ;;  %7428 = vmatpush3.bf16.msra.mxu1 %v7483_v6  ;;  %v731_v5 = vrot.slane %v730_v57, 4  ;;  %v740_v6 = vrot.slane %v738_v58, 4  ;;  %v670_v29 = vld [vmem:[%s7777_s7 + $0x20] sm:$0x1]  ;;  %v1489_v37 = vld [vmem:[%s7777_s7 + $0x18] sm:$0xe] }
  0x28   : > { %6994 = vmatprep.subr.bf16.mxu0 %v7484_v7  ;;  %7421 = vmatprep.subr.bf16.mxu1 %v7484_v7  ;;  %v781_v48 = vshll.u32 %v670_v29, 16  ;;  %v1491_v49 = vld [vmem:[%s7777_s7 + $0x20] sm:$0x1]  ;;  %v671_v50 = vld [vmem:[%s7777_s7 + $0x24] sm:$0xf] }
  0x29   : > { %v672_v57 = vld [vmem:[%s7777_s7 + $0x28] sm:$0xf]  ;;  %v673_v58 = vld [vmem:[%s7777_s7 + $0x2c] sm:$0x1]  ;;  %v674_v29 = vld [vmem:[%s7777_s7 + $0x30] sm:$0xf] }
  0x2b   : > { %6995 = vmatpush3.bf16.msra.mxu0 %v7484_v7  ;;  %7429 = vmatpush3.bf16.msra.mxu1 %v7484_v7  ;;  %v743_v7 = vrot.slane %v741_v59, 5  ;;  %v783_v59 = vrot.slane %v781_v48, 5 }
  0x2c   : > { %6996 = vmatprep.subr.bf16.mxu0 %v7485_v8  ;;  %7422 = vmatprep.subr.bf16.mxu1 %v7485_v8 }
  0x2f   : > { %6997 = vmatpush3.bf16.msra.mxu0 %v7485_v8  ;;  %7430 = vmatpush3.bf16.msra.mxu1 %v7485_v8  ;;  %v749_v8 = vrot.slane %v747_v60, 5  ;;  %v6178_v60 = vrot.slane %v1489_v37, 9 }
  0x30   : > { %6998 = vmatprep.subr.bf16.mxu0 %v7486_v9  ;;  %7423 = vmatprep.subr.bf16.mxu1 %v7486_v9 }
  0x33   : > { %6999 = vmatpush3.bf16.msra.mxu0 %v7486_v9  ;;  %7431 = vmatpush3.bf16.msra.mxu1 %v7486_v9  ;;  %v1488_v9 = vld [vmem:[%s7777_s7 + $0x14] sm:$0x1] }
  0x34   : > { %7032 = vmatprep.subr.bf16.mxu1 %v7491_v10  ;;  %7080 = vmatprep.subr.bf16.mxu0 %v7492_v12  ;;  %v1594_v28 = vrot.slane %v1488_v9, 5  ;;  %v795_v9 = vshll.u32 %v672_v57, 16 }
  0x36   : > { %7001 = vmatmul.mubr.bf16.vlgmr.msra.gmra.mxu0 %v7489_v11  ;;  %7017 = vmatmul.mubr.bf16.vlgmr.msra.gmra.mxu1 %v7490_v13  ;;  %v7886_v11 = vsel %vm7848_vm4, %v1586_v2, %v1587_v51  ;;  %v757_v13 = vshll.u32 %v667_v53, 16  ;;  %v7518_v51 = vld [vmem:[%s9624_s1 + $0x80] sm:$0xff]  }
  0x37   : > { %7033 = vmatpush3.bf16.msra.mxu1 %v7491_v10  ;;  %7081 = vmatpush3.bf16.msra.mxu0 %v7492_v12  ;;  %v726_v10 = vsel %vm7867_vm5, %v721_v0, %v725_v43  ;;  %v753_v12 = vrot.slane %v751_v3, 4  ;;  %v1490_v43 = vld [vmem:[%s7777_s7 + $0x1c] sm:$0xf]  ;;  %v786_v3 = vshrl.u32 %v671_v50, 16 }
  0x38   : > { %7034 = vmatprep.subr.bf16.mxu1 %v7493_v14  ;;  %7082 = vmatprep.subr.bf16.mxu0 %v7494_v15 }
  0x39   : > { %7004 = vmatprep.mubr.bf16.mxu0 %v7495_v16  ;;  %7020 = vmatprep.mubr.bf16.mxu1 %v7496_v17  ;;  %v736_v16 = vsel %vm7867_vm5, %v731_v5, %v735_v45  ;;  %v6208_v17 = vcombine.low %v7876_v1, %v7886_v11  ;;  %v1493_v5 = vld [vmem:[%s7777_s7 + $0x28] sm:$0xf] }
  0x3b   : > { %7035 = vmatpush3.bf16.msra.mxu1 %v7493_v14  ;;  %7083 = vmatpush3.bf16.msra.mxu0 %v7494_v15  ;;  %v7891_v14 = vld [vmem:[%s9624_s1 + $0x48] sm:$0xff]  }
  0x3c   : > { %7036 = vmatprep.subr.bf16.mxu1 %v7499_v18  ;;  %7084 = vmatprep.subr.bf16.mxu0 %v7500_v20  ;;  %v7896_v15 = vld [vmem:[%s9624_s1 + $0x88] sm:$0xff]  }
  0x3e   : > { %7005 = vmatmul.mubr.bf16.gmra.mxu0 %v7497_v19  ;;  %7021 = vmatmul.mubr.bf16.gmra.mxu1 %v7498_v21  ;;  %v6177_v19 = vrot.slane %v1486_v61, 9  ;;  %v754_v21 = vor.u32 %v753_v12, %v749_v8  ;;  %v1598_v61 = vrot.slane %v1490_v43, 5  ;;  %v1494_v12 = vld [vmem:[%s7777_s7 + $0x2c] sm:$0x1] }
  0x3f   : > { %7037 = vmatpush3.bf16.msra.mxu1 %v7499_v18  ;;  %7085 = vmatpush3.bf16.msra.mxu0 %v7500_v20  ;;  %v744_v18 = vor.u32 %v743_v7, %v740_v6  ;;  %v7904_v20 = vcombine.low %v726_v10, %v736_v16  ;;  %v7519_v6 = vld [vmem:[%s9624_s1 + $0xf8] sm:$0xff]   ;;  %v799_v10 = vshrl.u32 %v672_v57, 16  ;;  %v788_v16 = vrot.slane %v786_v3, 4 }
  0x40   : > { %7038 = vmatprep.subr.bf16.mxu1 %v7501_v22  ;;  %7086 = vmatprep.subr.bf16.mxu0 %v7502_v23  ;;  %v755_v33 = vrot.slane %v754_v21, 4  ;;  %v1599_v7 = vsel %vm7848_vm4, %v6178_v60, %v1598_v61  ;;  %v797_v21 = vrot.slane %v795_v9, 5  ;;  %v678_v60 = vld [vmem:[%s7777_s7 + $0x40] sm:$0xf] }
  0x41   : > { %7008 = vmatprep.mubr.bf16.mxu0 %v7503_v24  ;;  %7024 = vmatprep.mubr.bf16.mxu1 %v7504_v25  ;;  %v668_v24 = vld [vmem:[%s7777_s7 + $0x18] sm:$0xf]  ;;  %v669_v25 = vld [vmem:[%s7777_s7 + $0x1c] sm:$0xf]  ;;  %v745_v27 = vrot.slane %v744_v18, 4 }
  0x42   : > { %v762_v30 = vshrl.u32 %v668_v24, 16  ;;  %v771_v36 = vshll.u32 %v669_v25, 16  ;;  %v1499_v9 = vld [vmem:[%s7777_s7 + $0x40] sm:$0xf] }
  0x43   : > { %7039 = vmatpush3.bf16.msra.mxu1 %v7501_v22  ;;  %7087 = vmatpush3.bf16.msra.mxu0 %v7502_v23  ;;  %v759_v22 = vrot.slane %v757_v13, 5  ;;  %v1591_v23 = vrot.slane %v1487_v4, 5  ;;  %v750_v39 = vsel %vm7867_vm5, %v745_v27, %v749_v8  ;;  %v789_v4 = vshll.u32 %v671_v50, 16  ;;  %v7520_v13 = vld [vmem:[%s9624_s1 + $0x138] sm:$0xff]   ;;  %v7523_v50 = vld [vmem:[%s9624_s1 + $0xe8] sm:$0xff]  }
  0x44   : > { %7040 = vmatprep.subr.bf16.mxu1 %v7834_v31  ;;  %7088 = vmatprep.subr.bf16.mxu0 %v7839_v32  ;;  %v764_v40 = vrot.slane %v762_v30, 4  ;;  %v773_v47 = vrot.slane %v771_v36, 5  ;;  %v1600_v8 = vrot.slane %v1598_v61, 4  ;;  %v675_v30 = vld [vmem:[%s7777_s7 + $0x34] sm:$0xf]  ;;  %v813_v36 = vshll.u32 %v674_v29, 16 }
  0x45   : > { %v7915_v34 = vsel %vm7848_vm4, %v6177_v19, %v1591_v23  ;;  %v1593_v35 = vrot.slane %v1591_v23, 4  ;;  %v760_v44 = vsel %vm7867_vm5, %v755_v33, %v759_v22  ;;  %v791_v18 = vrot.slane %v789_v4, 5  ;;  %v676_v33 = vld [vmem:[%s7777_s7 + $0x38] sm:$0x1]  ;;  %v679_v61 = vld [vmem:[%s7777_s7 + $0x44] sm:$0x1] }
  0x46   : > { %7009 = vmatmul.mubr.bf16.gmra.mxu0 %v7505_v41  ;;  %7025 = vmatmul.mubr.bf16.gmra.mxu1 %v7506_v42  ;;  %v775_v42 = vshrl.u32 %v669_v25, 16  ;;  %v7939_v52 = vcombine.low %v750_v39, %v760_v44  ;;  %v801_v22 = vrot.slane %v799_v10, 4  ;;  %v805_v23 = vshll.u32 %v673_v58, 16  ;;  %v1498_v4 = vld [vmem:[%s7777_s7 + $0x3c] sm:$0xe] }
  0x47   : > { %7041 = vmatpush3.bf16.msra.mxu1 %v7834_v31  ;;  %7089 = vmatpush3.bf16.msra.mxu0 %v7839_v32  ;;  %v765_v31 = vshll.u32 %v668_v24, 16  ;;  %v7514_v32 = vld [vmem:[%s7777_s7 + $0xb4] sm:$0xff]   ;;  %v7930_v45 = vsel %vm7848_vm4, %v1593_v35, %v1594_v28  ;;  %v810_v35 = vshrl.u32 %v674_v29, 16  ;;  %v823_v48 = vshrl.u32 %v675_v30, 16 }
  0x48   : > { %7042 = vmatprep.subr.bf16.mxu1 %v7858_v54  ;;  %7090 = vmatprep.subr.bf16.mxu0 %v7863_v55  ;;  %v6209_v53 = vcombine.low %v7915_v34, %v7930_v45  ;;  %v802_v1 = vor.u32 %v801_v22, %v797_v21  ;;  %v807_v11 = vrot.slane %v805_v23, 5  ;;  %v7521_v28 = vld [vmem:[%s9624_s1 + $0xf0] sm:$0xff]   ;;  %v7525_v22 = vld [vmem:[%s9624_s1 + $0xe0] sm:$0xff]   ;;  %v8026_v29 = vld [vmem:[%s9624_s1 + $0x118] sm:$0xff]  }
  0x49   : > { %7012 = vmatprep.mubr.bf16.mxu0 %v7511_v62  ;;  %7028 = vmatprep.mubr.bf16.mxu1 %v7512_v63  ;;  %v767_v41 = vrot.slane %v765_v31, 5  ;;  %v1601_v62 = vrot.slane %v1491_v49, 5  ;;  %v1492_v63 = vld [vmem:[%s7777_s7 + $0x24] sm:$0xe]  ;;  %v812_v44 = vrot.slane %v810_v35, 4 }
  0x4a   : > { %v6179_v27 = vrot.slane %v1492_v63, 9  ;;  %v803_v37 = vrot.slane %v802_v1, 4  ;;  %v1496_v49 = vld [vmem:[%s7777_s7 + $0x34] sm:$0xf]  ;;  %v680_v35 = vld [vmem:[%s7777_s7 + $0x48] sm:$0xf] }
  0x4b   : > { %7043 = vmatpush3.bf16.msra.mxu1 %v7858_v54  ;;  %7091 = vmatpush3.bf16.msra.mxu0 %v7863_v55  ;;  %v768_v54 = vor.u32 %v767_v41, %v764_v40  ;;  %v777_v55 = vrot.slane %v775_v42, 4  ;;  %v1602_v19 = vsel %vm7848_vm4, %v1600_v8, %v1601_v62  ;;  %v7522_v40 = vld [vmem:[%s9624_s1 + $0x130] sm:$0xff]   ;;  %v819_v41 = vshll.u32 %v675_v30, 16  ;;  %v7524_v62 = vld [vmem:[%s9624_s1 + $0x128] sm:$0xff]  }
  0x4c   : > { %7044 = vmatprep.subr.bf16.mxu1 %v7891_v14  ;;  %7092 = vmatprep.subr.bf16.mxu0 %v7896_v15  ;;  %v6210_v25 = vcombine.low %v1599_v7, %v1602_v19  ;;  %v1495_v42 = vld [vmem:[%s7777_s7 + $0x30] sm:$0xe] }
  0x4d   : > { %v769_v0 = vrot.slane %v768_v54, 4  ;;  %v778_v2 = vor.u32 %v777_v55, %v773_v47  ;;  %v821_v45 = vrot.slane %v819_v41, 5  ;;  %v677_v54 = vld [vmem:[%s7777_s7 + $0x3c] sm:$0xf]  ;;  %v861_v41 = vshll.u32 %v680_v35, 16 }
  0x4e   : > { %7013 = vmatmul.mubr.bf16.gmra.mxu0 %v7513_v26  ;;  %7029 = vmatmul.mubr.bf16.gmra.mxu1 %v7514_v32  ;;  %v792_v26 = vor.u32 %v791_v18, %v788_v16  ;;  %v1608_v32 = vrot.slane %v1494_v12, 5  ;;  %v834_v7 = vshrl.u32 %v677_v54, 16  ;;  %v837_v8 = vshll.u32 %v677_v54, 16 }
  0x4f   : > { %7045 = vmatpush3.bf16.msra.mxu1 %v7891_v14  ;;  %7093 = vmatpush3.bf16.msra.mxu0 %v7896_v15  ;;  %v774_v14 = vsel %vm7867_vm5, %v769_v0, %v773_v47  ;;  %v779_v15 = vrot.slane %v778_v2, 4  ;;  %v815_v47 = vrot.slane %v813_v36, 5  ;;  %v6180_v0 = vrot.slane %v1495_v42, 9  ;;  %v681_v36 = vld [vmem:[%s7777_s7 + $0x4c] sm:$0xf] }
  0x50   : > { %7046 = vmatprep.subr.bf16.mxu1 %v7517_v38  ;;  %7094 = vmatprep.subr.bf16.mxu0 %v7518_v51  ;;  %v793_v31 = vrot.slane %v792_v26, 4  ;;  %v1612_v2 = vrot.slane %v1496_v49, 5  ;;  %v836_v19 = vrot.slane %v834_v7, 4  ;;  %v853_v26 = vshll.u32 %v679_v61, 16 }
  0x51   : > { %7048 = vmatprep.mubr.bf16.mxu1 %v7904_v20  ;;  %7096 = vmatprep.mubr.bf16.mxu0 %v6208_v17  ;;  %v784_v24 = vsel %vm7867_vm5, %v779_v15, %v783_v59  ;;  %v1605_v17 = vrot.slane %v1493_v5, 5  ;;  %v816_v58 = vor.u32 %v815_v47, %v812_v44  ;;  %v825_v59 = vrot.slane %v823_v48, 4  ;;  %v1500_v15 = vld [vmem:[%s7777_s7 + $0x44] sm:$0x1]  ;;  %v1501_v48 = vld [vmem:[%s7777_s7 + $0x48] sm:$0xe] }
  0x52   : > { %v6154_v20 = vcombine.low %v774_v14, %v784_v24  ;;  %v798_v43 = vsel %vm7867_vm5, %v793_v31, %v797_v21  ;;  %v1613_v10 = vsel %vm7848_vm4, %v6180_v0, %v1612_v2  ;;  %v1614_v12 = vrot.slane %v1612_v2, 4  ;;  %v684_v0 = vld [vmem:[%s7777_s7 + $0x58] sm:$0xf]  ;;  %v685_v2 = vld [vmem:[%s7777_s7 + $0x5c] sm:$0x1] }
  0x53   : > { %7047 = vmatpush3.bf16.msra.mxu1 %v7517_v38  ;;  %7095 = vmatpush3.bf16.msra.mxu0 %v7518_v51  ;;  %v1606_v38 = vsel %vm7848_vm4, %v6179_v27, %v1605_v17  ;;  %v1607_v39 = vrot.slane %v1605_v17, 4  ;;  %v808_v51 = vsel %vm7867_vm5, %v803_v37, %v807_v11  ;;  %v817_v5 = vrot.slane %v816_v58, 4  ;;  %v7526_v27 = vld [vmem:[%s9624_s1 + $0x120] sm:$0xff]   ;;  %v1503_v58 = vld [vmem:[%s7777_s7 + $0x50] sm:$0x1] }
  0x54   : > { %7128 = vmatprep.subr.bf16.mxu1 %v7519_v6  ;;  %7176 = vmatprep.subr.bf16.mxu0 %v7520_v13  ;;  %v6155_v55 = vcombine.low %v798_v43, %v808_v51  ;;  %v847_v14 = vshrl.u32 %v678_v60, 16  ;;  %v839_v21 = vrot.slane %v837_v8, 5  ;;  %v6181_v17 = vrot.slane %v1498_v4, 9  ;;  %v1504_v8 = vld [vmem:[%s7777_s7 + $0x54] sm:$0xe] }
  0x55   : > { %v1609_v34 = vsel %vm7848_vm4, %v1607_v39, %v1608_v32  ;;  %v822_v16 = vsel %vm7867_vm5, %v817_v5, %v821_v45  ;;  %v855_v32 = vrot.slane %v853_v26, 5  ;;  %v682_v39 = vld [vmem:[%s7777_s7 + $0x50] sm:$0x1]  ;;  %v867_v47 = vshll.u32 %v681_v36, 16  ;;  %v7531_v26 = vld [vmem:[%s9624_s1 + $0xc8] sm:$0xff]  }
  0x56   : > { %7049 = vmatmul.mubr.bf16.vlgmr.msra.gmra.mxu1 %v7939_v52  ;;  %7097 = vmatmul.mubr.bf16.vlgmr.msra.gmra.mxu0 %v6209_v53  ;;  %v829_v52 = vshll.u32 %v676_v33, 16  ;;  %v1497_v53 = vld [vmem:[%s7777_s7 + $0x38] sm:$0x1]  ;;  %v6211_v57 = vcombine.low %v1606_v38, %v1609_v34  ;;  %v840_v11 = vor.u32 %v839_v21, %v836_v19  ;;  %v1619_v33 = vrot.slane %v1499_v9, 5  ;;  %v1506_v21 = vld [vmem:[%s7777_s7 + $0x5c] sm:$0x1] }
  0x57   : > { %7129 = vmatpush3.bf16.msra.mxu1 %v7519_v6  ;;  %7177 = vmatpush3.bf16.msra.mxu0 %v7520_v13  ;;  %v1615_v3 = vrot.slane %v1497_v53, 5  ;;  %v826_v6 = vor.u32 %v825_v59, %v821_v45  ;;  %v843_v13 = vshll.u32 %v678_v60, 16  ;;  %v1622_v38 = vrot.slane %v1500_v15, 5  ;;  %v1502_v45 = vld [vmem:[%s7777_s7 + $0x4c] sm:$0xf] }
  0x58   : > { %7052 = vmatprep.mubr.bf16.mxu1 %v6154_v20  ;;  %7100 = vmatprep.mubr.bf16.mxu0 %v6210_v25  ;;  %v831_v63 = vrot.slane %v829_v52, 5  ;;  %v849_v25 = vrot.slane %v847_v14, 4  ;;  %v841_v37 = vrot.slane %v840_v11, 4  ;;  %v1620_v43 = vsel %vm7848_vm4, %v6181_v17, %v1619_v33  ;;  %v7529_v52 = vld [vmem:[%s9624_s1 + $0xd0] sm:$0xff]   ;;  %v1505_v14 = vld [vmem:[%s7777_s7 + $0x58] sm:$0xf] }
  0x59   : > { %7130 = vmatprep.subr.bf16.mxu1 %v7521_v28  ;;  %7178 = vmatprep.subr.bf16.mxu0 %v7522_v40  ;;  %v827_v18 = vrot.slane %v826_v6, 4  ;;  %v1616_v23 = vsel %vm7848_vm4, %v1614_v12, %v1615_v3  ;;  %v845_v24 = vrot.slane %v843_v13, 5  ;;  %v1621_v44 = vrot.slane %v1619_v33, 4  ;;  %v683_v59 = vld [vmem:[%s7777_s7 + $0x54] sm:$0xf]  ;;  %v7532_v17 = vld [vmem:[%s9624_s1 + $0x108] sm:$0xff]  }
  0x5a   : > { %v6212_v1 = vcombine.low %v1613_v10, %v1616_v23  ;;  %v863_v51 = vrot.slane %v861_v41, 5  ;;  %v871_v34 = vshrl.u32 %v681_v36, 16  ;;  %v7530_v3 = vld [vmem:[%s9624_s1 + $0x110] sm:$0xff]   ;;  %v6182_v5 = vrot.slane %v1501_v48, 9  ;;  %v8080_v33 = vld [vmem:[%s9624_s1 + $0x100] sm:$0xff]  }
  0x5b   : > { %7131 = vmatpush3.bf16.msra.mxu1 %v7521_v28  ;;  %7179 = vmatpush3.bf16.msra.mxu0 %v7522_v40  ;;  %v832_v20 = vsel %vm7867_vm5, %v827_v18, %v831_v63  ;;  %v8021_v28 = vld [vmem:[%s9624_s1 + $0xd8] sm:$0xff]   ;;  %v850_v31 = vor.u32 %v849_v25, %v845_v24  ;;  %v858_v40 = vshrl.u32 %v680_v35, 16  ;;  %v846_v49 = vsel %vm7867_vm5, %v841_v37, %v845_v24 }
  0x5c   : > { %7132 = vmatprep.subr.bf16.mxu1 %v7523_v50  ;;  %7180 = vmatprep.subr.bf16.mxu0 %v7524_v62  ;;  %v6156_v30 = vcombine.low %v822_v16, %v832_v20  ;;  %v1623_v54 = vsel %vm7848_vm4, %v1621_v44, %v1622_v38  ;;  %v873_v63 = vrot.slane %v871_v34, 4  ;;  %v1626_v6 = vrot.slane %v1502_v45, 5  ;;  %v1507_v34 = vld [vmem:[%s7777_s7 + $0x60] sm:$0xe] }
  0x5d   : > { %v851_v42 = vrot.slane %v850_v31, 4  ;;  %v6213_v61 = vcombine.low %v1620_v43, %v1623_v54  ;;  %v1629_v7 = vrot.slane %v1503_v58, 5  ;;  %v882_v12 = vshrl.u32 %v683_v59, 16  ;;  %v688_v43 = vld [vmem:[%s7777_s7 + $0x68] sm:$0x1] }
  0x5e   : > { %7053 = vmatmul.mubr.bf16.gmra.mxu1 %v6155_v55  ;;  %7101 = vmatmul.mubr.bf16.gmra.mxu0 %v6211_v57  ;;  %v869_v55 = vrot.slane %v867_v47, 5  ;;  %v877_v57 = vshll.u32 %v682_v39, 16  ;;  %v885_v13 = vshll.u32 %v683_v59, 16  ;;  %v1627_v15 = vsel %vm7848_vm4, %v6182_v5, %v1626_v6  ;;  %v686_v39 = vld [vmem:[%s7777_s7 + $0x60] sm:$0xf] }
  0x5f   : > { %7133 = vmatpush3.bf16.msra.mxu1 %v7523_v50  ;;  %7181 = vmatpush3.bf16.msra.mxu0 %v7524_v62  ;;  %v860_v50 = vrot.slane %v858_v40, 4  ;;  %v856_v53 = vsel %vm7867_vm5, %v851_v42, %v855_v32  ;;  %v1628_v16 = vrot.slane %v1626_v6, 4  ;;  %v891_v18 = vshll.u32 %v684_v0, 16  ;;  %v8075_v32 = vld [vmem:[%s9624_s1 + $0xc0] sm:$0xff]   ;;  %v690_v5 = vld [vmem:[%s7777_s7 + $0x70] sm:$0xf] }
  0x60   : > { %7104 = vmatprep.mubr.bf16.mxu0 %v6212_v1  ;;  %7134 = vmatprep.subr.bf16.mxu1 %v7525_v22  ;;  %v6157_v60 = vcombine.low %v846_v49, %v856_v53  ;;  %v879_v4 = vrot.slane %v877_v57, 5  ;;  %v874_v10 = vor.u32 %v873_v63, %v869_v55  ;;  %v895_v19 = vshrl.u32 %v684_v0, 16  ;;  %v687_v40 = vld [vmem:[%s7777_s7 + $0x64] sm:$0xf]  ;;  %v8094_v57 = vld [vmem:[%s9624_s1 + $0x178] sm:$0xff]  }
  0x61   : > { %7056 = vmatprep.mubr.bf16.mxu1 %v6156_v30  ;;  %7182 = vmatprep.subr.bf16.mxu0 %v7526_v27  ;;  %v864_v62 = vor.u32 %v863_v51, %v860_v50  ;;  %v884_v24 = vrot.slane %v882_v12, 4  ;;  %v887_v25 = vrot.slane %v885_v13, 5  ;;  %v893_v20 = vrot.slane %v891_v18, 5  ;;  %v689_v63 = vld [vmem:[%s7777_s7 + $0x6c] sm:$0xf] }
  0x62   : > { %v875_v23 = vrot.slane %v874_v10, 4  ;;  %v897_v1 = vrot.slane %v895_v19, 4  ;;  %v901_v11 = vshll.u32 %v685_v2, 16  ;;  %v6183_v31 = vrot.slane %v1504_v8, 9  ;;  %v691_v6 = vld [vmem:[%s7777_s7 + $0x74] sm:$0x1] }
  0x63   : > { %7135 = vmatpush3.bf16.msra.mxu1 %v7525_v22  ;;  %7183 = vmatpush3.bf16.msra.mxu0 %v7526_v27  ;;  %v865_v9 = vrot.slane %v864_v62, 4  ;;  %v1630_v27 = vsel %vm7848_vm4, %v1628_v16, %v1629_v7  ;;  %v888_v30 = vor.u32 %v887_v25, %v884_v24  ;;  %v1633_v38 = vrot.slane %v1505_v14, 5  ;;  %v1509_v62 = vld [vmem:[%s7777_s7 + $0x68] sm:$0x1]  ;;  %v8109_v7 = vld [vmem:[%s9624_s1 + $0x1b8] sm:$0xff]  }
  0x64   : > { %7136 = vmatprep.subr.bf16.mxu1 %v8021_v28  ;;  %7184 = vmatprep.subr.bf16.mxu0 %v8026_v29  ;;  %v898_v36 = vor.u32 %v897_v1, %v893_v20  ;;  %v903_v37 = vrot.slane %v901_v11, 5  ;;  %v1636_v42 = vrot.slane %v1506_v21, 5  ;;  %v906_v44 = vshrl.u32 %v686_v39, 16  ;;  %v1510_v13 = vld [vmem:[%s7777_s7 + $0x6c] sm:$0xe] }
  0x65   : > { %v870_v22 = vsel %vm7867_vm5, %v865_v9, %v869_v55  ;;  %v889_v41 = vrot.slane %v888_v30, 4  ;;  %v909_v47 = vshll.u32 %v686_v39, 16  ;;  %v1634_v49 = vsel %vm7848_vm4, %v6183_v31, %v1633_v38  ;;  %v1508_v55 = vld [vmem:[%s7777_s7 + $0x64] sm:$0xf]  ;;  %v1511_v19 = vld [vmem:[%s7777_s7 + $0x70] sm:$0xf] }
  0x66   : > { %7057 = vmatmul.mubr.bf16.gmra.mxu1 %v6157_v60  ;;  %7105 = vmatmul.mubr.bf16.gmra.mxu0 %v6213_v61  ;;  %v899_v48 = vrot.slane %v898_v36, 4  ;;  %v1635_v50 = vrot.slane %v1633_v38, 4  ;;  %v915_v51 = vshll.u32 %v687_v40, 16  ;;  %v919_v54 = vshrl.u32 %v687_v40, 16  ;;  %v1512_v25 = vld [vmem:[%s7777_s7 + $0x74] sm:$0x1] }
  0x67   : > { %7137 = vmatpush3.bf16.msra.mxu1 %v8021_v28  ;;  %7185 = vmatpush3.bf16.msra.mxu0 %v8026_v29  ;;  %v880_v28 = vsel %vm7867_vm5, %v875_v23, %v879_v4  ;;  %v6214_v29 = vcombine.low %v1627_v15, %v1630_v27  ;;  %v894_v45 = vsel %vm7867_vm5, %v889_v41, %v893_v20  ;;  %v911_v53 = vrot.slane %v909_v47, 5  ;;  %v692_v39 = vld [vmem:[%s7777_s7 + $0x78] sm:$0xf]  ;;  %v693_v40 = vld [vmem:[%s7777_s7 + $0x7c] sm:$0xf] }
  0x68   : > { %7138 = vmatprep.subr.bf16.mxu1 %v7529_v52  ;;  %7186 = vmatprep.subr.bf16.mxu0 %v7530_v3  ;;  %v6158_v35 = vcombine.low %v870_v22, %v880_v28  ;;  %v904_v58 = vsel %vm7867_vm5, %v899_v48, %v903_v37  ;;  %v1637_v59 = vsel %vm7848_vm4, %v1635_v50, %v1636_v42  ;;  %v917_v60 = vrot.slane %v915_v51, 5 }
  0x69   : > { %7108 = vmatprep.mubr.bf16.mxu0 %v6214_v29  ;;  %v925_v61 = vshll.u32 %v688_v43, 16  ;;  %v6159_v0 = vcombine.low %v894_v45, %v904_v58  ;;  %v6215_v2 = vcombine.low %v1634_v49, %v1637_v59  ;;  %v921_v4 = vrot.slane %v919_v54, 4  ;;  %v694_v43 = vld [vmem:[%s7777_s7 + $0x80] sm:$0x1] }
  0x6a   : > { %7060 = vmatprep.mubr.bf16.mxu1 %v6158_v35  ;;  %v6184_v9 = vrot.slane %v1507_v34, 9  ;;  %v1640_v10 = vrot.slane %v1508_v55, 5  ;;  %v1643_v12 = vrot.slane %v1509_v62, 5  ;;  %v930_v16 = vshrl.u32 %v689_v63, 16  ;;  %v1513_v34 = vld [vmem:[%s7777_s7 + $0x78] sm:$0xe] }
  0x6b   : > { %7139 = vmatpush3.bf16.msra.mxu1 %v7529_v52  ;;  %7187 = vmatpush3.bf16.msra.mxu0 %v7530_v3  ;;  %v908_v52 = vrot.slane %v906_v44, 4  ;;  %v927_v8 = vrot.slane %v925_v61, 5  ;;  %v922_v15 = vor.u32 %v921_v4, %v917_v60  ;;  %v933_v18 = vshll.u32 %v689_v63, 16  ;;  %v1514_v55 = vld [vmem:[%s7777_s7 + $0x7c] sm:$0xf] }
  0x6c   : > { %7140 = vmatprep.subr.bf16.mxu1 %v7531_v26  ;;  %7188 = vmatprep.subr.bf16.mxu0 %v7532_v17  ;;  %v1641_v21 = vsel %vm7848_vm4, %v6184_v9, %v1640_v10  ;;  %v1642_v22 = vrot.slane %v1640_v10, 4  ;;  %v939_v23 = vshll.u32 %v690_v5, 16  ;;  %v943_v24 = vshrl.u32 %v690_v5, 16  ;;  %v1515_v62 = vld [vmem:[%s7777_s7 + $0x80] sm:$0x1] }
  0x6d   : > { %v912_v3 = vor.u32 %v911_v53, %v908_v52  ;;  %v923_v27 = vrot.slane %v922_v15, 4  ;;  %v932_v20 = vrot.slane %v930_v16, 4  ;;  %v935_v1 = vrot.slane %v933_v18, 5  ;;  %v695_v63 = vld [vmem:[%s7777_s7 + $0x84] sm:$0xf] }
  0x6e   : > { %7061 = vmatmul.mubr.bf16.gmra.mxu1 %v6159_v0  ;;  %7109 = vmatmul.mubr.bf16.gmra.mxu0 %v6215_v2  ;;  %v1644_v11 = vsel %vm7848_vm4, %v1642_v22, %v1643_v12  ;;  %v945_v28 = vrot.slane %v943_v24, 4  ;;  %v949_v29 = vshll.u32 %v691_v6, 16  ;;  %v1647_v38 = vrot.slane %v1511_v19, 5  ;;  %v696_v5 = vld [vmem:[%s7777_s7 + $0x88] sm:$0xf] }
  0x6f   : > { %7141 = vmatpush3.bf16.msra.mxu1 %v7531_v26  ;;  %7189 = vmatpush3.bf16.msra.mxu0 %v7532_v17  ;;  %v913_v14 = vrot.slane %v912_v3, 4  ;;  %v941_v17 = vrot.slane %v939_v23, 5  ;;  %v928_v30 = vsel %vm7867_vm5, %v923_v27, %v927_v8  ;;  %v6216_v31 = vcombine.low %v1641_v21, %v1644_v11  ;;  %v697_v6 = vld [vmem:[%s7777_s7 + $0x8c] sm:$0x1]  ;;  %v1517_v19 = vld [vmem:[%s7777_s7 + $0x88] sm:$0xf] }
  0x70   : > { %7142 = vmatprep.subr.bf16.mxu1 %v8075_v32  ;;  %7190 = vmatprep.subr.bf16.mxu0 %v8080_v33  ;;  %v951_v37 = vrot.slane %v949_v29, 5  ;;  %v1650_v42 = vrot.slane %v1512_v25, 5  ;;  %v954_v44 = vshrl.u32 %v692_v39, 16  ;;  %v957_v47 = vshll.u32 %v692_v39, 16  ;;  %v1518_v25 = vld [vmem:[%s7777_s7 + $0x8c] sm:$0x1] }
  0x71   : > { %v918_v26 = vsel %vm7867_vm5, %v913_v14, %v917_v60  ;;  %v946_v36 = vor.u32 %v945_v28, %v941_v17  ;;  %7112 = vmatprep.mubr.bf16.mxu0 %v6216_v31  ;;  %v1649_v50 = vrot.slane %v1647_v38, 4  ;;  %v963_v51 = vshll.u32 %v693_v40, 16  ;;  %v698_v39 = vld [vmem:[%s7777_s7 + $0x90] sm:$0xf] }
  0x72   : > { %v6160_v35 = vcombine.low %v918_v26, %v928_v30  ;;  %v956_v52 = vrot.slane %v954_v44, 4  ;;  %v959_v53 = vrot.slane %v957_v47, 5  ;;  %v967_v54 = vshrl.u32 %v693_v40, 16  ;;  %v699_v40 = vld [vmem:[%s7777_s7 + $0x94] sm:$0xf] }
  0x73   : > { %7143 = vmatpush3.bf16.msra.mxu1 %v8075_v32  ;;  %7191 = vmatpush3.bf16.msra.mxu0 %v8080_v33  ;;  %v936_v32 = vor.u32 %v935_v1, %v932_v20  ;;  %v6185_v33 = vrot.slane %v1510_v13, 9  ;;  %v947_v48 = vrot.slane %v946_v36, 4  ;;  %v1651_v59 = vsel %vm7848_vm4, %v1649_v50, %v1650_v42  ;;  %v1516_v13 = vld [vmem:[%s7777_s7 + $0x84] sm:$0xe] }
  0x74   : > { %7224 = vmatprep.subr.bf16.mxu1 %v8094_v57  ;;  %7272 = vmatprep.subr.bf16.mxu0 %v8109_v7  ;;  %v965_v60 = vrot.slane %v963_v51, 5  ;;  %v973_v61 = vshll.u32 %v694_v43, 16  ;;  %v960_v3 = vor.u32 %v959_v53, %v956_v52  ;;  %v969_v4 = vrot.slane %v967_v54, 4  ;;  %v700_v43 = vld [vmem:[%s7777_s7 + $0x98] sm:$0x1] }
  0x75   : > { %v937_v41 = vrot.slane %v936_v32, 4  ;;  %7064 = vmatprep.mubr.bf16.mxu1 %v6160_v35  ;;  %v1648_v49 = vsel %vm7848_vm4, %v6185_v33, %v1647_v38  ;;  %v952_v58 = vsel %vm7867_vm5, %v947_v48, %v951_v37  ;;  %v6186_v9 = vrot.slane %v1513_v34, 9  ;;  %v1519_v34 = vld [vmem:[%s7777_s7 + $0x90] sm:$0xe] }
  0x76   : > { %v6217_v2 = vcombine.low %v1648_v49, %v1651_v59  ;;  %v975_v8 = vrot.slane %v973_v61, 5  ;;  %v1654_v10 = vrot.slane %v1514_v55, 5  ;;  %v1657_v12 = vrot.slane %v1515_v62, 5  ;;  %v1520_v55 = vld [vmem:[%s7777_s7 + $0x94] sm:$0xf] }
  0x77   : > { %v942_v45 = vsel %vm7867_vm5, %v937_v41, %v941_v17  ;;  %v961_v14 = vrot.slane %v960_v3, 4  ;;  %v970_v15 = vor.u32 %v969_v4, %v965_v60  ;;  %v978_v16 = vshrl.u32 %v695_v63, 16  ;;  %v1521_v62 = vld [vmem:[%s7777_s7 + $0x98] sm:$0x1] }
  0x78   : > { %v6161_v0 = vcombine.low %v942_v45, %v952_v58  ;;  %7113 = vmatmul.mubr.bf16.gmra.mxu0 %v6217_v2  ;;  %v981_v18 = vshll.u32 %v695_v63, 16  ;;  %v1655_v21 = vsel %vm7848_vm4, %v6186_v9, %v1654_v10  ;;  %v1656_v22 = vrot.slane %v1654_v10, 4  ;;  %v701_v63 = vld [vmem:[%s7777_s7 + $0x9c] sm:$0xf] }
  0x79   : > { %v987_v23 = vshll.u32 %v696_v5, 16  ;;  %v991_v24 = vshrl.u32 %v696_v5, 16  ;;  %v966_v26 = vsel %vm7867_vm5, %v961_v14, %v965_v60  ;;  %v971_v27 = vrot.slane %v970_v15, 4  ;;  %v702_v5 = vld [vmem:[%s7777_s7 + $0xa0] sm:$0xf] }
  0x7a   : > { %7065 = vmatmul.mubr.bf16.gmra.mxu1 %v6161_v0  ;;  %v980_v20 = vrot.slane %v978_v16, 4  ;;  %v983_v1 = vrot.slane %v981_v18, 5  ;;  %v1658_v11 = vsel %vm7848_vm4, %v1656_v22, %v1657_v12  ;;  %v997_v29 = vshll.u32 %v697_v6, 16  ;;  %v703_v6 = vld [vmem:[%s7777_s7 + $0xa4] sm:$0x1] }
  0x7b   : > { %v989_v17 = vrot.slane %v987_v23, 5  ;;  %v993_v28 = vrot.slane %v991_v24, 4  ;;  %v976_v30 = vsel %vm7867_vm5, %v971_v27, %v975_v8  ;;  %v6218_v31 = vcombine.low %v1655_v21, %v1658_v11 }
  0x7c   : > { %v984_v32 = vor.u32 %v983_v1, %v980_v20  ;;  %v6187_v33 = vrot.slane %v1516_v13, 9  ;;  %v6162_v35 = vcombine.low %v966_v26, %v976_v30  ;;  %v999_v37 = vrot.slane %v997_v29, 5  ;;  %v1522_v13 = vld [vmem:[%s7777_s7 + $0x9c] sm:$0xe] }
  0x7d   : > { %v994_v36 = vor.u32 %v993_v28, %v989_v17  ;;  %v1661_v38 = vrot.slane %v1517_v19, 5  ;;  %7116 = vmatprep.mubr.bf16.mxu0 %v6218_v31  ;;  %v1664_v42 = vrot.slane %v1518_v25, 5  ;;  %v1002_v44 = vshrl.u32 %v698_v39, 16  ;;  %v1523_v19 = vld [vmem:[%s7777_s7 + $0xa0] sm:$0xf] }
  0x7e   : > { %v985_v41 = vrot.slane %v984_v32, 4  ;;  %v1005_v47 = vshll.u32 %v698_v39, 16  ;;  %7068 = vmatprep.mubr.bf16.mxu1 %v6162_v35  ;;  %v1011_v51 = vshll.u32 %v699_v40, 16  ;;  %v1015_v54 = vshrl.u32 %v699_v40, 16  ;;  %v1524_v25 = vld [vmem:[%s7777_s7 + $0xa4] sm:$0x1] }
  0x7f   : > { %v995_v48 = vrot.slane %v994_v36, 4  ;;  %v1662_v49 = vsel %vm7848_vm4, %v6187_v33, %v1661_v38  ;;  %v1663_v50 = vrot.slane %v1661_v38, 4  ;;  %v1004_v52 = vrot.slane %v1002_v44, 4  ;;  %v704_v39 = vld [vmem:[%s7777_s7 + $0xa8] sm:$0xf] }
  0x80   : > { %v990_v45 = vsel %vm7867_vm5, %v985_v41, %v989_v17  ;;  %v1007_v53 = vrot.slane %v1005_v47, 5  ;;  %v1013_v60 = vrot.slane %v1011_v51, 5  ;;  %v1021_v61 = vshll.u32 %v700_v43, 16  ;;  %v705_v40 = vld [vmem:[%s7777_s7 + $0xac] sm:$0xf] }
  0x81   : > { %v1000_v58 = vsel %vm7867_vm5, %v995_v48, %v999_v37  ;;  %v1665_v59 = vsel %vm7848_vm4, %v1663_v50, %v1664_v42  ;;  %v1017_v4 = vrot.slane %v1015_v54, 4  ;;  %v6188_v9 = vrot.slane %v1519_v34, 9  ;;  %v706_v43 = vld [vmem:[%s7777_s7 + $0xb0] sm:$0x1]  ;;  %v1525_v34 = vld [vmem:[%s7777_s7 + $0xa8] sm:$0xe] }
  0x82   : > { %v6163_v0 = vcombine.low %v990_v45, %v1000_v58  ;;  %v6219_v2 = vcombine.low %v1662_v49, %v1665_v59  ;;  %v1008_v3 = vor.u32 %v1007_v53, %v1004_v52  ;;  %v1023_v8 = vrot.slane %v1021_v61, 5 }
  0x83   : > { %v1668_v10 = vrot.slane %v1520_v55, 5  ;;  %v1671_v12 = vrot.slane %v1521_v62, 5  ;;  %v1018_v15 = vor.u32 %v1017_v4, %v1013_v60  ;;  %v1026_v16 = vshrl.u32 %v701_v63, 16  ;;  %v1526_v55 = vld [vmem:[%s7777_s7 + $0xac] sm:$0xf] }
  0x84   : > { %7069 = vmatmul.mubr.bf16.gmra.mxu1 %v6163_v0  ;;  %7117 = vmatmul.mubr.bf16.gmra.mxu0 %v6219_v2  ;;  %v1009_v14 = vrot.slane %v1008_v3, 4  ;;  %v1029_v18 = vshll.u32 %v701_v63, 16  ;;  %v1035_v23 = vshll.u32 %v702_v5, 16  ;;  %v1039_v24 = vshrl.u32 %v702_v5, 16  ;;  %v1527_v62 = vld [vmem:[%s7777_s7 + $0xb0] sm:$0x1] }
  0x85   : > { %v1669_v21 = vsel %vm7848_vm4, %v6188_v9, %v1668_v10  ;;  %v1670_v22 = vrot.slane %v1668_v10, 4  ;;  %v1019_v27 = vrot.slane %v1018_v15, 4  ;;  %v1028_v20 = vrot.slane %v1026_v16, 4  ;;  %v707_v63 = vld [vmem:[%s7777_s7 + $0xb4] sm:$0xf] }
  0x86   : > { %v1014_v26 = vsel %vm7867_vm5, %v1009_v14, %v1013_v60  ;;  %v1031_v1 = vrot.slane %v1029_v18, 5  ;;  %v1037_v17 = vrot.slane %v1035_v23, 5  ;;  %v1041_v28 = vrot.slane %v1039_v24, 4  ;;  %v708_v5 = vld [vmem:[%s7777_s7 + $0xb8] sm:$0xf] }
  0x87   : > { %v1672_v11 = vsel %vm7848_vm4, %v1670_v22, %v1671_v12  ;;  %v1045_v29 = vshll.u32 %v703_v6, 16  ;;  %v1024_v30 = vsel %vm7867_vm5, %v1019_v27, %v1023_v8  ;;  %v6189_v33 = vrot.slane %v1522_v13, 9  ;;  %v709_v6 = vld [vmem:[%s7777_s7 + $0xbc] sm:$0x1]  ;;  %v1528_v13 = vld [vmem:[%s7777_s7 + $0xb4] sm:$0xe] }
  0x88   : > { %v6220_v31 = vcombine.low %v1669_v21, %v1672_v11  ;;  %v1032_v32 = vor.u32 %v1031_v1, %v1028_v20  ;;  %v6164_v35 = vcombine.low %v1014_v26, %v1024_v30  ;;  %v1042_v36 = vor.u32 %v1041_v28, %v1037_v17 }
  0x89   : > { %v1047_v37 = vrot.slane %v1045_v29, 5  ;;  %v1675_v38 = vrot.slane %v1523_v19, 5  ;;  %v1678_v42 = vrot.slane %v1524_v25, 5  ;;  %v1050_v44 = vshrl.u32 %v704_v39, 16  ;;  %v1529_v19 = vld [vmem:[%s7777_s7 + $0xb8] sm:$0xf] }
  0x8a   : > { %7120 = vmatprep.mubr.bf16.mxu0 %v6220_v31  ;;  %v1033_v41 = vrot.slane %v1032_v32, 4  ;;  %v1053_v47 = vshll.u32 %v704_v39, 16  ;;  %7072 = vmatprep.mubr.bf16.mxu1 %v6164_v35  ;;  %v1043_v48 = vrot.slane %v1042_v36, 4  ;;  %v1059_v51 = vshll.u32 %v705_v40, 16  ;;  %v1530_v25 = vld [vmem:[%s7777_s7 + $0xbc] sm:$0x1] }
  0x8b   : > { %v1676_v49 = vsel %vm7848_vm4, %v6189_v33, %v1675_v38  ;;  %v1677_v50 = vrot.slane %v1675_v38, 4  ;;  %v1052_v52 = vrot.slane %v1050_v44, 4  ;;  %v1063_v54 = vshrl.u32 %v705_v40, 16 }
  0x8c   : > { %v1038_v45 = vsel %vm7867_vm5, %v1033_v41, %v1037_v17  ;;  %v1055_v53 = vrot.slane %v1053_v47, 5  ;;  %v1048_v58 = vsel %vm7867_vm5, %v1043_v48, %v1047_v37  ;;  %v1061_v60 = vrot.slane %v1059_v51, 5  ;;  %v6304_v41 = vld [vmem:[%s7777_s7 + $0xc] sm:$0xf]  ;;  %v6306_v48 = vld [vmem:[%s7777_s7 + $0x14] sm:$0x1] }
  0x8d   : > { %v1679_v59 = vsel %vm7848_vm4, %v1677_v50, %v1678_v42  ;;  %v1069_v61 = vshll.u32 %v706_v43, 16  ;;  %v6165_v0 = vcombine.low %v1038_v45, %v1048_v58  ;;  %v1065_v4 = vrot.slane %v1063_v54, 4  ;;  %v6305_v42 = vld [vmem:[%s7777_s7 + $0x10] sm:$0xf] }
  0x8e   : > { %v6221_v2 = vcombine.low %v1676_v49, %v1679_v59  ;;  %v1056_v3 = vor.u32 %v1055_v53, %v1052_v52  ;;  %v6190_v9 = vrot.slane %v1525_v34, 9  ;;  %v1682_v10 = vrot.slane %v1526_v55, 5  ;;  %v7535_v51 = vld [vmem:[%s7777_s7 + $0xc] sm:$0xff]   ;;  %v6307_v59 = vld [vmem:[%s7777_s7 + $0x18] sm:$0xf] }
  0x8f   : > { %v1071_v8 = vrot.slane %v1069_v61, 5  ;;  %v1685_v12 = vrot.slane %v1527_v62, 5  ;;  %7073 = vmatmul.mubr.bf16.gmra.mxu1 %v6165_v0  ;;  %v1066_v15 = vor.u32 %v1065_v4, %v1061_v60  ;;  %v1074_v16 = vshrl.u32 %v707_v63, 16  ;;  %v6308_v0 = vld [vmem:[%s7777_s7 + $0x1c] sm:$0xf] }
  0x90   : > { %7121 = vmatmul.mubr.bf16.gmra.mxu0 %v6221_v2  ;;  %v1057_v14 = vrot.slane %v1056_v3, 4  ;;  %v1077_v18 = vshll.u32 %v707_v63, 16  ;;  %v1683_v21 = vsel %vm7848_vm4, %v6190_v9, %v1682_v10  ;;  %v1684_v22 = vrot.slane %v1682_v10, 4  ;;  %v6309_v2 = vld [vmem:[%s7777_s7 + $0x20] sm:$0x1] }
  0x91   : > { %v1083_v23 = vshll.u32 %v708_v5, 16  ;;  %v1087_v24 = vshrl.u32 %v708_v5, 16  ;;  %v1067_v27 = vrot.slane %v1066_v15, 4  ;;  %v1076_v20 = vrot.slane %v1074_v16, 4 }
  0x92   : > { %v1062_v26 = vsel %vm7867_vm5, %v1057_v14, %v1061_v60  ;;  %v1079_v1 = vrot.slane %v1077_v18, 5  ;;  %v1686_v11 = vsel %vm7848_vm4, %v1684_v22, %v1685_v12  ;;  %v1093_v29 = vshll.u32 %v709_v6, 16  ;;  %v7536_v18 = vld [vmem:[%s7777_s7 + $0x18] sm:$0xff]  }
  0x93   : > { %v1085_v17 = vrot.slane %v1083_v23, 5  ;;  %v1089_v28 = vrot.slane %v1087_v24, 4  ;;  %v1072_v30 = vsel %vm7867_vm5, %v1067_v27, %v1071_v8  ;;  %v6222_v31 = vcombine.low %v1683_v21, %v1686_v11 }
  0x94   : > { %v1080_v32 = vor.u32 %v1079_v1, %v1076_v20  ;;  %v6191_v33 = vrot.slane %v1528_v13, 9  ;;  %v6166_v35 = vcombine.low %v1062_v26, %v1072_v30  ;;  %v1095_v37 = vrot.slane %v1093_v29, 5  ;;  %v6311_v20 = vld [vmem:[%s7777_s7 + $0x28] sm:$0xf]  ;;  %v6312_v1 = vld [vmem:[%s7777_s7 + $0x2c] sm:$0x1] }
  0x95   : > { %v1090_v36 = vor.u32 %v1089_v28, %v1085_v17  ;;  %v1689_v38 = vrot.slane %v1529_v19, 5  ;;  %7124 = vmatprep.mubr.bf16.mxu0 %v6222_v31  ;;  %v1692_v40 = vrot.slane %v1530_v25, 5  ;;  %v2580_v49 = vshrl.u32 %v6304_v41, 16  ;;  %v6310_v25 = vld [vmem:[%s7777_s7 + $0x24] sm:$0xf] }
  0x96   : > { %v1081_v39 = vrot.slane %v1080_v32, 4  ;;  %7076 = vmatprep.mubr.bf16.mxu1 %v6166_v35  ;;  %v2583_v34 = vshll.u32 %v6304_v41, 16  ;;  %v2589_v45 = vshll.u32 %v6305_v42, 16  ;;  %v2593_v52 = vshrl.u32 %v6305_v42, 16  ;;  %v7539_v30 = vld [vmem:[%s7777_s7 + $0x24] sm:$0xff]  }
  0x97   : > { %v1091_v43 = vrot.slane %v1090_v36, 4  ;;  %v1690_v44 = vsel %vm7848_vm4, %v6191_v33, %v1689_v38  ;;  %v1691_v47 = vrot.slane %v1689_v38, 4  ;;  %v2582_v55 = vrot.slane %v2580_v49, 4  ;;  %v7541_v38 = vld [vmem:[%s9624_s1 + $0x170] sm:$0xff]  }
  0x98   : > { %v1086_v50 = vsel %vm7867_vm5, %v1081_v39, %v1085_v17  ;;  %v2599_v58 = vshll.u32 %v6306_v48, 16  ;;  %v2585_v62 = vrot.slane %v2583_v34, 5  ;;  %v2591_v63 = vrot.slane %v2589_v45, 5  ;;  %v6314_v49 = vld [vmem:[%s7777_s7 + $0x34] sm:$0xf]  ;;  %v7545_v45 = vld [vmem:[%s9624_s1 + $0x168] sm:$0xff]  }
  0x99   : > { %v1096_v53 = vsel %vm7867_vm5, %v1091_v43, %v1095_v37  ;;  %v1693_v54 = vsel %vm7848_vm4, %v1691_v47, %v1692_v40  ;;  %v2595_v3 = vrot.slane %v2593_v52, 4  ;;  %v2604_v5 = vshrl.u32 %v6307_v59, 16  ;;  %v6313_v43 = vld [vmem:[%s7777_s7 + $0x30] sm:$0xf] }
  0x9a   : > { %v6167_v60 = vcombine.low %v1086_v50, %v1096_v53  ;;  %v6223_v61 = vcombine.low %v1690_v44, %v1693_v54  ;;  %v2601_v4 = vrot.slane %v2599_v58, 5  ;;  %v2607_v6 = vshll.u32 %v6307_v59, 16  ;;  %v7542_v44 = vld [vmem:[%s9624_s1 + $0x1b0] sm:$0xff]   ;;  %v6315_v50 = vld [vmem:[%s7777_s7 + $0x38] sm:$0x1] }
  0x9b   : > { %v2586_v8 = vor.u32 %v2585_v62, %v2582_v55  ;;  %v2613_v9 = vshll.u32 %v6308_v0, 16  ;;  %v2617_v10 = vshrl.u32 %v6308_v0, 16  ;;  %v2623_v12 = vshll.u32 %v6309_v2, 16  ;;  %v7540_v59 = vld [vmem:[%s7777_s7 + $0x30] sm:$0xff]  }
  0x9c   : > { %7077 = vmatmul.mubr.bf16.gmra.mxu1 %v6167_v60  ;;  %7125 = vmatmul.mubr.bf16.gmra.mxu0 %v6223_v61  ;;  %v2596_v13 = vor.u32 %v2595_v3, %v2591_v63  ;;  %v2606_v14 = vrot.slane %v2604_v5, 4  ;;  %v2609_v15 = vrot.slane %v2607_v6, 5  ;;  %v2628_v11 = vshrl.u32 %v6310_v25, 16  ;;  %v7543_v3 = vld [vmem:[%s7777_s7 + $0x3c] sm:$0xff]   ;;  %v7546_v6 = vld [vmem:[%s9624_s1 + $0x1a8] sm:$0xff]  }
  0x9d   : > { %7144 = vmatprep.mubr.bf16.mxu1 %v7535_v51  ;;  %v2587_v16 = vrot.slane %v2586_v8, 4  ;;  %v2615_v19 = vrot.slane %v2613_v9, 5  ;;  %v2619_v21 = vrot.slane %v2617_v10, 4  ;;  %v2625_v24 = vrot.slane %v2623_v12, 5  ;;  %v6316_v10 = vld [vmem:[%s7777_s7 + $0x3c] sm:$0xf] }
  0x9e   : > { %v2597_v22 = vrot.slane %v2596_v13, 4  ;;  %v2610_v23 = vor.u32 %v2609_v15, %v2606_v14  ;;  %v2631_v17 = vshll.u32 %v6310_v25, 16  ;;  %v2637_v31 = vshll.u32 %v6311_v20, 16  ;;  %v6317_v12 = vld [vmem:[%s7777_s7 + $0x40] sm:$0xf] }
  0x9f   : > { %v2592_v26 = vsel %vm7867_vm5, %v2587_v16, %v2591_v63  ;;  %v2620_v27 = vor.u32 %v2619_v21, %v2615_v19  ;;  %v2641_v32 = vshrl.u32 %v6311_v20, 16  ;;  %v2630_v36 = vrot.slane %v2628_v11, 4  ;;  %v6318_v16 = vld [vmem:[%s7777_s7 + $0x44] sm:$0x1]  ;;  %v6320_v20 = vld [vmem:[%s7777_s7 + $0x4c] sm:$0xf] }
  0xa0   : > { %v2602_v28 = vsel %vm7867_vm5, %v2597_v22, %v2601_v4  ;;  %v2611_v29 = vrot.slane %v2610_v23, 4  ;;  %v2633_v37 = vrot.slane %v2631_v17, 5  ;;  %v2639_v40 = vrot.slane %v2637_v31, 5  ;;  %v7544_v31 = vld [vmem:[%s7777_s7 + $0x48] sm:$0xff]  }
  0xa1   : > { %v6368_v33 = vcombine.low %v2592_v26, %v2602_v28  ;;  %v2621_v35 = vrot.slane %v2620_v27, 4  ;;  %v2643_v41 = vrot.slane %v2641_v32, 4  ;;  %v2647_v42 = vshll.u32 %v6312_v1, 16  ;;  %v6319_v27 = vld [vmem:[%s7777_s7 + $0x48] sm:$0xf] }
  0xa2   : > { %v2616_v39 = vsel %vm7867_vm5, %v2611_v29, %v2615_v19  ;;  %v2634_v48 = vor.u32 %v2633_v37, %v2630_v36  ;;  %v2652_v51 = vshrl.u32 %v6313_v43, 16  ;;  %v2655_v34 = vshll.u32 %v6313_v43, 16  ;;  %v6321_v29 = vld [vmem:[%s7777_s7 + $0x50] sm:$0x1]  ;;  %v7550_v36 = vld [vmem:[%s9624_s1 + $0x1a0] sm:$0xff]  }
  0xa3   : > { %7192 = vmatprep.mubr.bf16.mxu0 %v6368_v33  ;;  %v2626_v47 = vsel %vm7867_vm5, %v2621_v35, %v2625_v24  ;;  %v2644_v53 = vor.u32 %v2643_v41, %v2639_v40  ;;  %v2649_v54 = vrot.slane %v2647_v42, 5  ;;  %v2661_v55 = vshll.u32 %v6314_v49, 16  ;;  %v7553_v41 = vld [vmem:[%s9624_s1 + $0x158] sm:$0xff]  }
  0xa4   : > { %7145 = vmatmul.mubr.bf16.vlgmr.msra.gmra.mxu1 %v7536_v18  ;;  %v6369_v52 = vcombine.low %v2616_v39, %v2626_v47  ;;  %v2635_v58 = vrot.slane %v2634_v48, 4  ;;  %v2654_v60 = vrot.slane %v2652_v51, 4  ;;  %v2657_v61 = vrot.slane %v2655_v34, 5  ;;  %v7547_v51 = vld [vmem:[%s7777_s7 + $0x54] sm:$0xff]  }
  0xa5   : > { %7225 = vmatpush3.bf16.msra.mxu1 %v8094_v57  ;;  %7148 = vmatprep.mubr.bf16.mxu1 %v7539_v30  ;;  %v2665_v62 = vshrl.u32 %v6314_v49, 16  ;;  %v2645_v63 = vrot.slane %v2644_v53, 4  ;;  %v2663_v0 = vrot.slane %v2661_v55, 5  ;;  %v2671_v2 = vshll.u32 %v6315_v50, 16 }
  0xa6   : > { %7226 = vmatprep.subr.bf16.mxu1 %v7541_v38  ;;  %7193 = vmatmul.mubr.bf16.vlgmr.msra.gmra.mxu0 %v6369_v52  ;;  %v2640_v57 = vsel %vm7867_vm5, %v2635_v58, %v2639_v40  ;;  %v2658_v4 = vor.u32 %v2657_v61, %v2654_v60  ;;  %v2676_v18 = vshrl.u32 %v6316_v10, 16  ;;  %v2679_v19 = vshll.u32 %v6316_v10, 16  ;;  %v6322_v52 = vld [vmem:[%s7777_s7 + $0x54] sm:$0xf]  ;;  %v6323_v58 = vld [vmem:[%s7777_s7 + $0x58] sm:$0xf] }
  0xa7   : > { %7273 = vmatpush3.bf16.msra.mxu0 %v8109_v7  ;;  %v2667_v5 = vrot.slane %v2665_v62, 4  ;;  %v2650_v8 = vsel %vm7867_vm5, %v2645_v63, %v2649_v54  ;;  %v2673_v9 = vrot.slane %v2671_v2, 5  ;;  %v7549_v7 = vld [vmem:[%s9624_s1 + $0x160] sm:$0xff]   ;;  %v2685_v21 = vshll.u32 %v6317_v12, 16  ;;  %v7554_v61 = vld [vmem:[%s9624_s1 + $0x198] sm:$0xff]  }
  0xa8   : > { %7274 = vmatprep.subr.bf16.mxu0 %v7542_v44  ;;  %v6370_v13 = vcombine.low %v2640_v57, %v2650_v8  ;;  %v2659_v14 = vrot.slane %v2658_v4, 4  ;;  %v2689_v22 = vshrl.u32 %v6317_v12, 16  ;;  %v2695_v23 = vshll.u32 %v6318_v16, 16  ;;  %v7548_v12 = vld [vmem:[%s7777_s7 + $0x60] sm:$0xff]  }
  0xa9   : > { %7227 = vmatpush3.bf16.msra.mxu1 %v7541_v38  ;;  %v2668_v15 = vor.u32 %v2667_v5, %v2663_v0  ;;  %v2678_v26 = vrot.slane %v2676_v18, 4  ;;  %v2681_v1 = vrot.slane %v2679_v19, 5  ;;  %v2687_v11 = vrot.slane %v2685_v21, 5  ;;  %v6327_v18 = vld [vmem:[%s7777_s7 + $0x68] sm:$0x1]  ;;  %v7551_v21 = vld [vmem:[%s7777_s7 + $0x6c] sm:$0xff]  }
  0xaa   : > { %7228 = vmatprep.subr.bf16.mxu1 %v7545_v45  ;;  %7196 = vmatprep.mubr.bf16.mxu0 %v6370_v13  ;;  %v2664_v24 = vsel %vm7867_vm5, %v2659_v14, %v2663_v0  ;;  %v2691_v17 = vrot.slane %v2689_v22, 4  ;;  %v2697_v28 = vrot.slane %v2695_v23, 5  ;;  %v2700_v32 = vshrl.u32 %v6319_v27, 16  ;;  %v6326_v13 = vld [vmem:[%s7777_s7 + $0x64] sm:$0xf]  ;;  %v7558_v22 = vld [vmem:[%s9624_s1 + $0x190] sm:$0xff]  }
  0xab   : > { %v2669_v25 = vrot.slane %v2668_v15, 4  ;;  %7275 = vmatpush3.bf16.msra.mxu0 %v7542_v44  ;;  %v2703_v33 = vshll.u32 %v6319_v27, 16  ;;  %v2709_v35 = vshll.u32 %v6320_v20, 16  ;;  %v2682_v38 = vor.u32 %v2681_v1, %v2678_v26 }
  0xac   : > { %7149 = vmatmul.mubr.bf16.gmra.mxu1 %v7540_v59  ;;  %7276 = vmatprep.subr.bf16.mxu0 %v7546_v6  ;;  %v2692_v39 = vor.u32 %v2691_v17, %v2687_v11  ;;  %v2713_v40 = vshrl.u32 %v6320_v20, 16  ;;  %v2702_v42 = vrot.slane %v2700_v32, 4  ;;  %v2719_v47 = vshll.u32 %v6321_v29, 16  ;;  %v6324_v59 = vld [vmem:[%s7777_s7 + $0x5c] sm:$0x1]  ;;  %v7561_v17 = vld [vmem:[%s9624_s1 + $0x148] sm:$0xff]  }
  0xad   : > { %7152 = vmatprep.mubr.bf16.mxu1 %v7543_v3  ;;  %v2674_v30 = vsel %vm7867_vm5, %v2669_v25, %v2673_v9  ;;  %7229 = vmatpush3.bf16.msra.mxu1 %v7545_v45  ;;  %v2705_v43 = vrot.slane %v2703_v33, 5  ;;  %v2711_v44 = vrot.slane %v2709_v35, 5  ;;  %v2683_v48 = vrot.slane %v2682_v38, 4  ;;  %v7557_v3 = vld [vmem:[%s9624_s1 + $0x150] sm:$0xff]  }
  0xae   : > { %v6371_v37 = vcombine.low %v2664_v24, %v2674_v30  ;;  %7230 = vmatprep.subr.bf16.mxu1 %v7549_v7  ;;  %v2693_v49 = vrot.slane %v2692_v39, 4  ;;  %v2715_v50 = vrot.slane %v2713_v40, 4  ;;  %v2721_v45 = vrot.slane %v2719_v47, 5  ;;  %v6328_v39 = vld [vmem:[%s7777_s7 + $0x6c] sm:$0xf] }
  0xaf   : > { %v2706_v34 = vor.u32 %v2705_v43, %v2702_v42  ;;  %7277 = vmatpush3.bf16.msra.mxu0 %v7546_v6  ;;  %v2688_v53 = vsel %vm7867_vm5, %v2683_v48, %v2687_v11  ;;  %v2724_v60 = vshrl.u32 %v6322_v52, 16  ;;  %v2727_v0 = vshll.u32 %v6322_v52, 16  ;;  %v6329_v40 = vld [vmem:[%s7777_s7 + $0x70] sm:$0xf]  ;;  %v6330_v43 = vld [vmem:[%s7777_s7 + $0x74] sm:$0x1] }
  0xb0   : > { %7197 = vmatmul.mubr.bf16.gmra.mxu0 %v6371_v37  ;;  %v2698_v54 = vsel %vm7867_vm5, %v2693_v49, %v2697_v28  ;;  %v2716_v55 = vor.u32 %v2715_v50, %v2711_v44  ;;  %7278 = vmatprep.subr.bf16.mxu0 %v7550_v36  ;;  %v2733_v2 = vshll.u32 %v6323_v58, 16  ;;  %v2737_v5 = vshrl.u32 %v6323_v58, 16  ;;  %v7555_v58 = vld [vmem:[%s7777_s7 + $0x84] sm:$0xff]  }
  0xb1   : > { %7231 = vmatpush3.bf16.msra.mxu1 %v7549_v7  ;;  %v6372_v62 = vcombine.low %v2688_v53, %v2698_v54  ;;  %v2707_v63 = vrot.slane %v2706_v34, 4  ;;  %v2726_v4 = vrot.slane %v2724_v60, 4  ;;  %v2743_v6 = vshll.u32 %v6324_v59, 16  ;;  %v6325_v7 = vld [vmem:[%s7777_s7 + $0x60] sm:$0xf]  ;;  %v7552_v34 = vld [vmem:[%s7777_s7 + $0x78] sm:$0xff]  }
  0xb2   : > { %7232 = vmatprep.subr.bf16.mxu1 %v7553_v41  ;;  %v2717_v57 = vrot.slane %v2716_v55, 4  ;;  %v2729_v9 = vrot.slane %v2727_v0, 5  ;;  %v2735_v10 = vrot.slane %v2733_v2, 5  ;;  %v2739_v15 = vrot.slane %v2737_v5, 4  ;;  %v6331_v55 = vld [vmem:[%s7777_s7 + $0x78] sm:$0xf] }
  0xb3   : > { %7200 = vmatprep.mubr.bf16.mxu0 %v6372_v62  ;;  %v2712_v8 = vsel %vm7867_vm5, %v2707_v63, %v2711_v44  ;;  %7279 = vmatpush3.bf16.msra.mxu0 %v7550_v36  ;;  %v2745_v16 = vrot.slane %v2743_v6, 5  ;;  %v2748_v19 = vshrl.u32 %v6325_v7, 16  ;;  %v2751_v25 = vshll.u32 %v6325_v7, 16  ;;  %v7565_v36 = vld [vmem:[%s9624_s1 + $0x140] sm:$0xff]   ;;  %v6332_v63 = vld [vmem:[%s7777_s7 + $0x7c] sm:$0xf] }
  0xb4   : > { %7153 = vmatmul.mubr.bf16.gmra.mxu1 %v7544_v31  ;;  %v2722_v14 = vsel %vm7867_vm5, %v2717_v57, %v2721_v45  ;;  %7280 = vmatprep.subr.bf16.mxu0 %v7554_v61  ;;  %v2730_v24 = vor.u32 %v2729_v9, %v2726_v4  ;;  %v2757_v26 = vshll.u32 %v6326_v13, 16  ;;  %v2740_v27 = vor.u32 %v2739_v15, %v2735_v10  ;;  %v7562_v31 = vld [vmem:[%s9624_s1 + $0x188] sm:$0xff]   ;;  %v7566_v59 = vld [vmem:[%s9624_s1 + $0x180] sm:$0xff]   ;;  %v8336_v2 = vld [vmem:[%s9624_s1 + $0x1f8] sm:$0xff]  }
  0xb5   : > { %7156 = vmatprep.mubr.bf16.mxu1 %v7547_v51  ;;  %7233 = vmatpush3.bf16.msra.mxu1 %v7553_v41  ;;  %v6373_v23 = vcombine.low %v2712_v8, %v2722_v14  ;;  %v2750_v20 = vrot.slane %v2748_v19, 4  ;;  %v2761_v1 = vshrl.u32 %v6326_v13, 16  ;;  %v2767_v11 = vshll.u32 %v6327_v18, 16  ;;  %v6333_v0 = vld [vmem:[%s7777_s7 + $0x80] sm:$0x1]  ;;  %v8343_v19 = vld [vmem:[%s9624_s1 + $0x238] sm:$0xff]  }
  0xb6   : > { %7234 = vmatprep.subr.bf16.mxu1 %v7557_v3  ;;  %v2731_v28 = vrot.slane %v2730_v24, 4  ;;  %v2753_v29 = vrot.slane %v2751_v25, 5  ;;  %v2759_v30 = vrot.slane %v2757_v26, 5  ;;  %v2741_v32 = vrot.slane %v2740_v27, 4  ;;  %v6334_v24 = vld [vmem:[%s7777_s7 + $0x84] sm:$0xf] }
  0xb7   : > { %v2763_v33 = vrot.slane %v2761_v1, 4  ;;  %v2769_v35 = vrot.slane %v2767_v11, 5  ;;  %7281 = vmatpush3.bf16.msra.mxu0 %v7554_v61  ;;  %v2772_v44 = vshrl.u32 %v6328_v39, 16  ;;  %v2775_v47 = vshll.u32 %v6328_v39, 16  ;;  %v6335_v25 = vld [vmem:[%s7777_s7 + $0x88] sm:$0xf] }
  0xb8   : > { %7201 = vmatmul.mubr.bf16.gmra.mxu0 %v6373_v23  ;;  %v2736_v37 = vsel %vm7867_vm5, %v2731_v28, %v2735_v10  ;;  %v2754_v38 = vor.u32 %v2753_v29, %v2750_v20  ;;  %7282 = vmatprep.subr.bf16.mxu0 %v7558_v22  ;;  %v2746_v41 = vsel %vm7867_vm5, %v2741_v32, %v2745_v16  ;;  %v2781_v50 = vshll.u32 %v6329_v40, 16  ;;  %v6336_v20 = vld [vmem:[%s7777_s7 + $0x8c] sm:$0x1]  ;;  %v6337_v32 = vld [vmem:[%s7777_s7 + $0x90] sm:$0xf] }
  0xb9   : > { %7235 = vmatpush3.bf16.msra.mxu1 %v7557_v3  ;;  %v2764_v42 = vor.u32 %v2763_v33, %v2759_v30  ;;  %v6374_v48 = vcombine.low %v2736_v37, %v2746_v41  ;;  %v2785_v51 = vshrl.u32 %v6329_v40, 16  ;;  %v2774_v52 = vrot.slane %v2772_v44, 4  ;;  %v7559_v33 = vld [vmem:[%s7777_s7 + $0x9c] sm:$0xff]   ;;  %v6338_v39 = vld [vmem:[%s7777_s7 + $0x94] sm:$0xf] }
  0xba   : > { %7236 = vmatprep.subr.bf16.mxu1 %v7561_v17  ;;  %v2755_v49 = vrot.slane %v2754_v38, 4  ;;  %v2777_v53 = vrot.slane %v2775_v47, 5  ;;  %v2791_v54 = vshll.u32 %v6330_v43, 16  ;;  %v2783_v61 = vrot.slane %v2781_v50, 5  ;;  %v6339_v43 = vld [vmem:[%s7777_s7 + $0x98] sm:$0x1] }
  0xbb   : > { %v2765_v45 = vrot.slane %v2764_v42, 4  ;;  %7283 = vmatpush3.bf16.msra.mxu0 %v7558_v22  ;;  %7204 = vmatprep.mubr.bf16.mxu0 %v6374_v48  ;;  %v2787_v62 = vrot.slane %v2785_v51, 4  ;;  %v2796_v5 = vshrl.u32 %v6331_v55, 16  ;;  %v2799_v9 = vshll.u32 %v6331_v55, 16 }
  0xbc   : > { %7157 = vmatmul.mubr.bf16.gmra.mxu1 %v7548_v12  ;;  %v2760_v60 = vsel %vm7867_vm5, %v2755_v49, %v2759_v30  ;;  %7284 = vmatprep.subr.bf16.mxu0 %v7562_v31  ;;  %v2778_v57 = vor.u32 %v2777_v53, %v2774_v52  ;;  %v2793_v4 = vrot.slane %v2791_v54, 5  ;;  %v2805_v10 = vshll.u32 %v6332_v63, 16 }
  0xbd   : > { %7160 = vmatprep.mubr.bf16.mxu1 %v7551_v21  ;;  %7237 = vmatpush3.bf16.msra.mxu1 %v7561_v17  ;;  %v2770_v3 = vsel %vm7867_vm5, %v2765_v45, %v2769_v35  ;;  %v2788_v8 = vor.u32 %v2787_v62, %v2783_v61  ;;  %v2798_v7 = vrot.slane %v2796_v5, 4  ;;  %v2809_v13 = vshrl.u32 %v6332_v63, 16  ;;  %v7556_v17 = vld [vmem:[%s7777_s7 + $0x90] sm:$0xff]  }
  0xbe   : > { %7238 = vmatprep.subr.bf16.mxu1 %v7565_v36  ;;  %v6375_v6 = vcombine.low %v2760_v60, %v2770_v3  ;;  %v2779_v12 = vrot.slane %v2778_v57, 4  ;;  %v2815_v14 = vshll.u32 %v6333_v0, 16  ;;  %v2801_v16 = vrot.slane %v2799_v9, 5  ;;  %v6340_v3 = vld [vmem:[%s7777_s7 + $0x9c] sm:$0xf] }
  0xbf   : > { %7285 = vmatpush3.bf16.msra.mxu0 %v7562_v31  ;;  %v2789_v15 = vrot.slane %v2788_v8, 4  ;;  %v2807_v18 = vrot.slane %v2805_v10, 5  ;;  %v2811_v22 = vrot.slane %v2809_v13, 4  ;;  %v2820_v1 = vshrl.u32 %v6334_v24, 16  ;;  %v6341_v57 = vld [vmem:[%s7777_s7 + $0xa0] sm:$0xf] }
  0xc0   : > { %7205 = vmatmul.mubr.bf16.gmra.mxu0 %v6375_v6  ;;  %v2784_v21 = vsel %vm7867_vm5, %v2779_v12, %v2783_v61  ;;  %v2817_v23 = vrot.slane %v2815_v14, 5  ;;  %7286 = vmatprep.subr.bf16.mxu0 %v7566_v59  ;;  %v2802_v27 = vor.u32 %v2801_v16, %v2798_v7  ;;  %v2823_v11 = vshll.u32 %v6334_v24, 16  ;;  %v6342_v8 = vld [vmem:[%s7777_s7 + $0xa4] sm:$0x1]  ;;  %v7563_v12 = vld [vmem:[%s7777_s7 + $0xb4] sm:$0xff]  }
  0xc1   : > { %7239 = vmatpush3.bf16.msra.mxu1 %v7565_v36  ;;  %v2794_v26 = vsel %vm7867_vm5, %v2789_v15, %v2793_v4  ;;  %v2812_v29 = vor.u32 %v2811_v22, %v2807_v18  ;;  %v2829_v30 = vshll.u32 %v6335_v25, 16  ;;  %v2833_v31 = vshrl.u32 %v6335_v25, 16  ;;  %v7560_v4 = vld [vmem:[%s7777_s7 + $0xa8] sm:$0xff]  }
  0xc2   : > { %7320 = vmatprep.subr.bf16.mxu1 %v8336_v2  ;;  %v6376_v28 = vcombine.low %v2784_v21, %v2794_v26  ;;  %v2803_v35 = vrot.slane %v2802_v27, 4  ;;  %v2822_v36 = vrot.slane %v2820_v1, 4  ;;  %v2825_v37 = vrot.slane %v2823_v11, 5  ;;  %v6344_v27 = vld [vmem:[%s7777_s7 + $0xac] sm:$0xf] }
  0xc3   : > { %7287 = vmatpush3.bf16.msra.mxu0 %v7566_v59  ;;  %v2839_v38 = vshll.u32 %v6336_v20, 16  ;;  %v2813_v40 = vrot.slane %v2812_v29, 4  ;;  %v2831_v41 = vrot.slane %v2829_v30, 5  ;;  %v2835_v42 = vrot.slane %v2833_v31, 4  ;;  %v6345_v20 = vld [vmem:[%s7777_s7 + $0xb0] sm:$0x1] }
  0xc4   : > { %7161 = vmatmul.mubr.bf16.gmra.mxu1 %v7552_v34  ;;  %7368 = vmatprep.subr.bf16.mxu0 %v8343_v19  ;;  %v2844_v44 = vshrl.u32 %v6337_v32, 16  ;;  %v2808_v47 = vsel %vm7867_vm5, %v2803_v35, %v2807_v18  ;;  %v2826_v48 = vor.u32 %v2825_v37, %v2822_v36  ;;  %v2847_v50 = vshll.u32 %v6337_v32, 16 }
  0xc5   : > { %7164 = vmatprep.mubr.bf16.mxu1 %v7555_v58  ;;  %7208 = vmatprep.mubr.bf16.mxu0 %v6376_v28  ;;  %v2841_v49 = vrot.slane %v2839_v38, 5  ;;  %v2818_v51 = vsel %vm7867_vm5, %v2813_v40, %v2817_v23  ;;  %v2836_v34 = vor.u32 %v2835_v42, %v2831_v41  ;;  %v2853_v52 = vshll.u32 %v6338_v39, 16  ;;  %v6343_v23 = vld [vmem:[%s7777_s7 + $0xa8] sm:$0xf] }
  0xc6   : > { %v2846_v45 = vrot.slane %v2844_v44, 4  ;;  %v6377_v53 = vcombine.low %v2808_v47, %v2818_v51  ;;  %v2827_v54 = vrot.slane %v2826_v48, 4  ;;  %v2849_v55 = vrot.slane %v2847_v50, 5  ;;  %v6346_v44 = vld [vmem:[%s7777_s7 + $0xb4] sm:$0xf]  ;;  %v7564_v47 = vld [vmem:[%s7777_s7 + $0xc0] sm:$0xff]  }
  0xc7   : > { %v2857_v58 = vshrl.u32 %v6338_v39, 16  ;;  %v2837_v59 = vrot.slane %v2836_v34, 4  ;;  %v2855_v60 = vrot.slane %v2853_v52, 5  ;;  %v2863_v61 = vshll.u32 %v6339_v43, 16  ;;  %v6347_v51 = vld [vmem:[%s7777_s7 + $0xb8] sm:$0xf] }
  0xc8   : > { %7209 = vmatmul.mubr.bf16.gmra.mxu0 %v6377_v53  ;;  %v2832_v62 = vsel %vm7867_vm5, %v2827_v54, %v2831_v41  ;;  %v2850_v63 = vor.u32 %v2849_v55, %v2846_v45  ;;  %v2868_v9 = vshrl.u32 %v6340_v3, 16  ;;  %v2871_v10 = vshll.u32 %v6340_v3, 16  ;;  %v6348_v34 = vld [vmem:[%s7777_s7 + $0xbc] sm:$0x1] }
  0xc9   : > { %v2859_v0 = vrot.slane %v2857_v58, 4  ;;  %v2842_v5 = vsel %vm7867_vm5, %v2837_v59, %v2841_v49  ;;  %v2865_v6 = vrot.slane %v2863_v61, 5  ;;  %v2877_v15 = vshll.u32 %v6341_v57, 16 }
  0xca   : > { %v6378_v7 = vcombine.low %v2832_v62, %v2842_v5  ;;  %v2851_v13 = vrot.slane %v2850_v63, 4  ;;  %v2870_v16 = vrot.slane %v2868_v9, 4  ;;  %v2873_v18 = vrot.slane %v2871_v10, 5 }
  0xcb   : > { %v2860_v14 = vor.u32 %v2859_v0, %v2855_v60  ;;  %v2881_v21 = vshrl.u32 %v6341_v57, 16  ;;  %v2887_v22 = vshll.u32 %v6342_v8, 16  ;;  %v2879_v26 = vrot.slane %v2877_v15, 5  ;;  %v6349_v57 = vld [vmem:[%s7777_s7 + $0xc0] sm:$0xf] }
  0xcc   : > { %7165 = vmatmul.mubr.bf16.gmra.mxu1 %v7556_v17  ;;  %7212 = vmatprep.mubr.bf16.mxu0 %v6378_v7  ;;  %v2856_v24 = vsel %vm7867_vm5, %v2851_v13, %v2855_v60  ;;  %v2874_v1 = vor.u32 %v2873_v18, %v2870_v16  ;;  %v2892_v28 = vshrl.u32 %v6343_v23, 16  ;;  %v2895_v30 = vshll.u32 %v6343_v23, 16  ;;  %v6351_v8 = vld [vmem:[%s7777_s7 + $0xc8] sm:$0x1] }
  0xcd   : > { %7168 = vmatprep.mubr.bf16.mxu1 %v7559_v33  ;;  %v2861_v25 = vrot.slane %v2860_v14, 4  ;;  %v2883_v11 = vrot.slane %v2881_v21, 4  ;;  %v2889_v17 = vrot.slane %v2887_v22, 5  ;;  %v2901_v31 = vshll.u32 %v6344_v27, 16 }
  0xce   : > { %v2905_v32 = vshrl.u32 %v6344_v27, 16  ;;  %v2875_v35 = vrot.slane %v2874_v1, 4  ;;  %v2894_v37 = vrot.slane %v2892_v28, 4  ;;  %v2897_v38 = vrot.slane %v2895_v30, 5  ;;  %v6393_v1 = vld [vmem:[%s7777_s7 + $0x10] sm:$0xf] }
  0xcf   : > { %v2866_v29 = vsel %vm7867_vm5, %v2861_v25, %v2865_v6  ;;  %v2884_v36 = vor.u32 %v2883_v11, %v2879_v26  ;;  %v2903_v39 = vrot.slane %v2901_v31, 5  ;;  %v2911_v41 = vshll.u32 %v6345_v20, 16  ;;  %v6350_v6 = vld [vmem:[%s7777_s7 + $0xc4] sm:$0xf]  ;;  %v6392_v20 = vld [vmem:[%s7777_s7 + $0xc] sm:$0xe] }
  0xd0   : > { %v6379_v33 = vcombine.low %v2856_v24, %v2866_v29  ;;  %v2907_v40 = vrot.slane %v2905_v32, 4  ;;  %v2880_v42 = vsel %vm7867_vm5, %v2875_v35, %v2879_v26  ;;  %v2898_v48 = vor.u32 %v2897_v38, %v2894_v37  ;;  %v6394_v29 = vld [vmem:[%s7777_s7 + $0x14] sm:$0x1]  ;;  %v6396_v38 = vld [vmem:[%s7777_s7 + $0x1c] sm:$0xf] }
  0xd1   : > { %v2885_v43 = vrot.slane %v2884_v36, 4  ;;  %v2913_v50 = vrot.slane %v2911_v41, 5  ;;  %v2916_v45 = vshrl.u32 %v6346_v44, 16  ;;  %v2919_v53 = vshll.u32 %v6346_v44, 16  ;;  %v6395_v36 = vld [vmem:[%s7777_s7 + $0x18] sm:$0xe] }
  0xd2   : > { %7213 = vmatmul.mubr.bf16.gmra.mxu0 %v6379_v33  ;;  %v2908_v49 = vor.u32 %v2907_v40, %v2903_v39  ;;  %v2925_v54 = vshll.u32 %v6347_v51, 16  ;;  %v2929_v55 = vshrl.u32 %v6347_v51, 16  ;;  %v2899_v59 = vrot.slane %v2898_v48, 4 }
  0xd3   : > { %v2890_v52 = vsel %vm7867_vm5, %v2885_v43, %v2889_v17  ;;  %v2918_v61 = vrot.slane %v2916_v45, 4  ;;  %v2921_v62 = vrot.slane %v2919_v53, 5  ;;  %v2935_v3 = vshll.u32 %v6348_v34, 16  ;;  %v6398_v34 = vld [vmem:[%s7777_s7 + $0x24] sm:$0xe] }
  0xd4   : > { %7169 = vmatmul.mubr.bf16.gmra.mxu1 %v7560_v4  ;;  %v6380_v58 = vcombine.low %v2880_v42, %v2890_v52  ;;  %v2909_v60 = vrot.slane %v2908_v49, 4  ;;  %v2927_v63 = vrot.slane %v2925_v54, 5  ;;  %v2931_v0 = vrot.slane %v2929_v55, 4  ;;  %v6399_v55 = vld [vmem:[%s7777_s7 + $0x28] sm:$0xf] }
  0xd5   : > { %7172 = vmatprep.mubr.bf16.mxu1 %v7563_v12  ;;  %v2904_v4 = vsel %vm7867_vm5, %v2899_v59, %v2903_v39  ;;  %v2940_v9 = vshrl.u32 %v6349_v57, 16  ;;  %v2943_v10 = vshll.u32 %v6349_v57, 16  ;;  %v2922_v7 = vor.u32 %v2921_v62, %v2918_v61  ;;  %v6397_v39 = vld [vmem:[%s7777_s7 + $0x20] sm:$0x1]  ;;  %v7573_v62 = vld [vmem:[%s9624_s1 + $0x1f0] sm:$0xff]  }
  0xd6   : > { %7216 = vmatprep.mubr.bf16.mxu0 %v6380_v58  ;;  %v2914_v5 = vsel %vm7867_vm5, %v2909_v60, %v2913_v50  ;;  %v2932_v13 = vor.u32 %v2931_v0, %v2927_v63  ;;  %v2937_v14 = vrot.slane %v2935_v3, 5  ;;  %v2949_v18 = vshll.u32 %v6350_v6, 16  ;;  %v6400_v58 = vld [vmem:[%s7777_s7 + $0x2c] sm:$0x1]  ;;  %v6401_v0 = vld [vmem:[%s7777_s7 + $0x30] sm:$0xe] }
  0xd7   : > { %v6381_v12 = vcombine.low %v2904_v4, %v2914_v5  ;;  %v2942_v15 = vrot.slane %v2940_v9, 4  ;;  %v2945_v16 = vrot.slane %v2943_v10, 5  ;;  %v2953_v21 = vshrl.u32 %v6350_v6, 16  ;;  %v6402_v3 = vld [vmem:[%s7777_s7 + $0x34] sm:$0xf]  ;;  %v7568_v9 = vld [vmem:[%s7777_s7 + $0x24] sm:$0xff]  }
  0xd8   : > { %v2923_v22 = vrot.slane %v2922_v7, 4  ;;  %v2933_v23 = vrot.slane %v2932_v13, 4  ;;  %v2959_v24 = vshll.u32 %v6351_v8, 16  ;;  %v2951_v26 = vrot.slane %v2949_v18, 5  ;;  %v6403_v6 = vld [vmem:[%s7777_s7 + $0x38] sm:$0x1] }
  0xd9   : > { %v2946_v25 = vor.u32 %v2945_v16, %v2942_v15  ;;  %v2955_v27 = vrot.slane %v2953_v21, 4  ;;  %v6440_v30 = vrot.slane %v6392_v20, 9  ;;  %v3447_v35 = vrot.slane %v6393_v1, 5  ;;  %v7571_v13 = vld [vmem:[%s7777_s7 + $0x30] sm:$0xff]   ;;  %v6404_v21 = vld [vmem:[%s7777_s7 + $0x3c] sm:$0xe] }
  0xda   : > { %7217 = vmatmul.mubr.bf16.gmra.mxu0 %v6381_v12  ;;  %v2928_v11 = vsel %vm7867_vm5, %v2923_v22, %v2927_v63  ;;  %v2938_v17 = vsel %vm7867_vm5, %v2933_v23, %v2937_v14  ;;  %v2961_v28 = vrot.slane %v2959_v24, 5  ;;  %v3450_v37 = vrot.slane %v6394_v29, 5  ;;  %v7574_v18 = vld [vmem:[%s9624_s1 + $0x230] sm:$0xff]   ;;  %v6405_v22 = vld [vmem:[%s7777_s7 + $0x40] sm:$0xf]  ;;  %v7577_v20 = vld [vmem:[%s9624_s1 + $0x1e8] sm:$0xff]  }
  0xdb   : > { %v6382_v31 = vcombine.low %v2928_v11, %v2938_v17  ;;  %v2947_v32 = vrot.slane %v2946_v25, 4  ;;  %v2956_v33 = vor.u32 %v2955_v27, %v2951_v26  ;;  %v6441_v40 = vrot.slane %v6395_v36, 9  ;;  %v6406_v23 = vld [vmem:[%s7777_s7 + $0x44] sm:$0x1]  ;;  %v6407_v27 = vld [vmem:[%s7777_s7 + $0x48] sm:$0xe] }
  0xdc   : > { %7173 = vmatmul.mubr.bf16.gmra.mxu1 %v7564_v47  ;;  %v3448_v43 = vsel %vm7848_vm4, %v6440_v30, %v3447_v35  ;;  %v3449_v44 = vrot.slane %v3447_v35, 4  ;;  %v7567_v47 = vld [vmem:[%s7777_s7 + $0x18] sm:$0xff]   ;;  %v3454_v48 = vrot.slane %v6396_v38, 5  ;;  %v3457_v49 = vrot.slane %v6397_v39, 5  ;;  %v6409_v29 = vld [vmem:[%s7777_s7 + $0x50] sm:$0x1] }
  0xdd   : > { %7220 = vmatprep.mubr.bf16.mxu0 %v6382_v31  ;;  %v2952_v41 = vsel %vm7867_vm5, %v2947_v32, %v2951_v26  ;;  %v2957_v42 = vrot.slane %v2956_v33, 4  ;;  %v6442_v59 = vrot.slane %v6398_v34, 9  ;;  %v3461_v60 = vrot.slane %v6399_v55, 5  ;;  %v7581_v31 = vld [vmem:[%s9624_s1 + $0x1e0] sm:$0xff]  }
  0xde   : > { %v3451_v51 = vsel %vm7848_vm4, %v3449_v44, %v3450_v37  ;;  %v3455_v53 = vsel %vm7848_vm4, %v6441_v40, %v3454_v48  ;;  %v3456_v54 = vrot.slane %v3454_v48, 4  ;;  %v3464_v61 = vrot.slane %v6400_v58, 5  ;;  %v7572_v40 = vld [vmem:[%s7777_s7 + $0x3c] sm:$0xff]   ;;  %v6410_v44 = vld [vmem:[%s7777_s7 + $0x54] sm:$0xe] }
  0xdf   : > { %v2962_v50 = vsel %vm7867_vm5, %v2957_v42, %v2961_v28  ;;  %v6472_v52 = vcombine.low %v3448_v43, %v3451_v51  ;;  %v3462_v4 = vsel %vm7848_vm4, %v6442_v59, %v3461_v60  ;;  %v3463_v5 = vrot.slane %v3461_v60, 4  ;;  %v6408_v28 = vld [vmem:[%s7777_s7 + $0x4c] sm:$0xf]  ;;  %v6412_v48 = vld [vmem:[%s7777_s7 + $0x5c] sm:$0x1] }
  0xe0   : > { %v6383_v45 = vcombine.low %v2952_v41, %v2962_v50  ;;  %v3458_v63 = vsel %vm7848_vm4, %v3456_v54, %v3457_v49  ;;  %v6443_v8 = vrot.slane %v6401_v0, 9  ;;  %v3468_v10 = vrot.slane %v6402_v3, 5  ;;  %v7578_v43 = vld [vmem:[%s9624_s1 + $0x228] sm:$0xff]   ;;  %v6413_v54 = vld [vmem:[%s7777_s7 + $0x60] sm:$0xe]  ;;  %v7585_v3 = vld [vmem:[%s9624_s1 + $0x1d8] sm:$0xff]  }
  0xe1   : > { %7240 = vmatprep.mubr.bf16.mxu1 %v6472_v52  ;;  %v6473_v57 = vcombine.low %v3455_v53, %v3458_v63  ;;  %v3471_v12 = vrot.slane %v6403_v6, 5  ;;  %v3465_v7 = vsel %vm7848_vm4, %v3463_v5, %v3464_v61  ;;  %v6444_v24 = vrot.slane %v6404_v21, 9  ;;  %v6414_v55 = vld [vmem:[%s7777_s7 + $0x64] sm:$0xf]  ;;  %v6415_v58 = vld [vmem:[%s7777_s7 + $0x68] sm:$0x1] }
  0xe2   : > { %7221 = vmatmul.mubr.bf16.gmra.mxu0 %v6383_v45  ;;  %v6474_v14 = vcombine.low %v3462_v4, %v3465_v7  ;;  %v3469_v15 = vsel %vm7848_vm4, %v6443_v8, %v3468_v10  ;;  %v3470_v16 = vrot.slane %v3468_v10, 4  ;;  %v3475_v25 = vrot.slane %v6405_v22, 5  ;;  %v7582_v0 = vld [vmem:[%s9624_s1 + $0x220] sm:$0xff]   ;;  %v7589_v8 = vld [vmem:[%s9624_s1 + $0x1d0] sm:$0xff]   ;;  %v7586_v7 = vld [vmem:[%s9624_s1 + $0x218] sm:$0xff]  }
  0xe3   : > { %7288 = vmatprep.mubr.bf16.mxu0 %v7567_v47  ;;  %v3478_v26 = vrot.slane %v6406_v23, 5  ;;  %v6445_v30 = vrot.slane %v6407_v27, 9  ;;  %v3482_v35 = vrot.slane %v6408_v28, 5  ;;  %v3485_v36 = vrot.slane %v6409_v29, 5  ;;  %v6411_v47 = vld [vmem:[%s7777_s7 + $0x58] sm:$0xf] }
  0xe4   : > { %7241 = vmatmul.mubr.bf16.vlgmr.msra.gmra.mxu1 %v6473_v57  ;;  %v3476_v11 = vsel %vm7848_vm4, %v6444_v24, %v3475_v25  ;;  %v3477_v17 = vrot.slane %v3475_v25, 4  ;;  %v6446_v49 = vrot.slane %v6410_v44, 9  ;;  %v3489_v52 = vrot.slane %v6411_v47, 5  ;;  %v7576_v21 = vld [vmem:[%s7777_s7 + $0x54] sm:$0xff]   ;;  %v7579_v25 = vld [vmem:[%s7777_s7 + $0x60] sm:$0xff]  }
  0xe5   : > { %7321 = vmatpush3.bf16.msra.mxu1 %v8336_v2  ;;  %7244 = vmatprep.mubr.bf16.mxu1 %v6474_v14  ;;  %v3472_v2 = vsel %vm7848_vm4, %v3470_v16, %v3471_v12  ;;  %v3484_v42 = vrot.slane %v3482_v35, 4  ;;  %v3483_v34 = vsel %vm7848_vm4, %v6445_v30, %v3482_v35  ;;  %v3492_v53 = vrot.slane %v6412_v48, 5  ;;  %v6416_v14 = vld [vmem:[%s7777_s7 + $0x6c] sm:$0xe]  ;;  %v6418_v22 = vld [vmem:[%s7777_s7 + $0x74] sm:$0x1] }
  0xe6   : > { %7322 = vmatprep.subr.bf16.mxu1 %v7573_v62  ;;  %v6475_v1 = vcombine.low %v3469_v15, %v3472_v2  ;;  %v3479_v37 = vsel %vm7848_vm4, %v3477_v17, %v3478_v26  ;;  %v3490_v61 = vsel %vm7848_vm4, %v6446_v49, %v3489_v52  ;;  %v3496_v63 = vrot.slane %v6414_v55, 5  ;;  %v6417_v15 = vld [vmem:[%s7777_s7 + $0x70] sm:$0xf]  ;;  %v6419_v26 = vld [vmem:[%s7777_s7 + $0x78] sm:$0xe]  ;;  %v7597_v49 = vld [vmem:[%s9624_s1 + $0x1c0] sm:$0xff]  }
  0xe7   : > { %v6476_v41 = vcombine.low %v3476_v11, %v3479_v37  ;;  %v3486_v45 = vsel %vm7848_vm4, %v3484_v42, %v3485_v36  ;;  %v6447_v4 = vrot.slane %v6413_v54, 9  ;;  %v3499_v12 = vrot.slane %v6415_v58, 5  ;;  %v6420_v28 = vld [vmem:[%s7777_s7 + $0x7c] sm:$0xf]  ;;  %v6421_v29 = vld [vmem:[%s7777_s7 + $0x80] sm:$0x1] }
  0xe8   : > { %v6477_v57 = vcombine.low %v3483_v34, %v3486_v45  ;;  %v3498_v10 = vrot.slane %v3496_v63, 4  ;;  %v6448_v23 = vrot.slane %v6416_v14, 9  ;;  %v3503_v24 = vrot.slane %v6417_v15, 5  ;;  %v7590_v30 = vld [vmem:[%s9624_s1 + $0x210] sm:$0xff]   ;;  %v7594_v55 = vld [vmem:[%s9624_s1 + $0x208] sm:$0xff]   ;;  %v7598_v15 = vld [vmem:[%s9624_s1 + $0x200] sm:$0xff]  }
  0xe9   : > { %7323 = vmatpush3.bf16.msra.mxu1 %v7573_v62  ;;  %v3491_v62 = vrot.slane %v3489_v52, 4  ;;  %v3506_v2 = vrot.slane %v6418_v22, 5  ;;  %v3510_v35 = vrot.slane %v6420_v28, 5  ;;  %v3513_v44 = vrot.slane %v6421_v29, 5  ;;  %v6423_v52 = vld [vmem:[%s7777_s7 + $0x88] sm:$0xf] }
  0xea   : > { %7289 = vmatmul.mubr.bf16.vlgmr.msra.gmra.mxu0 %v7568_v9  ;;  %7324 = vmatprep.subr.bf16.mxu1 %v7577_v20  ;;  %v3500_v11 = vsel %vm7848_vm4, %v3498_v10, %v3499_v12  ;;  %v3505_v17 = vrot.slane %v3503_v24, 4  ;;  %v3517_v58 = vrot.slane %v6423_v52, 5  ;;  %v6430_v28 = vld [vmem:[%s7777_s7 + $0xa4] sm:$0x1] }
  0xeb   : > { %7369 = vmatpush3.bf16.msra.mxu0 %v8343_v19  ;;  %7292 = vmatprep.mubr.bf16.mxu0 %v7571_v13  ;;  %v7575_v19 = vld [vmem:[%s7777_s7 + $0x48] sm:$0xff]   ;;  %v3493_v9 = vsel %vm7848_vm4, %v3491_v62, %v3492_v53  ;;  %v3512_v45 = vrot.slane %v3510_v35, 4 }
  0xec   : > { %7370 = vmatprep.subr.bf16.mxu0 %v7574_v18  ;;  %7245 = vmatmul.mubr.bf16.gmra.mxu1 %v6475_v1  ;;  %v6478_v13 = vcombine.low %v3490_v61, %v3493_v9  ;;  %v3497_v1 = vsel %vm7848_vm4, %v6447_v4, %v3496_v63  ;;  %v6424_v53 = vld [vmem:[%s7777_s7 + $0x8c] sm:$0x1]  ;;  %v3519_v9 = vrot.slane %v3517_v58, 4 }
  0xed   : > { %7248 = vmatprep.mubr.bf16.mxu1 %v6476_v41  ;;  %7325 = vmatpush3.bf16.msra.mxu1 %v7577_v20  ;;  %v3507_v41 = vsel %vm7848_vm4, %v3505_v17, %v3506_v2  ;;  %v6479_v42 = vcombine.low %v3497_v1, %v3500_v11  ;;  %v3520_v61 = vrot.slane %v6424_v53, 5  ;;  %v7580_v4 = vld [vmem:[%s7777_s7 + $0x6c] sm:$0xff]   ;;  %v3514_v14 = vsel %vm7848_vm4, %v3512_v45, %v3513_v44  ;;  %v6429_v1 = vld [vmem:[%s7777_s7 + $0xa0] sm:$0xf] }
  0xee   : > { %7326 = vmatprep.subr.bf16.mxu1 %v7581_v31  ;;  %v3531_v29 = vrot.slane %v6429_v1, 5  ;;  %v6432_v44 = vld [vmem:[%s7777_s7 + $0xac] sm:$0xf] }
  0xef   : > { %7371 = vmatpush3.bf16.msra.mxu0 %v7574_v18  ;;  %v3521_v22 = vsel %vm7848_vm4, %v3519_v9, %v3520_v61  ;;  %v3538_v53 = vrot.slane %v6432_v44, 5  ;;  %v7587_v9 = vld [vmem:[%s7777_s7 + $0x90] sm:$0xff]  }
  0xf0   : > { %7372 = vmatprep.subr.bf16.mxu0 %v7578_v43 }
  0xf1   : > { %7327 = vmatpush3.bf16.msra.mxu1 %v7581_v31  ;;  %v3504_v31 = vsel %vm7848_vm4, %v6448_v23, %v3503_v24 }
  0xf2   : > { %7293 = vmatmul.mubr.bf16.gmra.mxu0 %v7572_v40  ;;  %7328 = vmatprep.subr.bf16.mxu1 %v7585_v3  ;;  %v7593_v40 = vld [vmem:[%s9624_s1 + $0x1c8] sm:$0xff]   ;;  %v6480_v34 = vcombine.low %v3504_v31, %v3507_v41  ;;  %v3534_v41 = vrot.slane %v6430_v28, 5  ;;  %v6437_v28 = vld [vmem:[%s7777_s7 + $0xc0] sm:$0xe] }
  0xf3   : > { %7296 = vmatprep.mubr.bf16.mxu0 %v7575_v19  ;;  %7373 = vmatpush3.bf16.msra.mxu0 %v7578_v43  ;;  %v6449_v43 = vrot.slane %v6419_v26, 9  ;;  %v6422_v19 = vld [vmem:[%s7777_s7 + $0x84] sm:$0xe]  ;;  %v6428_v26 = vld [vmem:[%s7777_s7 + $0x9c] sm:$0xe] }
  0xf4   : > { %7374 = vmatprep.subr.bf16.mxu0 %v7582_v0  ;;  %7249 = vmatmul.mubr.bf16.gmra.mxu1 %v6477_v57  ;;  %v6450_v54 = vrot.slane %v6422_v19, 9  ;;  %v6427_v57 = vld [vmem:[%s7777_s7 + $0x98] sm:$0x1]  ;;  %v6433_v19 = vld [vmem:[%s7777_s7 + $0xb0] sm:$0x1] }
  0xf5   : > { %7252 = vmatprep.mubr.bf16.mxu1 %v6478_v13  ;;  %7329 = vmatpush3.bf16.msra.mxu1 %v7585_v3  ;;  %v6426_v3 = vld [vmem:[%s7777_s7 + $0x94] sm:$0xf]  ;;  %v3511_v13 = vsel %vm7848_vm4, %v6449_v43, %v3510_v35  ;;  %v3527_v24 = vrot.slane %v6427_v57, 5  ;;  %v3533_v43 = vrot.slane %v3531_v29, 4 }
  0xf6   : > { %v8454_v32 = vpop.f32.mrf.mxu0  ;;  %v8456_v33 = vpop.f32.mrf.mxu1  ;;  %7330 = vmatprep.subr.bf16.mxu1 %v7589_v8  ;;  %v3524_v10 = vrot.slane %v6426_v3, 5  ;;  %v6481_v11 = vcombine.low %v3511_v13, %v3514_v14  ;;  %v6436_v13 = vld [vmem:[%s7777_s7 + $0xbc] sm:$0x1] }
  0xf7   : > { %7375 = vmatpush3.bf16.msra.mxu0 %v7582_v0  ;;  %v6425_v0 = vld [vmem:[%s7777_s7 + $0x90] sm:$0xe]  ;;  %v3535_v57 = vsel %vm7848_vm4, %v3533_v43, %v3534_v41  ;;  %v6455_v43 = vrot.slane %v6437_v28, 9 }
  0xf8   : > { %v8461_v38 = vpop.f32.mrf.mxu0  ;;  %v8463_v39 = vpop.f32.mrf.mxu1  ;;  %7376 = vmatprep.subr.bf16.mxu0 %v7586_v7  ;;  %v6451_v23 = vrot.slane %v6425_v0, 9  ;;  %v3526_v17 = vrot.slane %v3524_v10, 4 }
  0xf9   : > { %7331 = vmatpush3.bf16.msra.mxu1 %v7589_v8  ;;  %v7583_v8 = vld [vmem:[%s7777_s7 + $0x78] sm:$0xff]  }
  0xfa   : > { %v8473_v50 = vpop.f32.mrf.mxu0  ;;  %v8475_v51 = vpop.f32.mrf.mxu1  ;;  %7297 = vmatmul.mubr.bf16.gmra.mxu0 %v7576_v21  ;;  %7332 = vmatprep.subr.bf16.mxu1 %v7593_v40  ;;  %v3518_v21 = vsel %vm7848_vm4, %v6450_v54, %v3517_v58  ;;  %v3541_v54 = vrot.slane %v6433_v19, 5  ;;  %v3528_v0 = vsel %vm7848_vm4, %v3526_v17, %v3527_v24  ;;  %v3548_v24 = vrot.slane %v6436_v13, 5 }
  0xfb   : > { %7300 = vmatprep.mubr.bf16.mxu0 %v7579_v25  ;;  %7377 = vmatpush3.bf16.msra.mxu0 %v7586_v7 }
  0xfc   : > { %v8484_v59 = vpop.f32.mrf.mxu0  ;;  %v8486_v60 = vpop.f32.mrf.mxu1  ;;  %7378 = vmatprep.subr.bf16.mxu0 %v7590_v30  ;;  %7253 = vmatmul.mubr.bf16.gmra.mxu1 %v6479_v42  ;;  %v6431_v42 = vld [vmem:[%s7777_s7 + $0xa8] sm:$0xe] }
  0xfd   : > { %7256 = vmatprep.mubr.bf16.mxu1 %v6480_v34  ;;  %7333 = vmatpush3.bf16.msra.mxu1 %v7593_v40  ;;  %v6452_v40 = vrot.slane %v6428_v26, 9  ;;  %v6453_v34 = vrot.slane %v6431_v42, 9 }
  0xfe   : > { %v8496_v5 = vpop.f32.mrf.mxu0  ;;  %v8498_v6 = vpop.f32.mrf.mxu1  ;;  %7334 = vmatprep.subr.bf16.mxu1 %v7597_v49 }
  0xff   : > { %7379 = vmatpush3.bf16.msra.mxu0 %v7590_v30  ;;  %v6482_v30 = vcombine.low %v3518_v21, %v3521_v22  ;;  %v3532_v3 = vsel %vm7848_vm4, %v6452_v40, %v3531_v29  ;;  %v6438_v29 = vld [vmem:[%s7777_s7 + $0xc4] sm:$0xf] }
 0x100   : > { %v8510_v16 = vpop.f32.mrf.mxu0  ;;  %v8512_v18 = vpop.f32.mrf.mxu1  ;;  %7380 = vmatprep.subr.bf16.mxu0 %v7594_v55  ;;  %v6484_v1 = vcombine.low %v3532_v3, %v3535_v57  ;;  %v3552_v44 = vrot.slane %v6438_v29, 5 }
 0x101   : > { %7335 = vmatpush3.bf16.msra.mxu1 %v7597_v49  ;;  %v3525_v49 = vsel %vm7848_vm4, %v6451_v23, %v3524_v10  ;;  %v6435_v10 = vld [vmem:[%s7777_s7 + $0xb8] sm:$0xf] }
 0x102   : > { %v8518_v27 = vpop.f32.mrf.mxu0  ;;  %v8520_v20 = vpop.f32.mrf.mxu1  ;;  %7301 = vmatmul.mubr.bf16.gmra.mxu0 %v7580_v4  ;;  %v3540_v4 = vrot.slane %v3538_v53, 4  ;;  %v3545_v23 = vrot.slane %v6435_v10, 5  ;;  %v6483_v26 = vcombine.low %v3525_v49, %v3528_v0  ;;  %v7588_v49 = vld [vmem:[%s7777_s7 + $0x9c] sm:$0xff]   ;;  %v8641_v0 = vsel %vm7848_vm4, %v6455_v43, %v3552_v44 }
 0x103   : > { %9633 = vst [vmem:[#allocation9_spill] sm:$0xff] %v8520_v20  ;;  %7304 = vmatprep.mubr.bf16.mxu0 %v7583_v8  ;;  %7381 = vmatpush3.bf16.msra.mxu0 %v7594_v55  ;;  %v7584_v55 = vld [vmem:[%s7777_s7 + $0x84] sm:$0xff]   ;;  %v6434_v8 = vld [vmem:[%s7777_s7 + $0xb4] sm:$0xe]  ;;  %v3554_v3 = vrot.slane %v3552_v44, 4 }
 0x104   : > { %v8533_v36 = vpop.f32.mrf.mxu0  ;;  %v8535_v37 = vpop.f32.mrf.mxu1  ;;  %7382 = vmatprep.subr.bf16.mxu0 %v7598_v15  ;;  %7257 = vmatmul.mubr.bf16.gmra.mxu1 %v6481_v11  ;;  %v6454_v14 = vrot.slane %v6434_v8, 9  ;;  %v8620_v11 = vsel %vm7848_vm4, %v6453_v34, %v3538_v53  ;;  %v8624_v17 = vsel %vm7848_vm4, %v3540_v4, %v3541_v54  ;;  %v3547_v42 = vrot.slane %v3545_v23, 4  ;;  %v6568_v8 = vld [vmem:[%s7777_s7 + $0x18] sm:$0xf] }
 0x105   : > { %9634 = vst [vmem:[#allocation10_spill] sm:$0xff] %v8535_v37  ;;  %7260 = vmatprep.mubr.bf16.mxu1 %v6482_v30  ;;  %v6578_v37 = vld [vmem:[%s7777_s7 + $0x40] sm:$0xf] }
 0x106   : > { %v8543_v47 = vpop.f32.mrf.mxu0  ;;  %v8545_v48 = vpop.f32.mrf.mxu1  ;;  %v8631_v41 = vsel %vm7848_vm4, %v6454_v14, %v3545_v23  ;;  %v7591_v23 = vld [vmem:[%s7777_s7 + $0xa8] sm:$0xff]  }
 0x107   : > { %9635 = vst [vmem:[#allocation11_spill] sm:$0xff] %v8545_v48  ;;  %7383 = vmatpush3.bf16.msra.mxu0 %v7598_v15  ;;  %v6439_v15 = vld [vmem:[%s7777_s7 + $0xc8] sm:$0x1] }
 0x108   : > { %v8555_v62 = vpop.f32.mrf.mxu0  ;;  %v8557_v63 = vpop.f32.mrf.mxu1  ;;  %v3555_v19 = vrot.slane %v6439_v15, 5 }
 0x109   : > { %9636 = vst [vmem:[#allocation12_spill] sm:$0xff] %v8557_v63 }
 0x10a   : > { %v8564_v12 = vpop.f32.mrf.mxu0  ;;  %v8566_v7 = vpop.f32.mrf.mxu1  ;;  %7305 = vmatmul.mubr.bf16.gmra.mxu0 %v7584_v55  ;;  %v8637_v55 = vsel %vm7848_vm4, %v3547_v42, %v3548_v24  ;;  %v6570_v24 = vld [vmem:[%s7777_s7 + $0x20] sm:$0x1] }
 0x10b   : > { %9637 = vst [vmem:[#allocation13_spill] sm:$0xff] %v8566_v7  ;;  %7308 = vmatprep.mubr.bf16.mxu0 %v7587_v9  ;;  %v6486_v4 = vcombine.low %v8631_v41, %v8637_v55  ;;  %v6569_v9 = vld [vmem:[%s7777_s7 + $0x1c] sm:$0xf]  ;;  %v4462_v15 = vshll.u32 %v6570_v24, 16  ;;  %v6571_v24 = vld [vmem:[%s7777_s7 + $0x24] sm:$0xf] }
 0x10c   : > { %v8579_v25 = vpop.f32.mrf.mxu0  ;;  %v8581_v2 = vpop.f32.mrf.mxu1  ;;  %7261 = vmatmul.mubr.bf16.gmra.mxu1 %v6483_v26  ;;  %v4443_v26 = vshrl.u32 %v6568_v8, 16  ;;  %v4456_v29 = vshrl.u32 %v6569_v9, 16 }
 0x10d   : > { %9638 = vst [vmem:[#allocation14_spill] sm:$0xff] %v8581_v2  ;;  %7264 = vmatprep.mubr.bf16.mxu1 %v6484_v1  ;;  %v6574_v2 = vld [vmem:[%s7777_s7 + $0x30] sm:$0xf] }
 0x10e   : > { %v8586_v31 = vpop.f32.mrf.mxu0  ;;  %v8588_v35 = vpop.f32.mrf.mxu1  ;;  %v4445_v43 = vrot.slane %v4443_v26, 4  ;;  %v4458_v55 = vrot.slane %v4456_v29, 4  ;;  %v4467_v26 = vshrl.u32 %v6571_v24, 16 }
 0x10f   : > { %9639 = vst [vmem:[#allocation15_spill] sm:$0xff] %v8588_v35 }
 0x110   : > { %v8593_v45 = vpop.f32.mrf.mxu0  ;;  %v8595_v52 = vpop.f32.mrf.mxu1 }
 0x111   : > { %9640 = vst [vmem:[#allocation16_spill] sm:$0xff] %v8595_v52 }
 0x112   : > { %v8599_v58 = vpop.f32.mrf.mxu0  ;;  %v8601_v61 = vpop.f32.mrf.mxu1  ;;  %7309 = vmatmul.mubr.bf16.gmra.mxu0 %v7588_v49 }
 0x113   : > { %9641 = vst [vmem:[#allocation17_spill] sm:$0xff] %v8601_v61  ;;  %7312 = vmatprep.mubr.bf16.mxu0 %v7591_v23 }
 0x114   : > { %v8614_v21 = vpop.f32.mrf.mxu0  ;;  %v8616_v22 = vpop.f32.mrf.mxu1 }
 0x115   : > { %9642 = vst [vmem:[#allocation18_spill] sm:$0xff] %v8616_v22  ;;  %v4469_v22 = vrot.slane %v4467_v26, 4 }
 0x116   : > { %v7050_v30 = vpop.f32.mrf.mxu1  ;;  %v7098_v40 = vpop.f32.mrf.mxu0 }
 0x117   : > { %v1421_v34 = vadd.f32 %v7050_v30, %v8454_v32  ;;  %v6485_v32 = vcombine.low %v8620_v11, %v8624_v17  ;;  %v4446_v11 = vshll.u32 %v6568_v8, 16  ;;  %v4452_v17 = vshll.u32 %v6569_v9, 16  ;;  %v6656_v30 = vld [vmem:[%s7777_s7 + $0x18] sm:$0xe] }
 0x118   : > { %v1292_v53 = vpop.f32.mrf.mxu1  ;;  %v1889_v54 = vpop.f32.mrf.mxu0 }
 0x119   : > { %v1419_v57 = vadd.f32 %v1292_v53, %v8461_v38  ;;  %v8650_v10 = vadd.f32 %v7098_v40, %v1421_v34  ;;  %v8657_v38 = vsel %vm7848_vm4, %v3554_v3, %v3555_v19  ;;  %v6657_v40 = vld [vmem:[%s7777_s7 + $0x1c] sm:$0xf]  ;;  %v4448_v44 = vrot.slane %v4446_v11, 5  ;;  %v6658_v34 = vld [vmem:[%s7777_s7 + $0x20] sm:$0x1]  ;;  %7265 = vmatmul.mubr.bf16.gmra.mxu1 %v6485_v32 }
 0x11a   : > { %v7051_v13 = vpop.f32.mrf.mxu1  ;;  %v8652_v14 = vpop.f32.mrf.mxu0  ;;  %v4454_v19 = vrot.slane %v4452_v17, 5  ;;  %v6704_v53 = vrot.slane %v6656_v30, 9  ;;  %v4464_v3 = vrot.slane %v4462_v15, 5  ;;  %v5310_v8 = vrot.slane %v6657_v40, 5  ;;  %7268 = vmatprep.mubr.bf16.mxu1 %v6486_v4 }
 0x11b   : > { %9643 = vst [vmem:[#allocation19_spill] sm:$0xff] %v8650_v10  ;;  %v8664_v41 = vadd.f32 %v1889_v54, %v1419_v57  ;;  %v5313_v9 = vrot.slane %v6658_v34, 5  ;;  %v4449_v57 = vor.u32 %v4448_v44, %v4445_v43  ;;  %v6573_v10 = vld [vmem:[%s7777_s7 + $0x2c] sm:$0x1]  ;;  %v4470_v11 = vshll.u32 %v6571_v24, 16 }
 0x11c   : > { %v8666_v1 = vpop.f32.mrf.mxu1  ;;  %v8668_v42 = vpop.f32.mrf.mxu0  ;;  %v1422_v17 = vadd.f32 %v7051_v13, %v8473_v50  ;;  %v4459_v29 = vor.u32 %v4458_v55, %v4454_v19  ;;  %v8681_v15 = vsel %vm7848_vm4, %v6704_v53, %v5310_v8  ;;  %v5312_v30 = vrot.slane %v5310_v8, 4  ;;  %v6659_v34 = vld [vmem:[%s7777_s7 + $0x24] sm:$0xe]  ;;  %v6660_v50 = vld [vmem:[%s7777_s7 + $0x28] sm:$0xf] }
 0x11d   : > { %9644 = vst [vmem:[#allocation20_spill] sm:$0xff] %v8664_v41  ;;  %v6572_v41 = vld [vmem:[%s7777_s7 + $0x28] sm:$0xf]  ;;  %v4450_v44 = vrot.slane %v4449_v57, 4  ;;  %v4472_v24 = vrot.slane %v4470_v11, 5  ;;  %v4486_v55 = vshll.u32 %v6573_v10, 16 }
 0x11e   : > { %v8672_v28 = vpop.f32.mrf.mxu1  ;;  %v8674_v54 = vpop.f32.mrf.mxu0  ;;  %v4476_v40 = vshll.u32 %v6572_v41, 16  ;;  %v4480_v61 = vshrl.u32 %v6572_v41, 16  ;;  %v4460_v13 = vrot.slane %v4459_v29, 4  ;;  %v8691_v23 = vsel %vm7848_vm4, %v5312_v30, %v5313_v9  ;;  %v6661_v8 = vld [vmem:[%s7777_s7 + $0x2c] sm:$0x1]  ;;  %v7592_v57 = vld [vmem:[%s7777_s7 + $0xb4] sm:$0xff]  }
 0x11f   : > { %v4455_v41 = vsel %vm7867_vm5, %v4450_v44, %v4454_v19  ;;  %v4473_v26 = vor.u32 %v4472_v24, %v4469_v22  ;;  %v7595_v11 = vld [vmem:[%s7777_s7 + $0xc0] sm:$0xff]   ;;  %v4488_v29 = vrot.slane %v4486_v55, 5  ;;  %v6705_v30 = vrot.slane %v6659_v34, 9  ;;  %v6575_v22 = vld [vmem:[%s7777_s7 + $0x34] sm:$0xf]  ;;  %7313 = vmatmul.mubr.bf16.gmra.mxu0 %v7592_v57 }
 0x120   : > { %v8684_v49 = vpop.f32.mrf.mxu1  ;;  %v8686_v43 = vpop.f32.mrf.mxu0  ;;  %v4478_v53 = vrot.slane %v4476_v40, 5  ;;  %v4482_v9 = vrot.slane %v4480_v61, 4  ;;  %v4465_v10 = vsel %vm7867_vm5, %v4460_v13, %v4464_v3  ;;  %v5317_v40 = vrot.slane %v6660_v50, 5  ;;  %v6576_v50 = vld [vmem:[%s7777_s7 + $0x38] sm:$0x1]  ;;  %7316 = vmatprep.mubr.bf16.mxu0 %v7595_v11 }
 0x121   : > { %v6632_v19 = vcombine.low %v4455_v41, %v4465_v10  ;;  %v4474_v44 = vrot.slane %v4473_v26, 4  ;;  %v5320_v32 = vrot.slane %v6661_v8, 5  ;;  %v8717_v24 = vadd.f32 %v8652_v14, %v1422_v17  ;;  %v6662_v14 = vld [vmem:[%s7777_s7 + $0x30] sm:$0xe]  ;;  %v6664_v57 = vld [vmem:[%s7777_s7 + $0x38] sm:$0x1] }
 0x122   : > { %v8694_v52 = vpop.f32.mrf.mxu1  ;;  %v8696_v35 = vpop.f32.mrf.mxu0  ;;  %v4483_v63 = vor.u32 %v4482_v9, %v4478_v53  ;;  %v8714_v61 = vsel %vm7848_vm4, %v6705_v30, %v5317_v40  ;;  %v5319_v3 = vrot.slane %v5317_v40, 4  ;;  %v1420_v34 = vadd.f32 %v8666_v1, %v8484_v59  ;;  %v6663_v30 = vld [vmem:[%s7777_s7 + $0x34] sm:$0xf] }
 0x123   : > { %9645 = vst [vmem:[#allocation21_spill] sm:$0xff] %v8717_v24  ;;  %v4479_v8 = vsel %vm7867_vm5, %v4474_v44, %v4478_v53  ;;  %v4491_v26 = vshrl.u32 %v6574_v2, 16  ;;  %v4494_v9 = vshll.u32 %v6574_v2, 16  ;;  %v4500_v1 = vshll.u32 %v6575_v22, 16 }
 0x124   : > { %v8707_v7 = vpop.f32.mrf.mxu1  ;;  %v8709_v4 = vpop.f32.mrf.mxu0  ;;  %v4484_v41 = vrot.slane %v4483_v63, 4  ;;  %v8731_v17 = vsel %vm7848_vm4, %v5319_v3, %v5320_v32  ;;  %v8734_v59 = vadd.f32 %v8668_v42, %v1420_v34  ;;  %v4504_v10 = vshrl.u32 %v6575_v22, 16  ;;  %v6577_v42 = vld [vmem:[%s7777_s7 + $0x3c] sm:$0xf] }
 0x125   : > { %v4493_v32 = vrot.slane %v4491_v26, 4  ;;  %v4496_v11 = vrot.slane %v4494_v9, 5  ;;  %v9647_v44 = vcombine.low %v8641_v0, %v8657_v38  ;;  %v4502_v3 = vrot.slane %v4500_v1, 5 }
 0x126   : > { %v8722_v13 = vpop.f32.mrf.mxu1  ;;  %v8724_v55 = vpop.f32.mrf.mxu0  ;;  %9646 = vst [vmem:[#allocation22_spill] sm:$0xff] %v8734_v59  ;;  %v4489_v2 = vsel %vm7867_vm5, %v4484_v41, %v4488_v29  ;;  %v4506_v34 = vrot.slane %v4504_v10, 4  ;;  %v4510_v59 = vshll.u32 %v6576_v50, 16  ;;  %v7596_v29 = vld [vmem:[%s7777_s7 + $0xcc] sm:$0xff]   ;;  %v6706_v26 = vrot.slane %v6662_v14, 9 }
 0x127   : > { %7269 = vmatmul.mubr.bf16.gmra.mxu1 %v9647_v44  ;;  %v6633_v22 = vcombine.low %v4479_v8, %v4489_v2  ;;  %v4497_v41 = vor.u32 %v4496_v11, %v4493_v32  ;;  %v5324_v53 = vrot.slane %v6663_v30, 5  ;;  %v5327_v9 = vrot.slane %v6664_v57, 5  ;;  %v6665_v32 = vld [vmem:[%s7777_s7 + $0x3c] sm:$0xe]  ;;  %7317 = vmatmul.mubr.bf16.gmra.mxu0 %v7596_v29  ;;  %v6666_v44 = vld [vmem:[%s7777_s7 + $0x40] sm:$0xf] }
 0x128   : > { %v8738_v40 = vpop.f32.mrf.mxu1  ;;  %v8740_v63 = vpop.f32.mrf.mxu0  ;;  %7336 = vmatprep.mubr.bf16.mxu1 %v6632_v19  ;;  %v4507_v20 = vor.u32 %v4506_v34, %v4502_v3  ;;  %v4512_v0 = vrot.slane %v4510_v59, 5  ;;  %v1425_v38 = vadd.f32 %v8672_v28, %v8496_v5  ;;  %v4515_v8 = vshrl.u32 %v6577_v42, 16  ;;  %v6579_v19 = vld [vmem:[%s7777_s7 + $0x44] sm:$0x1] }
 0x129   : > { %v4498_v50 = vrot.slane %v4497_v41, 4  ;;  %v8760_v1 = vsel %vm7848_vm4, %v6706_v26, %v5324_v53  ;;  %v5326_v10 = vrot.slane %v5324_v53, 4  ;;  %v4518_v14 = vshll.u32 %v6577_v42, 16 }
 0x12a   : > { %v8750_v24 = vpop.f32.mrf.mxu1  ;;  %v8752_v48 = vpop.f32.mrf.mxu0  ;;  %v4508_v30 = vrot.slane %v4507_v20, 4  ;;  %v8764_v57 = vadd.f32 %v8674_v54, %v1425_v38  ;;  %v4517_v2 = vrot.slane %v4515_v8, 4  ;;  %v4524_v59 = vshll.u32 %v6578_v37, 16  ;;  %v6667_v54 = vld [vmem:[%s7777_s7 + $0x44] sm:$0x1] }
 0x12b   : > { %v4503_v28 = vsel %vm7867_vm5, %v4498_v50, %v4502_v3  ;;  %v5328_v53 = vsel %vm7848_vm4, %v5326_v10, %v5327_v9  ;;  %v4520_v42 = vrot.slane %v4518_v14, 5  ;;  %v4528_v20 = vshrl.u32 %v6578_v37, 16  ;;  %v6580_v10 = vld [vmem:[%s7777_s7 + $0x48] sm:$0xf] }
 0x12c   : > { %9648 = vst [vmem:[#allocation23_spill] sm:$0xff] %v8764_v57  ;;  %v8767_v11 = vpop.f32.mrf.mxu1  ;;  %v8769_v5 = vpop.f32.mrf.mxu0  ;;  %v9649_v34 = vcombine.low %v8681_v15, %v8691_v23  ;;  %v4513_v41 = vsel %vm7867_vm5, %v4508_v30, %v4512_v0  ;;  %v6738_v29 = vcombine.low %v8760_v1, %v5328_v53  ;;  %v4526_v26 = vrot.slane %v4524_v59, 5 }
 0x12d   : > { %v4534_v38 = vshll.u32 %v6579_v19, 16  ;;  %v6634_v8 = vcombine.low %v4503_v28, %v4513_v41  ;;  %v4521_v3 = vor.u32 %v4520_v42, %v4517_v2  ;;  %v4530_v50 = vrot.slane %v4528_v20, 4  ;;  %v6581_v2 = vld [vmem:[%s7777_s7 + $0x4c] sm:$0xf]  ;;  %v6668_v20 = vld [vmem:[%s7777_s7 + $0x48] sm:$0xe] }
 0x12e   : > { %7384 = vmatprep.mubr.bf16.mxu0 %v9649_v34  ;;  %v6707_v9 = vrot.slane %v6665_v32, 9  ;;  %v5331_v14 = vrot.slane %v6666_v44, 5  ;;  %v5334_v57 = vrot.slane %v6667_v54, 5  ;;  %v1423_v15 = vadd.f32 %v8684_v49, %v8510_v16  ;;  %v8786_v23 = vpop.f32.mrf.mxu1  ;;  %v8788_v0 = vpop.f32.mrf.mxu0  ;;  %v6582_v32 = vld [vmem:[%s7777_s7 + $0x50] sm:$0x1] }
 0x12f   : > { %7337 = vmatmul.mubr.bf16.vlgmr.msra.gmra.mxu1 %v6633_v22  ;;  %v4536_v37 = vrot.slane %v4534_v38, 5  ;;  %v4522_v1 = vrot.slane %v4521_v3, 4  ;;  %v4531_v19 = vor.u32 %v4530_v50, %v4526_v26  ;;  %v1426_v30 = vadd.f32 %v8694_v52, %v8518_v27  ;;  %v6670_v38 = vld [vmem:[%s7777_s7 + $0x50] sm:$0x1] }
 0x130   : > { %7340 = vmatprep.mubr.bf16.mxu1 %v6634_v8  ;;  %v1424_v22 = vadd.f32 %v8707_v7, %v8533_v36  ;;  %v8797_v59 = vsel %vm7848_vm4, %v6707_v9, %v5331_v14  ;;  %v5333_v16 = vrot.slane %v5331_v14, 4  ;;  %v8800_v49 = vadd.f32 %v8686_v43, %v1423_v15  ;;  %v8803_v53 = vpop.f32.mrf.mxu1  ;;  %v8805_v42 = vpop.f32.mrf.mxu0  ;;  %v6669_v43 = vld [vmem:[%s7777_s7 + $0x4c] sm:$0xf]  ;;  %v6583_v9 = vld [vmem:[%s7777_s7 + $0x54] sm:$0xf] }
 0x131   : > { %v4539_v28 = vshrl.u32 %v6580_v10, 16  ;;  %v4527_v27 = vsel %vm7867_vm5, %v4522_v1, %v4526_v26  ;;  %v4532_v36 = vrot.slane %v4531_v19, 4  ;;  %v8810_v7 = vadd.f32 %v8696_v35, %v1426_v30  ;;  %v6584_v19 = vld [vmem:[%s7777_s7 + $0x58] sm:$0xf] }
 0x132   : > { %v8813_v52 = vadd.f32 %v8709_v4, %v1424_v22  ;;  %v5335_v44 = vsel %vm7848_vm4, %v5333_v16, %v5334_v57  ;;  %v4542_v34 = vshll.u32 %v6580_v10, 16  ;;  %v4548_v41 = vshll.u32 %v6581_v2, 16  ;;  %v8820_v8 = vpop.f32.mrf.mxu1  ;;  %v8822_v26 = vpop.f32.mrf.mxu0 }
 0x133   : > { %v4541_v54 = vrot.slane %v4539_v28, 4  ;;  %v9650_v35 = vcombine.low %v8714_v61, %v8731_v17  ;;  %v4537_v4 = vsel %vm7867_vm5, %v4532_v36, %v4536_v37  ;;  %v6739_v3 = vcombine.low %v8797_v59, %v5335_v44  ;;  %v6671_v44 = vld [vmem:[%s7777_s7 + $0x54] sm:$0xe] }
 0x134   : > { %v4552_v50 = vshrl.u32 %v6581_v2, 16  ;;  %v4558_v57 = vshll.u32 %v6582_v32, 16  ;;  %v6635_v10 = vcombine.low %v4527_v27, %v4537_v4  ;;  %v4544_v14 = vrot.slane %v4542_v34, 5  ;;  %v8836_v32 = vpop.f32.mrf.mxu0 }
 0x135   : > { %7385 = vmatmul.mubr.bf16.vlgmr.msra.gmra.mxu0 %v9650_v35  ;;  %v4550_v15 = vrot.slane %v4548_v41, 5  ;;  %v6708_v1 = vrot.slane %v6668_v20, 9  ;;  %v5338_v61 = vrot.slane %v6669_v43, 5  ;;  %v5341_v17 = vrot.slane %v6670_v38, 5  ;;  %v6585_v20 = vld [vmem:[%s7777_s7 + $0x5c] sm:$0x1] }
 0x136   : > { %7388 = vmatprep.mubr.bf16.mxu0 %v6738_v29  ;;  %v4554_v30 = vrot.slane %v4552_v50, 4  ;;  %v4560_v22 = vrot.slane %v4558_v57, 5  ;;  %v4545_v16 = vor.u32 %v4544_v14, %v4541_v54  ;;  %v1429_v37 = vadd.f32 %v8722_v13, %v8543_v47  ;;  %v8834_v29 = vpop.f32.mrf.mxu1  ;;  %v6672_v41 = vld [vmem:[%s7777_s7 + $0x58] sm:$0xf]  ;;  %v6673_v57 = vld [vmem:[%s7777_s7 + $0x5c] sm:$0x1] }
 0x137   : > { %7341 = vmatmul.mubr.bf16.gmra.mxu1 %v6635_v10  ;;  %v4563_v2 = vshrl.u32 %v6583_v9, 16  ;;  %v4566_v59 = vshll.u32 %v6583_v9, 16  ;;  %v5339_v27 = vsel %vm7848_vm4, %v6708_v1, %v5338_v61  ;;  %v5340_v36 = vrot.slane %v5338_v61, 4 }
 0x138   : > { %v4555_v28 = vor.u32 %v4554_v30, %v4550_v15  ;;  %v4572_v43 = vshll.u32 %v6584_v19, 16  ;;  %v4546_v54 = vrot.slane %v4545_v16, 4  ;;  %v8843_v34 = vadd.f32 %v8724_v55, %v1429_v37  ;;  %v8853_v55 = vpop.f32.mrf.mxu0 }
 0x139   : > { %v4565_v47 = vrot.slane %v4563_v2, 4  ;;  %v4568_v13 = vrot.slane %v4566_v59, 5  ;;  %v5342_v35 = vsel %vm7848_vm4, %v5340_v36, %v5341_v17  ;;  %v4576_v50 = vshrl.u32 %v6584_v19, 16  ;;  %v6586_v2 = vld [vmem:[%s7777_s7 + $0x60] sm:$0xf] }
 0x13a   : > { %v4556_v38 = vrot.slane %v4555_v28, 4  ;;  %v4574_v4 = vrot.slane %v4572_v43, 5  ;;  %v4551_v9 = vsel %vm7867_vm5, %v4546_v54, %v4550_v15  ;;  %v6740_v10 = vcombine.low %v5339_v27, %v5342_v35  ;;  %v8851_v30 = vpop.f32.mrf.mxu1  ;;  %v8860_v36 = vpop.f32.mrf.mxu0 }
 0x13b   : > { %v4569_v14 = vor.u32 %v4568_v13, %v4565_v47  ;;  %v4582_v1 = vshll.u32 %v6585_v20, 16  ;;  %v4578_v16 = vrot.slane %v4576_v50, 4  ;;  %v6709_v37 = vrot.slane %v6671_v44, 9  ;;  %v6587_v13 = vld [vmem:[%s7777_s7 + $0x64] sm:$0xf] }
 0x13c   : > { %v4561_v61 = vsel %vm7867_vm5, %v4556_v38, %v4560_v22  ;;  %v5345_v17 = vrot.slane %v6672_v41, 5  ;;  %v5348_v28 = vrot.slane %v6673_v57, 5  ;;  %v8858_v27 = vpop.f32.mrf.mxu1  ;;  %v1427_v43 = vadd.f32 %v8738_v40, %v8555_v62  ;;  %v6588_v41 = vld [vmem:[%s7777_s7 + $0x68] sm:$0x1]  ;;  %v8876_v50 = vpop.f32.mrf.mxu0 }
 0x13d   : > { %7389 = vmatmul.mubr.bf16.gmra.mxu0 %v6739_v3  ;;  %v6636_v19 = vcombine.low %v4551_v9, %v4561_v61  ;;  %v4570_v15 = vrot.slane %v4569_v14, 4  ;;  %v4584_v59 = vrot.slane %v4582_v1, 5  ;;  %v4579_v20 = vor.u32 %v4578_v16, %v4574_v4  ;;  %v6676_v14 = vld [vmem:[%s7777_s7 + $0x68] sm:$0x1] }
 0x13e   : > { %7392 = vmatprep.mubr.bf16.mxu0 %v6740_v10  ;;  %v5346_v3 = vsel %vm7848_vm4, %v6709_v37, %v5345_v17  ;;  %v5347_v22 = vrot.slane %v5345_v17, 4  ;;  %v1430_v54 = vadd.f32 %v8750_v24, %v8564_v12  ;;  %v1428_v47 = vadd.f32 %v8767_v11, %v8579_v25  ;;  %v8874_v35 = vpop.f32.mrf.mxu1  ;;  %v6674_v12 = vld [vmem:[%s7777_s7 + $0x60] sm:$0xe]  ;;  %v6675_v24 = vld [vmem:[%s7777_s7 + $0x64] sm:$0xf] }
 0x13f   : > { %7344 = vmatprep.mubr.bf16.mxu1 %v6636_v19  ;;  %v4575_v44 = vsel %vm7867_vm5, %v4570_v15, %v4574_v4  ;;  %v4587_v38 = vshrl.u32 %v6586_v2, 16  ;;  %v4580_v57 = vrot.slane %v4579_v20, 4  ;;  %v8881_v40 = vadd.f32 %v8740_v63, %v1427_v43  ;;  %v6589_v15 = vld [vmem:[%s7777_s7 + $0x6c] sm:$0xf] }
 0x140   : > { %v5349_v62 = vsel %vm7848_vm4, %v5347_v22, %v5348_v28  ;;  %v4590_v4 = vshll.u32 %v6586_v2, 16  ;;  %v8886_v11 = vadd.f32 %v8752_v48, %v1430_v54  ;;  %v8889_v9 = vadd.f32 %v8769_v5, %v1428_v47  ;;  %v8895_v48 = vpop.f32.mrf.mxu1  ;;  %v8897_v28 = vpop.f32.mrf.mxu0  ;;  %v6590_v22 = vld [vmem:[%s7777_s7 + $0x70] sm:$0xf] }
 0x141   : > { %v6741_v25 = vcombine.low %v5346_v3, %v5349_v62  ;;  %v4589_v10 = vrot.slane %v4587_v38, 4  ;;  %v4585_v1 = vsel %vm7867_vm5, %v4580_v57, %v4584_v59  ;;  %v4596_v63 = vshll.u32 %v6587_v13, 16 }
 0x142   : > { %9651 = vst [vmem:[#allocation24_spill] sm:$0xff] %v8889_v9  ;;  %v4592_v61 = vrot.slane %v4590_v4, 5  ;;  %v4600_v16 = vshrl.u32 %v6587_v13, 16  ;;  %v6637_v37 = vcombine.low %v4575_v44, %v4585_v1  ;;  %v4606_v17 = vshll.u32 %v6588_v41, 16  ;;  %v6591_v13 = vld [vmem:[%s7777_s7 + $0x74] sm:$0x1] }
 0x143   : > { %v6710_v2 = vrot.slane %v6674_v12, 9  ;;  %v5352_v19 = vrot.slane %v6675_v24, 5  ;;  %v4598_v20 = vrot.slane %v4596_v63, 5  ;;  %v5355_v59 = vrot.slane %v6676_v14, 5  ;;  %v6677_v4 = vld [vmem:[%s7777_s7 + $0x6c] sm:$0xe] }
 0x144   : > { %v4593_v5 = vor.u32 %v4592_v61, %v4589_v10  ;;  %v4602_v3 = vrot.slane %v4600_v16, 4  ;;  %7345 = vmatmul.mubr.bf16.gmra.mxu1 %v6637_v37  ;;  %v4608_v43 = vrot.slane %v4606_v17, 5  ;;  %v1433_v47 = vadd.f32 %v8786_v23, %v8586_v31  ;;  %v6678_v14 = vld [vmem:[%s7777_s7 + $0x70] sm:$0xf]  ;;  %v6679_v1 = vld [vmem:[%s7777_s7 + $0x74] sm:$0x1]  ;;  %v8913_v61 = vpop.f32.mrf.mxu1  ;;  %v8915_v63 = vpop.f32.mrf.mxu0 }
 0x145   : > { %7393 = vmatmul.mubr.bf16.gmra.mxu0 %v6741_v25  ;;  %v5353_v44 = vsel %vm7848_vm4, %v6710_v2, %v5352_v19  ;;  %v5354_v54 = vrot.slane %v5352_v19, 4  ;;  %v4611_v57 = vshrl.u32 %v6589_v15, 16  ;;  %v4614_v62 = vshll.u32 %v6589_v15, 16 }
 0x146   : > { %v4594_v41 = vrot.slane %v4593_v5, 4  ;;  %v4603_v38 = vor.u32 %v4602_v3, %v4598_v20  ;;  %v8909_v24 = vadd.f32 %v8788_v0, %v1433_v47  ;;  %v4620_v25 = vshll.u32 %v6590_v22, 16  ;;  %v8919_v15 = vpop.f32.mrf.mxu1  ;;  %v8921_v5 = vpop.f32.mrf.mxu0 }
 0x147   : > { %v5356_v12 = vsel %vm7848_vm4, %v5354_v54, %v5355_v59  ;;  %v4624_v10 = vshrl.u32 %v6590_v22, 16  ;;  %v4613_v37 = vrot.slane %v4611_v57, 4  ;;  %v4616_v17 = vrot.slane %v4614_v62, 5 }
 0x148   : > { %9652 = vst [vmem:[#allocation25_spill] sm:$0xff] %v8909_v24  ;;  %v4599_v31 = vsel %vm7867_vm5, %v4594_v41, %v4598_v20  ;;  %v4604_v23 = vrot.slane %v4603_v38, 4  ;;  %v6742_v16 = vcombine.low %v5353_v44, %v5356_v12  ;;  %v4622_v2 = vrot.slane %v4620_v25, 5  ;;  %v6592_v20 = vld [vmem:[%s7777_s7 + $0x78] sm:$0xf]  ;;  %v8926_v57 = vpop.f32.mrf.mxu1 }
 0x149   : > { %v4626_v19 = vrot.slane %v4624_v10, 4  ;;  %v4630_v0 = vshll.u32 %v6591_v13, 16  ;;  %v6711_v59 = vrot.slane %v6677_v4, 9  ;;  %v5359_v22 = vrot.slane %v6678_v14, 5  ;;  %v8928_v13 = vpop.f32.mrf.mxu0  ;;  %v6593_v25 = vld [vmem:[%s7777_s7 + $0x7c] sm:$0xf] }
 0x14a   : > { %v4609_v3 = vsel %vm7867_vm5, %v4604_v23, %v4608_v43  ;;  %7396 = vmatprep.mubr.bf16.mxu0 %v6742_v16  ;;  %v5362_v54 = vrot.slane %v6679_v1, 5  ;;  %v4617_v47 = vor.u32 %v4616_v17, %v4613_v37  ;;  %v1431_v4 = vadd.f32 %v8803_v53, %v8593_v45  ;;  %v6680_v53 = vld [vmem:[%s7777_s7 + $0x78] sm:$0xe] }
 0x14b   : > { %v6638_v44 = vcombine.low %v4599_v31, %v4609_v3  ;;  %v4627_v41 = vor.u32 %v4626_v19, %v4622_v2  ;;  %v4632_v38 = vrot.slane %v4630_v0, 5  ;;  %v5360_v62 = vsel %vm7848_vm4, %v6711_v59, %v5359_v22  ;;  %v6594_v31 = vld [vmem:[%s7777_s7 + $0x80] sm:$0x1]  ;;  %v8960_v3 = vpop.f32.mrf.mxu0 }
 0x14c   : > { %v5361_v43 = vrot.slane %v5359_v22, 4  ;;  %v1434_v12 = vadd.f32 %v8820_v8, %v8599_v58  ;;  %v4618_v10 = vrot.slane %v4617_v47, 4  ;;  %v1432_v1 = vadd.f32 %v8834_v29, %v8614_v21  ;;  %v6681_v8 = vld [vmem:[%s7777_s7 + $0x7c] sm:$0xf]  ;;  %v6682_v0 = vld [vmem:[%s7777_s7 + $0x80] sm:$0x1] }
 0x14d   : > { %7348 = vmatprep.mubr.bf16.mxu1 %v6638_v44  ;;  %v4628_v14 = vrot.slane %v4627_v41, 4  ;;  %v4635_v23 = vshrl.u32 %v6592_v20, 16  ;;  %v8943_v37 = vadd.f32 %v8805_v42, %v1431_v4  ;;  %v4638_v58 = vshll.u32 %v6592_v20, 16  ;;  %v8958_v42 = vpop.f32.mrf.mxu1  ;;  %v6595_v41 = vld [vmem:[%s7777_s7 + $0x84] sm:$0xf] }
 0x14e   : > { %v5363_v16 = vsel %vm7848_vm4, %v5361_v43, %v5362_v54  ;;  %v8946_v45 = vadd.f32 %v8822_v26, %v1434_v12  ;;  %v4623_v17 = vsel %vm7867_vm5, %v4618_v10, %v4622_v2  ;;  %v8955_v19 = vadd.f32 %v8836_v32, %v1432_v1  ;;  %v6596_v4 = vld [vmem:[%s7777_s7 + $0x88] sm:$0xf]  ;;  %v6597_v1 = vld [vmem:[%s7777_s7 + $0x8c] sm:$0x1] }
 0x14f   : > { %9653 = vst [vmem:[#allocation26_spill] sm:$0xff] %v8943_v37  ;;  %v4633_v21 = vsel %vm7867_vm5, %v4628_v14, %v4632_v38  ;;  %v6743_v29 = vcombine.low %v5360_v62, %v5363_v16  ;;  %v4637_v59 = vrot.slane %v4635_v23, 4  ;;  %v4640_v22 = vrot.slane %v4638_v58, 5 }
 0x150   : > { %9654 = vst [vmem:[#allocation27_spill] sm:$0xff] %v8946_v45  ;;  %9655 = vst [vmem:[#allocation28_spill] sm:$0xff] %v8955_v19  ;;  %v6639_v26 = vcombine.low %v4623_v17, %v4633_v21  ;;  %v4644_v54 = vshll.u32 %v6593_v25, 16  ;;  %v4648_v2 = vshrl.u32 %v6593_v25, 16  ;;  %v4654_v20 = vshll.u32 %v6594_v31, 16  ;;  %v8969_v31 = vpop.f32.mrf.mxu1  ;;  %v8971_v23 = vpop.f32.mrf.mxu0 }
 0x151   : > { %7397 = vmatmul.mubr.bf16.gmra.mxu0 %v6743_v29  ;;  %v6712_v44 = vrot.slane %v6680_v53, 9  ;;  %v5366_v47 = vrot.slane %v6681_v8, 5  ;;  %v4641_v32 = vor.u32 %v4640_v22, %v4637_v59  ;;  %v5369_v62 = vrot.slane %v6682_v0, 5  ;;  %v6684_v0 = vld [vmem:[%s7777_s7 + $0x88] sm:$0xf] }
 0x152   : > { %7349 = vmatmul.mubr.bf16.gmra.mxu1 %v6639_v26  ;;  %v4646_v38 = vrot.slane %v4644_v54, 5  ;;  %v1437_v43 = vadd.f32 %v8851_v30, %v8456_v33  ;;  %v4650_v12 = vrot.slane %v4648_v2, 4  ;;  %v4656_v10 = vrot.slane %v4654_v20, 5  ;;  %v6683_v30 = vld [vmem:[%s7777_s7 + $0x84] sm:$0xe]  ;;  %v8981_v59 = vpop.f32.mrf.mxu1  ;;  %v8983_v22 = vpop.f32.mrf.mxu0 }
 0x153   : > { %v5367_v25 = vsel %vm7848_vm4, %v6712_v44, %v5366_v47  ;;  %v5368_v14 = vrot.slane %v5366_v47, 4  ;;  %v4642_v16 = vrot.slane %v4641_v32, 4  ;;  %v4659_v53 = vshrl.u32 %v6595_v41, 16  ;;  %v6685_v26 = vld [vmem:[%s7777_s7 + $0x8c] sm:$0x1] }
 0x154   : > { %v8974_v58 = vadd.f32 %v8853_v55, %v1437_v43  ;;  %v4662_v33 = vshll.u32 %v6595_v41, 16  ;;  %v4651_v8 = vor.u32 %v4650_v12, %v4646_v38  ;;  %v4668_v21 = vshll.u32 %v6596_v4, 16  ;;  %v8989_v43 = vpop.f32.mrf.mxu0 }
 0x155   : > { %v5370_v17 = vsel %vm7848_vm4, %v5368_v14, %v5369_v62  ;;  %v4672_v29 = vshrl.u32 %v6596_v4, 16  ;;  %v4647_v54 = vsel %vm7867_vm5, %v4642_v16, %v4646_v38  ;;  %v4661_v2 = vrot.slane %v4659_v53, 4  ;;  %v8987_v62 = vpop.f32.mrf.mxu1 }
 0x156   : > { %9656 = vst [vmem:[#allocation29_spill] sm:$0xff] %v8974_v58  ;;  %v6744_v55 = vcombine.low %v5367_v25, %v5370_v17  ;;  %v4664_v20 = vrot.slane %v4662_v33, 5  ;;  %v4652_v44 = vrot.slane %v4651_v8, 4  ;;  %v4670_v47 = vrot.slane %v4668_v21, 5 }
 0x157   : > { %v4674_v41 = vrot.slane %v4672_v29, 4  ;;  %v4678_v32 = vshll.u32 %v6597_v1, 16  ;;  %v6713_v12 = vrot.slane %v6683_v30, 9  ;;  %v5373_v14 = vrot.slane %v6684_v0, 5  ;;  %v6598_v1 = vld [vmem:[%s7777_s7 + $0x90] sm:$0xf] }
 0x158   : > { %7400 = vmatprep.mubr.bf16.mxu0 %v6744_v55  ;;  %v4665_v4 = vor.u32 %v4664_v20, %v4661_v2  ;;  %v5376_v58 = vrot.slane %v6685_v26, 5  ;;  %v4657_v38 = vsel %vm7867_vm5, %v4652_v44, %v4656_v10  ;;  %v1435_v53 = vadd.f32 %v8858_v27, %v8463_v39  ;;  %v6599_v39 = vld [vmem:[%s7777_s7 + $0x94] sm:$0xf]  ;;  %v6600_v27 = vld [vmem:[%s7777_s7 + $0x98] sm:$0x1]  ;;  %v9007_v26 = vpop.f32.mrf.mxu1 }
 0x159   : > { %v4675_v25 = vor.u32 %v4674_v41, %v4670_v47  ;;  %v4680_v16 = vrot.slane %v4678_v32, 5  ;;  %v6640_v33 = vcombine.low %v4647_v54, %v4657_v38  ;;  %v5374_v17 = vsel %vm7848_vm4, %v6713_v12, %v5373_v14  ;;  %v9009_v54 = vpop.f32.mrf.mxu0  ;;  %v6688_v32 = vld [vmem:[%s7777_s7 + $0x98] sm:$0x1] }
 0x15a   : > { %v4666_v8 = vrot.slane %v4665_v4, 4  ;;  %v5375_v30 = vrot.slane %v5373_v14, 4  ;;  %v8999_v29 = vadd.f32 %v8860_v36, %v1435_v53  ;;  %v1438_v10 = vadd.f32 %v8874_v35, %v8475_v51  ;;  %v6686_v51 = vld [vmem:[%s7777_s7 + $0x90] sm:$0xe]  ;;  %v6687_v35 = vld [vmem:[%s7777_s7 + $0x94] sm:$0xf] }
 0x15b   : > { %v4676_v21 = vrot.slane %v4675_v25, 4  ;;  %v1436_v0 = vadd.f32 %v8895_v48, %v8486_v60  ;;  %7352 = vmatprep.mubr.bf16.mxu1 %v6640_v33  ;;  %v4683_v2 = vshrl.u32 %v6598_v1, 16  ;;  %v4686_v20 = vshll.u32 %v6598_v1, 16 }
 0x15c   : > { %9657 = vst [vmem:[#allocation30_spill] sm:$0xff] %v8999_v29  ;;  %v4671_v55 = vsel %vm7867_vm5, %v4666_v8, %v4670_v47  ;;  %v5377_v36 = vsel %vm7848_vm4, %v5375_v30, %v5376_v58  ;;  %v9020_v44 = vadd.f32 %v8876_v50, %v1438_v10  ;;  %v4692_v12 = vshll.u32 %v6599_v39, 16  ;;  %v9027_v1 = vpop.f32.mrf.mxu1  ;;  %v9029_v50 = vpop.f32.mrf.mxu0  ;;  %v6602_v30 = vld [vmem:[%s7777_s7 + $0xa0] sm:$0xf] }
 0x15d   : > { %v4681_v60 = vsel %vm7867_vm5, %v4676_v21, %v4680_v16  ;;  %v6745_v48 = vcombine.low %v5374_v17, %v5377_v36  ;;  %v9023_v41 = vadd.f32 %v8897_v28, %v1436_v0  ;;  %v4685_v4 = vrot.slane %v4683_v2, 4  ;;  %v6601_v16 = vld [vmem:[%s7777_s7 + $0x9c] sm:$0xf] }
 0x15e   : > { %9658 = vst [vmem:[#allocation31_spill] sm:$0xff] %v9020_v44  ;;  %v6641_v47 = vcombine.low %v4671_v55, %v4681_v60  ;;  %v4688_v58 = vrot.slane %v4686_v20, 5  ;;  %v4696_v14 = vshrl.u32 %v6599_v39, 16  ;;  %v4702_v38 = vshll.u32 %v6600_v27, 16  ;;  %v6603_v27 = vld [vmem:[%s7777_s7 + $0xa4] sm:$0x1]  ;;  %v9037_v55 = vpop.f32.mrf.mxu1  ;;  %v9039_v36 = vpop.f32.mrf.mxu0 }
 0x15f   : > { %9659 = vst [vmem:[#allocation32_spill] sm:$0xff] %v9023_v41  ;;  %7401 = vmatmul.mubr.bf16.gmra.mxu0 %v6745_v48  ;;  %v6714_v25 = vrot.slane %v6686_v51, 9  ;;  %v5380_v53 = vrot.slane %v6687_v35, 5  ;;  %v4694_v33 = vrot.slane %v4692_v12, 5  ;;  %v5383_v8 = vrot.slane %v6688_v32, 5 }
 0x160   : > { %7353 = vmatmul.mubr.bf16.gmra.mxu1 %v6641_v47  ;;  %v4689_v28 = vor.u32 %v4688_v58, %v4685_v4  ;;  %v1441_v17 = vadd.f32 %v8913_v61, %v8498_v6  ;;  %v4698_v21 = vrot.slane %v4696_v14, 4  ;;  %v4704_v10 = vrot.slane %v4702_v38, 5  ;;  %v6689_v61 = vld [vmem:[%s7777_s7 + $0x9c] sm:$0xe]  ;;  %v6690_v47 = vld [vmem:[%s7777_s7 + $0xa0] sm:$0xf]  ;;  %v9049_v58 = vpop.f32.mrf.mxu1  ;;  %v9051_v12 = vpop.f32.mrf.mxu0 }
 0x161   : > { %v5381_v0 = vsel %vm7848_vm4, %v6714_v25, %v5380_v53  ;;  %v5382_v39 = vrot.slane %v5380_v53, 4  ;;  %v4707_v51 = vshrl.u32 %v6601_v16, 16  ;;  %v4710_v6 = vshll.u32 %v6601_v16, 16  ;;  %v6691_v4 = vld [vmem:[%s7777_s7 + $0xa4] sm:$0x1] }
 0x162   : > { %v4690_v2 = vrot.slane %v4689_v28, 4  ;;  %v9042_v20 = vadd.f32 %v8915_v63, %v1441_v17  ;;  %v4699_v35 = vor.u32 %v4698_v21, %v4694_v33  ;;  %v4716_v48 = vshll.u32 %v6602_v30, 16  ;;  %v9057_v41 = vpop.f32.mrf.mxu0 }
 0x163   : > { %v5384_v60 = vsel %vm7848_vm4, %v5382_v39, %v5383_v8  ;;  %v4720_v32 = vshrl.u32 %v6602_v30, 16  ;;  %v4709_v38 = vrot.slane %v4707_v51, 4  ;;  %v4712_v25 = vrot.slane %v4710_v6, 5  ;;  %v9055_v8 = vpop.f32.mrf.mxu1 }
 0x164   : > { %9660 = vst [vmem:[#allocation33_spill] sm:$0xff] %v9042_v20  ;;  %v4695_v14 = vsel %vm7867_vm5, %v4690_v2, %v4694_v33  ;;  %v6746_v63 = vcombine.low %v5381_v0, %v5384_v60  ;;  %v4700_v53 = vrot.slane %v4699_v35, 4  ;;  %v4718_v16 = vrot.slane %v4716_v48, 5 }
 0x165   : > { %v4722_v28 = vrot.slane %v4720_v32, 4  ;;  %v4726_v17 = vshll.u32 %v6603_v27, 16  ;;  %v4713_v30 = vor.u32 %v4712_v25, %v4709_v38  ;;  %v6715_v21 = vrot.slane %v6689_v61, 9  ;;  %v6604_v27 = vld [vmem:[%s7777_s7 + $0xa8] sm:$0xf]  ;;  %v9064_v6 = vpop.f32.mrf.mxu1 }
 0x166   : > { %7404 = vmatprep.mubr.bf16.mxu0 %v6746_v63  ;;  %v5387_v39 = vrot.slane %v6690_v47, 5  ;;  %v5390_v20 = vrot.slane %v6691_v4, 5  ;;  %v4705_v33 = vsel %vm7867_vm5, %v4700_v53, %v4704_v10  ;;  %v1439_v51 = vadd.f32 %v8919_v15, %v8512_v18  ;;  %v9662_v10 = vld [vmem:[#allocation9_spill] sm:$0xff]  ;;  %v9663_v63 = vld [vmem:[#allocation10_spill] sm:$0xff] }
 0x167   : > { %v4723_v0 = vor.u32 %v4722_v28, %v4718_v16  ;;  %v4728_v2 = vrot.slane %v4726_v17, 5  ;;  %v6642_v35 = vcombine.low %v4695_v14, %v4705_v33  ;;  %v4714_v61 = vrot.slane %v4713_v30, 4  ;;  %v6605_v15 = vld [vmem:[%s7777_s7 + $0xac] sm:$0xf]  ;;  %v6606_v14 = vld [vmem:[%s7777_s7 + $0xb0] sm:$0x1]  ;;  %v9077_v38 = vpop.f32.mrf.mxu1 }
 0x168   : > { %v5388_v60 = vsel %vm7848_vm4, %v6715_v21, %v5387_v39  ;;  %v5389_v48 = vrot.slane %v5387_v39, 4  ;;  %v9069_v47 = vadd.f32 %v8921_v5, %v1439_v51  ;;  %v1442_v4 = vadd.f32 %v8926_v57, %v9662_v10  ;;  %v6692_v17 = vld [vmem:[%s7777_s7 + $0xa8] sm:$0xe]  ;;  %v6693_v30 = vld [vmem:[%s7777_s7 + $0xac] sm:$0xf]  ;;  %v9085_v57 = vpop.f32.mrf.mxu0 }
 0x169   : > { %v4724_v32 = vrot.slane %v4723_v0, 4  ;;  %v1440_v18 = vadd.f32 %v8958_v42, %v9663_v63  ;;  %7356 = vmatprep.mubr.bf16.mxu1 %v6642_v35  ;;  %v4719_v25 = vsel %vm7867_vm5, %v4714_v61, %v4718_v16  ;;  %v4731_v5 = vshrl.u32 %v6604_v27, 16  ;;  %v6694_v16 = vld [vmem:[%s7777_s7 + $0xb0] sm:$0x1]  ;;  %v9096_v0 = vpop.f32.mrf.mxu1 }
 0x16a   : > { %9661 = vst [vmem:[#allocation34_spill] sm:$0xff] %v9069_v47  ;;  %v5391_v53 = vsel %vm7848_vm4, %v5389_v48, %v5390_v20  ;;  %v4734_v28 = vshll.u32 %v6604_v27, 16  ;;  %v9090_v39 = vadd.f32 %v8928_v13, %v1442_v4  ;;  %v4740_v35 = vshll.u32 %v6605_v15, 16  ;;  %v9098_v61 = vpop.f32.mrf.mxu0 }
 0x16b   : > { %v4729_v42 = vsel %vm7867_vm5, %v4724_v32, %v4728_v2  ;;  %v6747_v21 = vcombine.low %v5388_v60, %v5391_v53  ;;  %v9093_v33 = vadd.f32 %v8960_v3, %v1440_v18  ;;  %v4733_v51 = vrot.slane %v4731_v5, 4  ;;  %v6607_v32 = vld [vmem:[%s7777_s7 + $0xb4] sm:$0xf]  ;;  %v9101_v10 = vpop.f32.mrf.mxu1  ;;  %v6608_v53 = vld [vmem:[%s7777_s7 + $0xb8] sm:$0xf] }
 0x16c   : > { %9664 = vst [vmem:[#allocation9_spill] sm:$0xff] %v9090_v39  ;;  %v6643_v20 = vcombine.low %v4719_v25, %v4729_v42  ;;  %v4736_v27 = vrot.slane %v4734_v28, 5  ;;  %v4744_v2 = vshrl.u32 %v6605_v15, 16  ;;  %v4750_v48 = vshll.u32 %v6606_v14, 16  ;;  %v9666_v18 = vld [vmem:[#allocation11_spill] sm:$0xff]  ;;  %v9106_v5 = vpop.f32.mrf.mxu0 }
 0x16d   : > { %9665 = vst [vmem:[#allocation10_spill] sm:$0xff] %v9093_v33  ;;  %7405 = vmatmul.mubr.bf16.gmra.mxu0 %v6747_v21  ;;  %v6716_v60 = vrot.slane %v6692_v17, 9  ;;  %v5394_v13 = vrot.slane %v6693_v30, 5  ;;  %v4742_v4 = vrot.slane %v4740_v35, 5  ;;  %v5397_v63 = vrot.slane %v6694_v16, 5  ;;  %v9111_v42 = vpop.f32.mrf.mxu1 }
 0x16e   : > { %7357 = vmatmul.mubr.bf16.gmra.mxu1 %v6643_v20  ;;  %v4737_v3 = vor.u32 %v4736_v27, %v4733_v51  ;;  %v1445_v25 = vadd.f32 %v8969_v31, %v9666_v18  ;;  %v4746_v28 = vrot.slane %v4744_v2, 4  ;;  %v4752_v15 = vrot.slane %v4750_v48, 5  ;;  %v6609_v30 = vld [vmem:[%s7777_s7 + $0xbc] sm:$0x1]  ;;  %v6695_v51 = vld [vmem:[%s7777_s7 + $0xb4] sm:$0xe]  ;;  %v9117_v27 = vpop.f32.mrf.mxu0 }
 0x16f   : > { %v5395_v14 = vsel %vm7848_vm4, %v6716_v60, %v5394_v13  ;;  %v5396_v17 = vrot.slane %v5394_v13, 4  ;;  %v4755_v20 = vshrl.u32 %v6607_v32, 16  ;;  %v4758_v31 = vshll.u32 %v6607_v32, 16  ;;  %v6696_v60 = vld [vmem:[%s7777_s7 + $0xb8] sm:$0xf]  ;;  %v9123_v33 = vpop.f32.mrf.mxu1 }
 0x170   : > { %v4738_v21 = vrot.slane %v4737_v3, 4  ;;  %v9114_v16 = vadd.f32 %v8971_v23, %v1445_v25  ;;  %v4747_v35 = vor.u32 %v4746_v28, %v4742_v4  ;;  %v4764_v48 = vshll.u32 %v6608_v53, 16  ;;  %v6697_v13 = vld [vmem:[%s7777_s7 + $0xbc] sm:$0x1]  ;;  %v9129_v19 = vpop.f32.mrf.mxu0 }
 0x171   : > { %v5398_v2 = vsel %vm7848_vm4, %v5396_v17, %v5397_v63  ;;  %v4768_v18 = vshrl.u32 %v6608_v53, 16  ;;  %v4757_v25 = vrot.slane %v4755_v20, 4  ;;  %v4774_v28 = vshll.u32 %v6609_v30, 16  ;;  %v9127_v44 = vpop.f32.mrf.mxu1  ;;  %v9668_v20 = vld [vmem:[#allocation12_spill] sm:$0xff] }
 0x172   : > { %9667 = vst [vmem:[#allocation11_spill] sm:$0xff] %v9114_v16  ;;  %v4743_v3 = vsel %vm7867_vm5, %v4738_v21, %v4742_v4  ;;  %v6748_v23 = vcombine.low %v5395_v14, %v5398_v2  ;;  %v4760_v16 = vrot.slane %v4758_v31, 5  ;;  %v4748_v32 = vrot.slane %v4747_v35, 4  ;;  %v6610_v30 = vld [vmem:[%s7777_s7 + $0xc0] sm:$0xf] }
 0x173   : > { %v4766_v39 = vrot.slane %v4764_v48, 5  ;;  %v4770_v47 = vrot.slane %v4768_v18, 4  ;;  %v6717_v53 = vrot.slane %v6695_v51, 9  ;;  %v5401_v17 = vrot.slane %v6696_v60, 5  ;;  %v9136_v35 = vpop.f32.mrf.mxu1  ;;  %v9140_v18 = vpop.f32.mrf.mxu0  ;;  %v9670_v60 = vld [vmem:[#allocation13_spill] sm:$0xff] }
 0x174   : > { %7408 = vmatprep.mubr.bf16.mxu0 %v6748_v23  ;;  %v4761_v63 = vor.u32 %v4760_v16, %v4757_v25  ;;  %v5404_v29 = vrot.slane %v6697_v13, 5  ;;  %v4753_v4 = vsel %vm7867_vm5, %v4748_v32, %v4752_v15  ;;  %v4776_v21 = vrot.slane %v4774_v28, 5  ;;  %v9671_v13 = vld [vmem:[#allocation14_spill] sm:$0xff]  ;;  %v6612_v25 = vld [vmem:[%s7777_s7 + $0xc8] sm:$0x1] }
 0x175   : > { %v4771_v14 = vor.u32 %v4770_v47, %v4766_v39  ;;  %v1443_v31 = vadd.f32 %v8981_v59, %v9668_v20  ;;  %v6644_v2 = vcombine.low %v4743_v3, %v4753_v4  ;;  %v5402_v51 = vsel %vm7848_vm4, %v6717_v53, %v5401_v17  ;;  %v6611_v3 = vld [vmem:[%s7777_s7 + $0xc4] sm:$0xf]  ;;  %v9151_v32 = vpop.f32.mrf.mxu1 }
 0x176   : > { %v4762_v16 = vrot.slane %v4761_v63, 4  ;;  %v5403_v48 = vrot.slane %v5401_v17, 4  ;;  %v1446_v59 = vadd.f32 %v8987_v62, %v9670_v60  ;;  %v1444_v23 = vadd.f32 %v9007_v26, %v9671_v13  ;;  %v6698_v17 = vld [vmem:[%s7777_s7 + $0xc0] sm:$0xe]  ;;  %v6699_v4 = vld [vmem:[%s7777_s7 + $0xc4] sm:$0xf]  ;;  %v9159_v62 = vpop.f32.mrf.mxu0 }
 0x177   : > { %v4772_v15 = vrot.slane %v4771_v14, 4  ;;  %v9143_v47 = vadd.f32 %v8983_v22, %v1443_v31  ;;  %7360 = vmatprep.mubr.bf16.mxu1 %v6644_v2  ;;  %v4779_v22 = vshrl.u32 %v6610_v30, 16  ;;  %v4782_v53 = vshll.u32 %v6610_v30, 16  ;;  %v9170_v2 = vpop.f32.mrf.mxu1 }
 0x178   : > { %v4767_v28 = vsel %vm7867_vm5, %v4762_v16, %v4766_v39  ;;  %v5405_v63 = vsel %vm7848_vm4, %v5403_v48, %v5404_v29  ;;  %v9164_v20 = vadd.f32 %v8989_v43, %v1446_v59  ;;  %v9167_v31 = vadd.f32 %v9009_v54, %v1444_v23  ;;  %v6700_v39 = vld [vmem:[%s7777_s7 + $0xc8] sm:$0x1]  ;;  %v9172_v60 = vpop.f32.mrf.mxu0  ;;  %v6613_v59 = vld [vmem:[%s7777_s7 + $0xcc] sm:$0xf] }
 0x179   : > { %9669 = vst [vmem:[#allocation12_spill] sm:$0xff] %v9143_v47  ;;  %v4777_v26 = vsel %vm7867_vm5, %v4772_v15, %v4776_v21  ;;  %v6749_v14 = vcombine.low %v5402_v51, %v5405_v63  ;;  %v4781_v30 = vrot.slane %v4779_v22, 4  ;;  %v4784_v16 = vrot.slane %v4782_v53, 5  ;;  %v9175_v13 = vpop.f32.mrf.mxu1  ;;  %v9675_v63 = vld [vmem:[#allocation15_spill] sm:$0xff]  ;;  %v6614_v53 = vld [vmem:[%s7777_s7 + $0xd0] sm:$0xf] }
 0x17a   : > { %9672 = vst [vmem:[#allocation13_spill] sm:$0xff] %v9164_v20  ;;  %9673 = vst [vmem:[#allocation14_spill] sm:$0xff] %v9167_v31  ;;  %v6645_v29 = vcombine.low %v4767_v28, %v4777_v26  ;;  %v4788_v48 = vshll.u32 %v6611_v3, 16  ;;  %v4792_v21 = vshrl.u32 %v6611_v3, 16  ;;  %v4798_v51 = vshll.u32 %v6612_v25, 16 }
 0x17b   : > { %7409 = vmatmul.mubr.bf16.gmra.mxu0 %v6749_v14  ;;  %v6718_v15 = vrot.slane %v6698_v17, 9  ;;  %v5408_v43 = vrot.slane %v6699_v4, 5  ;;  %9674 = vst [vmem:[#allocation35_spill] sm:$0xff] %v9175_v13  ;;  %v4785_v54 = vor.u32 %v4784_v16, %v4781_v30  ;;  %v5411_v28 = vrot.slane %v6700_v39, 5  ;;  %v6615_v17 = vld [vmem:[%s7777_s7 + $0xd4] sm:$0x1]  ;;  %v9183_v4 = vpop.f32.mrf.mxu0 }
 0x17c   : > { %7361 = vmatmul.mubr.bf16.gmra.mxu1 %v6645_v29  ;;  %v4790_v23 = vrot.slane %v4788_v48, 5  ;;  %v1449_v22 = vadd.f32 %v9027_v1, %v9675_v63  ;;  %v4794_v26 = vrot.slane %v4792_v21, 4  ;;  %v4800_v14 = vrot.slane %v4798_v51, 5  ;;  %v9185_v29 = vpop.f32.mrf.mxu1  ;;  %v6701_v48 = vld [vmem:[%s7777_s7 + $0xcc] sm:$0xe] }
 0x17d   : > { %v5409_v3 = vsel %vm7848_vm4, %v6718_v15, %v5408_v43  ;;  %v5410_v25 = vrot.slane %v5408_v43, 4  ;;  %9676 = vst [vmem:[#allocation15_spill] sm:$0xff] %v9185_v29  ;;  %v4786_v30 = vrot.slane %v4785_v54, 4  ;;  %v4803_v16 = vshrl.u32 %v6613_v59, 16  ;;  %v6702_v15 = vld [vmem:[%s7777_s7 + $0xd0] sm:$0xf]  ;;  %v9195_v20 = vpop.f32.mrf.mxu0 }
 0x17e   : > { %v9188_v39 = vadd.f32 %v9029_v50, %v1449_v22  ;;  %v4806_v1 = vshll.u32 %v6613_v59, 16  ;;  %v4795_v21 = vor.u32 %v4794_v26, %v4790_v23  ;;  %v4812_v63 = vshll.u32 %v6614_v53, 16  ;;  %v6703_v43 = vld [vmem:[%s7777_s7 + $0xd4] sm:$0x1]  ;;  %v9197_v47 = vpop.f32.mrf.mxu1  ;;  %s9455_s7 = sand.u32 1, %s7681_s13  }
 0x17f   : > { %v5412_v51 = vsel %vm7848_vm4, %v5410_v25, %v5411_v28  ;;  %v4816_v31 = vshrl.u32 %v6614_v53, 16  ;;  %9678 = vst [vmem:[#allocation37_spill] sm:$0xff] %v9197_v47  ;;  %v4791_v54 = vsel %vm7867_vm5, %v4786_v30, %v4790_v23  ;;  %v4805_v22 = vrot.slane %v4803_v16, 4  ;;  %v9201_v24 = vpop.f32.mrf.mxu0  ;;  %s6109_s10 = sshll.u32 %s9455_s7, 8  ;;  %s5980_s26 = scalar_lea.sflag [#allocation4], %s9455_s7 }
 0x180   : > { %9677 = vst [vmem:[#allocation36_spill] sm:$0xff] %v9188_v39  ;;  %v6750_v50 = vcombine.low %v5409_v3, %v5412_v51  ;;  %v4808_v39 = vrot.slane %v4806_v1, 5  ;;  %v4796_v59 = vrot.slane %v4795_v21, 4  ;;  %v4814_v45 = vrot.slane %v4812_v63, 5  ;;  %v2388_v28 = vpop.f32.mrf.mxu1  ;;  %v9679_v3 = vld [vmem:[#allocation16_spill] sm:$0xff]  ;;  %v9680_v63 = vld [vmem:[#allocation17_spill] sm:$0xff] }
 0x181   : > { %v4818_v26 = vrot.slane %v4816_v31, 4  ;;  %v4822_v37 = vshll.u32 %v6615_v17, 16  ;;  %v6719_v25 = vrot.slane %v6701_v48, 9  ;;  %v5415_v29 = vrot.slane %v6702_v15, 5  ;;  %v3193_v16 = vpop.f32.mrf.mxu0  ;;  %v9681_v15 = vld [vmem:[#allocation18_spill] sm:$0xff]  ;;  %s9479_s11 = scalar_lea.vmem [#allocation3], %s6109_s10 }
 0x182   : > { %7412 = vmatprep.mubr.bf16.mxu0 %v6750_v50  ;;  %v4809_v53 = vor.u32 %v4808_v39, %v4805_v22  ;;  %v5418_v9 = vrot.slane %v6703_v43, 5  ;;  %v4801_v47 = vsel %vm7867_vm5, %v4796_v59, %v4800_v14  ;;  %v1447_v30 = vadd.f32 %v9037_v55, %v9679_v3  ;;  %v7159_v1 = vpop.f32.mrf.mxu1  ;;  %s5998_s19 = sshll.u32 %s9479_s11, 4  ;;  %s9555_s19 = int_to_ptr.vmem [resolvable:$true] %s5998_s19 }
 0x183   : > { %v4819_v13 = vor.u32 %v4818_v26, %v4814_v45  ;;  %v4824_v23 = vrot.slane %v4822_v37, 5  ;;  %v6646_v31 = vcombine.low %v4791_v54, %v4801_v47  ;;  %v5416_v21 = vsel %vm7848_vm4, %v6719_v25, %v5415_v29  ;;  %v9682_v54 = vld [vmem:[#allocation19_spill] sm:$0xff]  ;;  %v9685_v26 = vld [vmem:[#allocation22_spill] sm:$0xff]  ;;  %s7599_s27 = scalar_lea.vmem %s9555_s19, 4096  ;;  %p7606_p0 = scmp.lt.s32.totalorder %s9555_s19, %s7604_s29 }
 0x184   : > { %v4810_v17 = vrot.slane %v4809_v53, 4  ;;  %v5417_v51 = vrot.slane %v5415_v29, 4  ;;  %v9210_v48 = vadd.f32 %v9039_v36, %v1447_v30  ;;  %v1450_v14 = vadd.f32 %v9049_v58, %v9680_v63  ;;  %v2391_v43 = vpop.f32.mrf.mxu1  ;;  %v9683_v29 = vld [vmem:[#allocation20_spill] sm:$0xff]  ;;  %v9686_v53 = vld [vmem:[#allocation23_spill] sm:$0xff]  ;;  %v9690_v30 = vld [vmem:[#allocation25_spill] sm:$0xff]  ;;  %p7600_p11 = scmp.ne.s32.totalorder %s9555_s19, %s7599_s27  ;;  %p7607_p1 = scmp.lt.s32.totalorder %s7605_s30, %s7599_s27 }
 0x185   : > { %v4820_v39 = vrot.slane %v4819_v13, 4  ;;  %v1448_v37 = vadd.f32 %v9055_v8, %v9681_v15  ;;  %7364 = vmatprep.mubr.bf16.mxu1 %v6646_v31  ;;  %v2469_v13 = vadd.f32 %v9064_v6, %v9682_v54  ;;  %v2467_v36 = vadd.f32 %v9077_v38, %v9683_v29  ;;  %v9684_v38 = vld [vmem:[#allocation21_spill] sm:$0xff] }
 0x186   : > { %v4815_v55 = vsel %vm7867_vm5, %v4810_v17, %v4814_v45  ;;  %v5419_v47 = vsel %vm7848_vm4, %v5417_v51, %v5418_v9  ;;  %v9227_v8 = vadd.f32 %v9051_v12, %v1450_v14  ;;  %v7206_v45 = vpop.f32.mrf.mxu0  ;;  %v7162_v59 = vpop.f32.mrf.mxu1  ;;  %v2470_v56 = vadd.f32 %v9096_v0, %v9684_v38  ;;  %v9692_v17 = vld [vmem:[#allocation26_spill] sm:$0xff]  ;;  %v9693_v51 = vld [vmem:[#allocation27_spill] sm:$0xff]  ;;  %v9696_v15 = vld [vmem:[#allocation29_spill] sm:$0xff]  ;;  %p7601_p12 = pnand %p7600_p11, %p7753_p5  ;;  %p7608_p2 = por %p7607_p1, %p7606_p0 }
 0x187   : > { %v4825_v58 = vsel %vm7867_vm5, %v4820_v39, %v4824_v23  ;;  %v6751_v50 = vcombine.low %v5416_v21, %v5419_v47  ;;  %v9230_v22 = vadd.f32 %v9057_v41, %v1448_v37  ;;  %v9233_v9 = vadd.f32 %v9085_v57, %v2469_v13 }
 0x188   : > { %v6647_v46 = vcombine.low %v4815_v55, %v4825_v58  ;;  %v9236_v6 = vadd.f32 %v9098_v61, %v2467_v36  ;;  %v2468_v12 = vadd.f32 %v9101_v10, %v9685_v26  ;;  %v2473_v41 = vadd.f32 %v9111_v42, %v9686_v53  ;;  %v3206_v23 = vpop.f32.mrf.mxu0  ;;  %v2404_v3 = vpop.f32.mrf.mxu1  ;;  %v9699_v36 = vld [vmem:[#allocation31_spill] sm:$0xff]  ;;  %v9700_v58 = vld [vmem:[#allocation32_spill] sm:$0xff]  ;;  %p7602_p13 = pneg %p7601_p12 }
 0x189   : > { %7413 = vmatmul.mubr.bf16.gmra.mxu0 %v6751_v50  ;;  %v2471_v25 = vadd.f32 %v9123_v33, %v8800_v49  ;;  %v2474_v57 = vadd.f32 %v9127_v44, %v8810_v7  ;;  %v9249_v61 = vadd.f32 %v9106_v5, %v2470_v56  ;;  %v2472_v0 = vadd.f32 %v9136_v35, %v8813_v52 }
 0x18a   : > { %7365 = vmatmul.mubr.bf16.gmra.mxu1 %v6647_v46  ;;  %v2477_v10 = vadd.f32 %v9151_v32, %v8843_v34  ;;  %v2475_v42 = vadd.f32 %v9170_v2, %v8881_v40  ;;  %v9258_v49 = vadd.f32 %v9117_v27, %v2468_v12  ;;  %v9261_v7 = vadd.f32 %v9129_v19, %v2473_v41  ;;  %v7207_v5 = vpop.f32.mrf.mxu0  ;;  %v7163_v52 = vpop.f32.mrf.mxu1  ;;  %v9687_v19 = vld [vmem:[#allocation35_spill] sm:$0xff]  ;;  %v9688_v32 = vld [vmem:[#allocation24_spill] sm:$0xff]  ;;  %v9703_v41 = vld [vmem:[#allocation9_spill] sm:$0xff]  ;;  %p7609_p3 = pnand %p7608_p2, %p7602_p13 }
 0x18b   : > { %v9264_v44 = vadd.f32 %v9140_v18, %v2471_v25  ;;  %v9267_v33 = vadd.f32 %v9159_v62, %v2474_v57  ;;  %v9270_v35 = vadd.f32 %v9172_v60, %v2472_v0  ;;  %v2478_v27 = vadd.f32 %v9687_v19, %v8886_v11  ;;  %v9689_v18 = vld [vmem:[#allocation15_spill] sm:$0xff]  ;;  %v9691_v62 = vld [vmem:[#allocation37_spill] sm:$0xff]  ;;  %v9697_v11 = vld [vmem:[#allocation30_spill] sm:$0xff] }
 0x18c   : > { %v9273_v34 = vadd.f32 %v9183_v4, %v2477_v10  ;;  %v9276_v40 = vadd.f32 %v9195_v20, %v2475_v42  ;;  %v2476_v2 = vadd.f32 %v9689_v18, %v9688_v32  ;;  %v2481_v31 = vadd.f32 %v9691_v62, %v9690_v30  ;;  %v3209_v39 = vpop.f32.mrf.mxu0  ;;  %v2407_v63 = vpop.f32.mrf.mxu1  ;;  %v9695_v20 = vld [vmem:[#allocation28_spill] sm:$0xff]  ;;  %v9704_v0 = vld [vmem:[#allocation10_spill] sm:$0xff]  ;;  %v9705_v19 = vld [vmem:[#allocation11_spill] sm:$0xff] }
 0x18d   : > { %v2479_v21 = vadd.f32 %v2388_v28, %v9692_v17  ;;  %v2482_v60 = vadd.f32 %v7159_v1, %v9693_v51  ;;  %v9287_v4 = vadd.f32 %v9201_v24, %v2478_v27  ;;  %v2480_v14 = vadd.f32 %v2391_v43, %v9695_v20  ;;  %v9701_v43 = vld [vmem:[#allocation33_spill] sm:$0xff]  ;;  %v9708_v20 = vld [vmem:[#allocation14_spill] sm:$0xff] }
 0x18e   : > { %v2485_v37 = vadd.f32 %v7162_v59, %v9696_v15  ;;  %v2483_v55 = vadd.f32 %v2404_v3, %v9697_v11  ;;  %v9292_v47 = vadd.f32 %v3193_v16, %v2476_v2  ;;  %v9294_v54 = vadd.f32 %v7206_v45, %v2481_v31  ;;  %v7166_v1 = vpop.f32.mrf.mxu1  ;;  %v7210_v59 = vpop.f32.mrf.mxu0  ;;  %v9702_v16 = vld [vmem:[#allocation34_spill] sm:$0xff]  ;;  %v9706_v2 = vld [vmem:[#allocation12_spill] sm:$0xff] }
 0x18f   : > { %9694 = vst [vmem:[#allocation16_spill] sm:$0xff] %v9287_v4  ;;  %v9296_v13 = vadd.f32 %v3206_v23, %v2479_v21  ;;  %v9298_v28 = vadd.f32 %v7207_v5, %v2482_v60  ;;  %v9300_v29 = vadd.f32 %v3209_v39, %v2480_v14  ;;  %v2486_v24 = vadd.f32 %v7163_v52, %v9699_v36  ;;  %v9707_v21 = vld [vmem:[#allocation13_spill] sm:$0xff] }
 0x190   : > { %9698 = vst [vmem:[#allocation17_spill] sm:$0xff] %v9292_v47  ;;  %v2484_v50 = vadd.f32 %v2407_v63, %v9700_v58  ;;  %v2489_v46 = vadd.f32 %v7166_v1, %v9701_v43  ;;  %v2420_v38 = vpop.f32.mrf.mxu1  ;;  %v9305_v56 = vadd.f32 %v7210_v59, %v2485_v37  ;;  %v3222_v26 = vpop.f32.mrf.mxu0 }
 0x191   : > { %v2487_v45 = vadd.f32 %v2420_v38, %v9702_v16  ;;  %v9308_v53 = vadd.f32 %v3222_v26, %v2483_v55  ;;  %v9709_v55 = vld [vmem:[#allocation36_spill] sm:$0xff] }
 0x192   : > { %v7167_v12 = vpop.f32.mrf.mxu1  ;;  %v7211_v57 = vpop.f32.mrf.mxu0 }
 0x193   : > { %v2490_v25 = vadd.f32 %v7167_v12, %v9703_v41  ;;  %v9311_v3 = vadd.f32 %v7211_v57, %v2486_v24 }
 0x194   : > { %v2423_v23 = vpop.f32.mrf.mxu1  ;;  %v3225_v42 = vpop.f32.mrf.mxu0 }
 0x195   : > { %v2488_v10 = vadd.f32 %v2423_v23, %v9704_v0  ;;  %v9314_v52 = vadd.f32 %v3225_v42, %v2484_v50 }
 0x196   : > { %v7170_v5 = vpop.f32.mrf.mxu1  ;;  %v7214_v18 = vpop.f32.mrf.mxu0 }
 0x197   : > { %v2493_v27 = vadd.f32 %v7170_v5, %v9705_v19  ;;  %v9318_v62 = vadd.f32 %v7214_v18, %v2489_v46 }
 0x198   : > { %v2436_v32 = vpop.f32.mrf.mxu1  ;;  %v3238_v17 = vpop.f32.mrf.mxu0 }
 0x199   : > { %v2491_v30 = vadd.f32 %v2436_v32, %v9706_v2  ;;  %v9321_v60 = vadd.f32 %v3238_v17, %v2487_v45 }
 0x19a   : > { %v7171_v31 = vpop.f32.mrf.mxu1  ;;  %v7215_v63 = vpop.f32.mrf.mxu0 }
 0x19b   : > { %v2494_v51 = vadd.f32 %v7171_v31, %v9707_v21  ;;  %v9324_v15 = vadd.f32 %v7215_v63, %v2490_v25 }
 0x19c   : > { %v2439_v39 = vpop.f32.mrf.mxu1  ;;  %v3241_v11 = vpop.f32.mrf.mxu0 }
 0x19d   : > { %v2492_v14 = vadd.f32 %v2439_v39, %v9708_v20  ;;  %v9327_v36 = vadd.f32 %v3241_v11, %v2488_v10 }
 0x19e   : > { %v7174_v37 = vpop.f32.mrf.mxu1  ;;  %v7218_v58 = vpop.f32.mrf.mxu0 }
 0x19f   : > { %v2497_v1 = vadd.f32 %v7174_v37, %v9709_v55  ;;  %v9330_v43 = vadd.f32 %v7218_v58, %v2493_v27 }
 0x1a0   : > { %v2452_v24 = vpop.f32.mrf.mxu1  ;;  %v3254_v59 = vpop.f32.mrf.mxu0 }
 0x1a1   : > { %v2495_v50 = vadd.f32 %v2452_v24, %v9210_v48  ;;  %v9333_v16 = vadd.f32 %v3254_v59, %v2491_v30 }
 0x1a2   : > { %v7175_v46 = vpop.f32.mrf.mxu1  ;;  %v7219_v26 = vpop.f32.mrf.mxu0 }
 0x1a3   : > { %v2498_v38 = vadd.f32 %v7175_v46, %v9227_v8  ;;  %v9336_v41 = vadd.f32 %v7219_v26, %v2494_v51 }
 0x1a4   : > { %v2455_v45 = vpop.f32.mrf.mxu1  ;;  %v3257_v25 = vpop.f32.mrf.mxu0 }
 0x1a5   : > { %v2496_v12 = vadd.f32 %v2455_v45, %v9230_v22  ;;  %v9338_v57 = vadd.f32 %v3257_v25, %v2492_v14 }
 0x1a6   : > { %v7222_v23 = vpop.f32.mrf.mxu0  ;;  %v9344_v42 = vpop.f32.mrf.mxu1 }
 0x1a7   : > { %v9340_v0 = vadd.f32 %v7222_v23, %v2497_v1 }
 0x1a8   : > { %v3270_v48 = vpop.f32.mrf.mxu0  ;;  %v9348_v19 = vpop.f32.mrf.mxu1 }
 0x1a9   : > { %v9342_v10 = vadd.f32 %v3270_v48, %v2495_v50 }
 0x1aa   : > { %v7223_v8 = vpop.f32.mrf.mxu0  ;;  %v9352_v32 = vpop.f32.mrf.mxu1 }
 0x1ab   : > { %v9346_v5 = vadd.f32 %v7223_v8, %v2498_v38 }
 0x1ac   : > { %v3273_v27 = vpop.f32.mrf.mxu0  ;;  %v9356_v2 = vpop.f32.mrf.mxu1 }
 0x1ad   : > { %v9350_v22 = vadd.f32 %v3273_v27, %v2496_v12 }
 0x1ae   : > { %v9354_v18 = vpop.f32.mrf.mxu0  ;;  %v9360_v31 = vpop.f32.mrf.mxu1 }
 0x1b0   : > { %v9358_v30 = vpop.f32.mrf.mxu0  ;;  %v9364_v21 = vpop.f32.mrf.mxu1 }
 0x1b2   : > { %v9362_v17 = vpop.f32.mrf.mxu0  ;;  %v9368_v39 = vpop.f32.mrf.mxu1 }
 0x1b4   : > { %v9366_v51 = vpop.f32.mrf.mxu0  ;;  %v9372_v20 = vpop.f32.mrf.mxu1 }
 0x1b6   : > { %v9370_v63 = vpop.f32.mrf.mxu0  ;;  %v9376_v37 = vpop.f32.mrf.mxu1 }
 0x1b8   : > { %v9374_v14 = vpop.f32.mrf.mxu0  ;;  %v9380_v55 = vpop.f32.mrf.mxu1 }
 0x1ba   : > { %v9378_v11 = vpop.f32.mrf.mxu0  ;;  %v9384_v24 = vpop.f32.mrf.mxu1 }
 0x1bb   : > { %9710 = vst [vmem:[#allocation18_spill] sm:$0xff] %v9384_v24 }
 0x1bc   : > { %v9382_v1 = vpop.f32.mrf.mxu0  ;;  %v9388_v50 = vpop.f32.mrf.mxu1 }
 0x1bd   : > { %9712 = vst [vmem:[#allocation20_spill] sm:$0xff] %v9388_v50 }
 0x1be   : > { %v9386_v58 = vpop.f32.mrf.mxu0  ;;  %v7254_v59 = vpop.f32.mrf.mxu1 }
 0x1bf   : > { %9711 = vst [vmem:[#allocation19_spill] sm:$0xff] %v9386_v58  ;;  %v3893_v45 = vadd.f32 %v7254_v59, %v9294_v54 }
 0x1c0   : > { %v9390_v46 = vpop.f32.mrf.mxu0  ;;  %v3800_v26 = vpop.f32.mrf.mxu1 }
 0x1c1   : > { %9713 = vst [vmem:[#allocation21_spill] sm:$0xff] %v9390_v46  ;;  %v3891_v25 = vadd.f32 %v3800_v26, %v9296_v13 }
 0x1c2   : > { %v9392_v38 = vpop.f32.mrf.mxu0  ;;  %v7255_v23 = vpop.f32.mrf.mxu1 }
 0x1c3   : > { %9714 = vst [vmem:[#allocation22_spill] sm:$0xff] %v9392_v38  ;;  %v3894_v8 = vadd.f32 %v7255_v23, %v9298_v28 }
 0x1c4   : > { %v9395_v12 = vpop.f32.mrf.mxu0  ;;  %v3803_v47 = vpop.f32.mrf.mxu1 }
 0x1c5   : > { %9715 = vst [vmem:[#allocation23_spill] sm:$0xff] %v9395_v12  ;;  %v3892_v46 = vadd.f32 %v3803_v47, %v9300_v29 }
 0x1c6   : > { %v7302_v48 = vpop.f32.mrf.mxu0  ;;  %v7258_v38 = vpop.f32.mrf.mxu1 }
 0x1c7   : > { %v9399_v27 = vadd.f32 %v7302_v48, %v3893_v45  ;;  %v3897_v54 = vadd.f32 %v7258_v38, %v9305_v56 }
 0x1c8   : > { %v4251_v50 = vpop.f32.mrf.mxu0  ;;  %v3816_v12 = vpop.f32.mrf.mxu1 }
 0x1c9   : > { %v9402_v24 = vadd.f32 %v4251_v50, %v3891_v25  ;;  %v3895_v26 = vadd.f32 %v3816_v12, %v9308_v53 }
 0x1ca   : > { %v7303_v4 = vpop.f32.mrf.mxu0  ;;  %v7259_v28 = vpop.f32.mrf.mxu1 }
 0x1cb   : > { %v9405_v59 = vadd.f32 %v7303_v4, %v3894_v8  ;;  %v3898_v23 = vadd.f32 %v7259_v28, %v9311_v3 }
 0x1cc   : > { %v4254_v13 = vpop.f32.mrf.mxu0  ;;  %v3819_v47 = vpop.f32.mrf.mxu1 }
 0x1cd   : > { %v9408_v58 = vadd.f32 %v4254_v13, %v3892_v46  ;;  %v3896_v50 = vadd.f32 %v3819_v47, %v9314_v52 }
 0x1ce   : > { %v7306_v45 = vpop.f32.mrf.mxu0  ;;  %v7262_v4 = vpop.f32.mrf.mxu1 }
 0x1cf   : > { %v9411_v48 = vadd.f32 %v7306_v45, %v3897_v54  ;;  %v3901_v38 = vadd.f32 %v7262_v4, %v9318_v62 }
 0x1d0   : > { %v4267_v29 = vpop.f32.mrf.mxu0  ;;  %v3832_v53 = vpop.f32.mrf.mxu1 }
 0x1d1   : > { %v9414_v25 = vadd.f32 %v4267_v29, %v3895_v26  ;;  %v3899_v12 = vadd.f32 %v3832_v53, %v9321_v60 }
 0x1d2   : > { %v7307_v56 = vpop.f32.mrf.mxu0  ;;  %v7263_v3 = vpop.f32.mrf.mxu1 }
 0x1d3   : > { %v9417_v8 = vadd.f32 %v7307_v56, %v3898_v23  ;;  %v3902_v28 = vadd.f32 %v7263_v3, %v9324_v15 }
 0x1d4   : > { %v4270_v46 = vpop.f32.mrf.mxu0  ;;  %v3835_v52 = vpop.f32.mrf.mxu1 }
 0x1d5   : > { %v9420_v13 = vadd.f32 %v4270_v46, %v3896_v50  ;;  %v3900_v47 = vadd.f32 %v3835_v52, %v9327_v36 }
 0x1d6   : > { %v7310_v54 = vpop.f32.mrf.mxu0 }
 0x1d7   : > { %v9423_v45 = vadd.f32 %v7310_v54, %v3901_v38 }
 0x1d8   : > { %v4283_v26 = vpop.f32.mrf.mxu0 }
 0x1d9   : > { %v9426_v29 = vadd.f32 %v4283_v26, %v3899_v12  ;;  %v7266_v62 = vpop.f32.mrf.mxu1 }
 0x1da   : > { %v7311_v23 = vpop.f32.mrf.mxu0  ;;  %v3905_v4 = vadd.f32 %v7266_v62, %v9330_v43 }
 0x1db   : > { %v9429_v56 = vadd.f32 %v7311_v23, %v3902_v28  ;;  %v3848_v60 = vpop.f32.mrf.mxu1 }
 0x1dc   : > { %v4286_v50 = vpop.f32.mrf.mxu0  ;;  %v3903_v53 = vadd.f32 %v3848_v60, %v9333_v16 }
 0x1dd   : > { %v9432_v46 = vadd.f32 %v4286_v50, %v3900_v47  ;;  %v7267_v15 = vpop.f32.mrf.mxu1 }
 0x1de   : > { %v3906_v3 = vadd.f32 %v7267_v15, %v9336_v41  ;;  %v3881_v41 = vadd.f32 %v9344_v42, %v9233_v9  ;;  %v3879_v15 = vadd.f32 %v9348_v19, %v9236_v6  ;;  %v3880_v19 = vadd.f32 %v9356_v2, %v9258_v49 }
 0x1df   : > { %v7314_v38 = vpop.f32.mrf.mxu0  ;;  %v3851_v36 = vpop.f32.mrf.mxu1  ;;  %v3883_v49 = vadd.f32 %v9364_v21, %v9264_v44  ;;  %v3884_v44 = vadd.f32 %v9372_v20, %v9270_v35 }
 0x1e0   : > { %v9435_v54 = vadd.f32 %v7314_v38, %v3905_v4  ;;  %v3904_v52 = vadd.f32 %v3851_v36, %v9338_v57  ;;  %v4332_v9 = vadd.f32 %v9354_v18, %v3881_v41  ;;  %v4330_v6 = vadd.f32 %v9358_v30, %v3879_v15 }
 0x1e1   : > { %v4299_v12 = vpop.f32.mrf.mxu0  ;;  %v4331_v30 = vadd.f32 %v9366_v51, %v3880_v19 }
 0x1e2   : > { %v9438_v26 = vadd.f32 %v4299_v12, %v3903_v53 }
 0x1e3   : > { %v7315_v28 = vpop.f32.mrf.mxu0 }
 0x1e4   : > { %v9441_v16 = vadd.f32 %v7315_v28, %v3906_v3 }
 0x1e5   : > { %v4302_v23 = vpop.f32.mrf.mxu0 }
 0x1e6   : > { %v9446_v4 = vadd.f32 %v4302_v23, %v3904_v52 }
 0x1e7   : > { %v7270_v43 = vpop.f32.mrf.mxu1  ;;  %v7318_v57 = vpop.f32.mrf.mxu0 }
 0x1e8   : > { %v3909_v62 = vadd.f32 %v7270_v43, %v9340_v0 }
 0x1e9   : > { %v3864_v47 = vpop.f32.mrf.mxu1  ;;  %v4315_v3 = vpop.f32.mrf.mxu0 }
 0x1ea   : > { %v3907_v60 = vadd.f32 %v3864_v47, %v9342_v10  ;;  %v9451_v38 = vadd.f32 %v7318_v57, %v3909_v62  ;;  %v3882_v10 = vadd.f32 %v9352_v32, %v9249_v61  ;;  %v3885_v61 = vadd.f32 %v9360_v31, %v9261_v7 }
 0x1eb   : > { %v7271_v50 = vpop.f32.mrf.mxu1  ;;  %v7319_v12 = vpop.f32.mrf.mxu0 }
 0x1ec   : > { %v3910_v53 = vadd.f32 %v7271_v50, %v9346_v5  ;;  %v9460_v42 = vadd.f32 %v4315_v3, %v3907_v60  ;;  %v4333_v18 = vadd.f32 %v9362_v17, %v3882_v10  ;;  %v4336_v57 = vadd.f32 %v9370_v63, %v3885_v61 }
 0x1ed   : > { %v3867_v0 = vpop.f32.mrf.mxu1  ;;  %v4318_v28 = vpop.f32.mrf.mxu0  ;;  %v3886_v17 = vadd.f32 %v9368_v39, %v9267_v33  ;;  %v4335_v10 = vadd.f32 %v9382_v1, %v3884_v44  ;;  %v3889_v1 = vadd.f32 %v9376_v37, %v9273_v34  ;;  %v9718_v34 = vld [vmem:[#allocation18_spill] sm:$0xff] }
 0x1ee   : > { %v3908_v36 = vadd.f32 %v3867_v0, %v9350_v22  ;;  %v9465_v52 = vadd.f32 %v7319_v12, %v3910_v53  ;;  %v4334_v53 = vadd.f32 %v9374_v14, %v3883_v49 }
 0x1ef   : > { %v7338_v5 = vpop.f32.mrf.mxu1  ;;  %v4337_v0 = vadd.f32 %v9378_v11, %v3886_v17 }
 0x1f0   : > { %v5150_v22 = vadd.f32 %v7338_v5, %v4332_v9  ;;  %v9471_v32 = vadd.f32 %v4318_v28, %v3908_v36 }
 0x1f1   : > { %v5021_v43 = vpop.f32.mrf.mxu1 }
 0x1f2   : > { %v5148_v62 = vadd.f32 %v5021_v43, %v4330_v6 }
 0x1f3   : > { %v7339_v47 = vpop.f32.mrf.mxu1 }
 0x1f4   : > { %v5151_v60 = vadd.f32 %v7339_v47, %v4333_v18 }
 0x1f5   : > { %v7386_v23 = vpop.f32.mrf.mxu0  ;;  %v5024_v41 = vpop.f32.mrf.mxu1 }
 0x1f6   : > { %v5744_v2 = vadd.f32 %v7386_v23, %v5150_v22  ;;  %v5149_v31 = vadd.f32 %v5024_v41, %v4331_v30 }
 0x1f7   : > { %v5615_v50 = vpop.f32.mrf.mxu0  ;;  %v7342_v51 = vpop.f32.mrf.mxu1 }
 0x1f8   : > { %5840 = vst [vmem:[%s9479_s11 + $0x10] sm:$0xff] %v5744_v2  ;;  %v5742_v7 = vadd.f32 %v5615_v50, %v5148_v62  ;;  %v5154_v15 = vadd.f32 %v7342_v51, %v4336_v57  ;;  %v5909_v22 = vmul.f32 %v5744_v2, %v5744_v2  ;;  %v9717_v51 = vld [vmem:[#allocation16_spill] sm:$0xff] }
 0x1f9   : > { %v7387_v21 = vpop.f32.mrf.mxu0  ;;  %v5037_v33 = vpop.f32.mrf.mxu1  ;;  %v3890_v37 = vadd.f32 %v9718_v34, %v9717_v51 }
 0x1fa   : > { %5838 = vst [vmem:[%s9479_s11] sm:$0xff] %v5742_v7  ;;  %v5745_v63 = vadd.f32 %v7387_v21, %v5151_v60  ;;  %v5152_v36 = vadd.f32 %v5037_v33, %v4334_v53  ;;  %v5907_v5 = vmul.f32 %v5742_v7, %v5742_v7  ;;  %v3887_v60 = vadd.f32 %v9380_v55, %v9276_v40  ;;  %v9719_v33 = vld [vmem:[#allocation21_spill] sm:$0xff]  ;;  %v9721_v55 = vld [vmem:[#allocation20_spill] sm:$0xff] }
 0x1fb   : > { %v5618_v39 = vpop.f32.mrf.mxu0  ;;  %v7343_v9 = vpop.f32.mrf.mxu1  ;;  %v9720_v40 = vld [vmem:[#allocation17_spill] sm:$0xff] }
 0x1fc   : > { %5841 = vst [vmem:[%s9479_s11 + $0x18] sm:$0xff] %v5745_v63  ;;  %v5743_v3 = vadd.f32 %v5618_v39, %v5149_v31  ;;  %v5155_v6 = vadd.f32 %v7343_v9, %v4337_v0  ;;  %v5910_v47 = vmul.f32 %v5745_v63, %v5745_v63  ;;  %v4338_v39 = vadd.f32 %v9719_v33, %v3887_v60 }
 0x1fd   : > { %v7390_v35 = vpop.f32.mrf.mxu0  ;;  %v5040_v19 = vpop.f32.mrf.mxu1  ;;  %v3888_v0 = vadd.f32 %v9721_v55, %v9720_v40 }
 0x1fe   : > { %5839 = vst [vmem:[%s9479_s11 + $0x8] sm:$0xff] %v5743_v3  ;;  %v5870_v20 = vadd.f32 %v5743_v3, %v5742_v7  ;;  %v5908_v14 = vmul.f32 %v5743_v3, %v5743_v3  ;;  %v5748_v12 = vadd.f32 %v7390_v35, %v5154_v15  ;;  %v5153_v61 = vadd.f32 %v5040_v19, %v4335_v10  ;;  %v9716_v7 = vld [vmem:[#allocation19_spill] sm:$0xff] }
 0x1ff   : > { %v5631_v43 = vpop.f32.mrf.mxu0  ;;  %v4340_v31 = vadd.f32 %v9716_v7, %v3889_v1 }
 0x200   : > { %v5871_v28 = vadd.f32 %v5870_v20, %v5744_v2  ;;  %v5939_v11 = vadd.f32 %v5908_v14, %v5907_v5  ;;  %5844 = vst [vmem:[%s9479_s11 + $0x30] sm:$0xff] %v5748_v12  ;;  %v5746_v18 = vadd.f32 %v5631_v43, %v5152_v36  ;;  %v5913_v9 = vmul.f32 %v5748_v12, %v5748_v12  ;;  %v9722_v20 = vld [vmem:[#allocation22_spill] sm:$0xff] }
 0x201   : > { %v7391_v62 = vpop.f32.mrf.mxu0  ;;  %v4341_v14 = vadd.f32 %v9722_v20, %v3890_v37 }
 0x202   : > { %v5940_v23 = vadd.f32 %v5939_v11, %v5909_v22  ;;  %5842 = vst [vmem:[%s9479_s11 + $0x20] sm:$0xff] %v5746_v18  ;;  %v5872_v30 = vadd.f32 %v5871_v28, %v5745_v63  ;;  %v5749_v49 = vadd.f32 %v7391_v62, %v5155_v6  ;;  %v5911_v50 = vmul.f32 %v5746_v18, %v5746_v18 }
 0x203   : > { %v5634_v41 = vpop.f32.mrf.mxu0 }
 0x204   : > { %v5873_v2 = vadd.f32 %v5872_v30, %v5746_v18  ;;  %v5941_v57 = vadd.f32 %v5940_v23, %v5910_v47  ;;  %5845 = vst [vmem:[%s9479_s11 + $0x38] sm:$0xff] %v5749_v49  ;;  %v5747_v17 = vadd.f32 %v5634_v41, %v5153_v61  ;;  %v7346_v15 = vpop.f32.mrf.mxu1  ;;  %v5914_v22 = vmul.f32 %v5749_v49, %v5749_v49  ;;  %v9723_v61 = vld [vmem:[#allocation23_spill] sm:$0xff] }
 0x205   : > { %v7394_v44 = vpop.f32.mrf.mxu0  ;;  %v5158_v3 = vadd.f32 %v7346_v15, %v4340_v31  ;;  %v4339_v1 = vadd.f32 %v9723_v61, %v3888_v0 }
 0x206   : > { %v5942_v21 = vadd.f32 %v5941_v57, %v5911_v50  ;;  %5843 = vst [vmem:[%s9479_s11 + $0x28] sm:$0xff] %v5747_v17  ;;  %v5874_v53 = vadd.f32 %v5873_v2, %v5747_v17  ;;  %v5912_v63 = vmul.f32 %v5747_v17, %v5747_v17  ;;  %v5053_v35 = vpop.f32.mrf.mxu1 }
 0x207   : > { %v5647_v36 = vpop.f32.mrf.mxu0  ;;  %v5752_v6 = vadd.f32 %v7394_v44, %v5158_v3  ;;  %v5156_v19 = vadd.f32 %v5053_v35, %v4338_v39 }
 0x208   : > { %v5875_v10 = vadd.f32 %v5874_v53, %v5748_v12  ;;  %v5943_v5 = vadd.f32 %v5942_v21, %v5912_v63  ;;  %v7347_v11 = vpop.f32.mrf.mxu1 }
 0x209   : > { %v7395_v18 = vpop.f32.mrf.mxu0  ;;  %5848 = vst [vmem:[%s9479_s11 + $0x50] sm:$0xff] %v5752_v6  ;;  %v5750_v62 = vadd.f32 %v5647_v36, %v5156_v19  ;;  %v5159_v47 = vadd.f32 %v7347_v11, %v4341_v14  ;;  %v5917_v51 = vmul.f32 %v5752_v6, %v5752_v6 }
 0x20a   : > { %v5944_v43 = vadd.f32 %v5943_v5, %v5913_v9  ;;  %v5876_v28 = vadd.f32 %v5875_v10, %v5749_v49  ;;  %v5056_v23 = vpop.f32.mrf.mxu1 }
 0x20b   : > { %5846 = vst [vmem:[%s9479_s11 + $0x40] sm:$0xff] %v5750_v62  ;;  %v5915_v60 = vmul.f32 %v5750_v62, %v5750_v62  ;;  %v5753_v41 = vadd.f32 %v7395_v18, %v5159_v47  ;;  %v5157_v2 = vadd.f32 %v5056_v23, %v4339_v1  ;;  %v5650_v50 = vpop.f32.mrf.mxu0 }
 0x20c   : > { %v5945_v12 = vadd.f32 %v5944_v43, %v5914_v22  ;;  %v5877_v30 = vadd.f32 %v5876_v28, %v5750_v62 }
 0x20d   : > { %5849 = vst [vmem:[%s9479_s11 + $0x58] sm:$0xff] %v5753_v41  ;;  %v5751_v49 = vadd.f32 %v5650_v50, %v5157_v2  ;;  %v5918_v63 = vmul.f32 %v5753_v41, %v5753_v41 }
 0x20e   : > { %v5946_v57 = vadd.f32 %v5945_v12, %v5915_v60 }
 0x20f   : > { %5847 = vst [vmem:[%s9479_s11 + $0x48] sm:$0xff] %v5751_v49  ;;  %v5878_v17 = vadd.f32 %v5877_v30, %v5751_v49  ;;  %v5916_v7 = vmul.f32 %v5751_v49, %v5751_v49 }
 0x211   : > { %v7398_v31 = vpop.f32.mrf.mxu0  ;;  %v5879_v34 = vadd.f32 %v5878_v17, %v5752_v6  ;;  %v5947_v37 = vadd.f32 %v5946_v57, %v5916_v7 }
 0x212   : > { %v7350_v44 = vpop.f32.mrf.mxu1 }
 0x213   : > { %v5162_v21 = vadd.f32 %v7350_v44, %v9399_v27  ;;  %v5663_v53 = vpop.f32.mrf.mxu0  ;;  %v5948_v15 = vadd.f32 %v5947_v37, %v5917_v51  ;;  %v5880_v39 = vadd.f32 %v5879_v34, %v5753_v41 }
 0x214   : > { %v5069_v33 = vpop.f32.mrf.mxu1 }
 0x215   : > { %v5756_v40 = vadd.f32 %v7398_v31, %v5162_v21  ;;  %v5160_v55 = vadd.f32 %v5069_v33, %v9402_v24  ;;  %v5949_v0 = vadd.f32 %v5948_v15, %v5918_v63  ;;  %v7399_v36 = vpop.f32.mrf.mxu0 }
 0x216   : > { %v7351_v3 = vpop.f32.mrf.mxu1 }
 0x217   : > { %5852 = vst [vmem:[%s9479_s11 + $0x70] sm:$0xff] %v5756_v40  ;;  %v5754_v9 = vadd.f32 %v5663_v53, %v5160_v55  ;;  %v5163_v10 = vadd.f32 %v7351_v3, %v9405_v59  ;;  %v5666_v6 = vpop.f32.mrf.mxu0  ;;  %v5921_v28 = vmul.f32 %v5756_v40, %v5756_v40 }
 0x218   : > { %v5072_v5 = vpop.f32.mrf.mxu1 }
 0x219   : > { %5850 = vst [vmem:[%s9479_s11 + $0x60] sm:$0xff] %v5754_v9  ;;  %v5881_v27 = vadd.f32 %v5880_v39, %v5754_v9  ;;  %v5919_v35 = vmul.f32 %v5754_v9, %v5754_v9  ;;  %v5757_v20 = vadd.f32 %v7399_v36, %v5163_v10  ;;  %v5161_v14 = vadd.f32 %v5072_v5, %v9408_v58 }
 0x21b   : > { %v5950_v19 = vadd.f32 %v5949_v0, %v5919_v35  ;;  %5853 = vst [vmem:[%s9479_s11 + $0x78] sm:$0xff] %v5757_v20  ;;  %v5755_v22 = vadd.f32 %v5666_v6, %v5161_v14  ;;  %v5922_v1 = vmul.f32 %v5757_v20, %v5757_v20 }
 0x21d   : > { %5851 = vst [vmem:[%s9479_s11 + $0x68] sm:$0xff] %v5755_v22  ;;  %v5882_v24 = vadd.f32 %v5881_v27, %v5755_v22  ;;  %v5920_v43 = vmul.f32 %v5755_v22, %v5755_v22 }
 0x21f   : > { %v5883_v11 = vadd.f32 %v5882_v24, %v5756_v40  ;;  %v5951_v18 = vadd.f32 %v5950_v19, %v5920_v43  ;;  %v7402_v61 = vpop.f32.mrf.mxu0 }
 0x220   : > { %v7354_v59 = vpop.f32.mrf.mxu1 }
 0x221   : > { %v5952_v62 = vadd.f32 %v5951_v18, %v5921_v28  ;;  %v5166_v47 = vadd.f32 %v7354_v59, %v9411_v48  ;;  %v5679_v12 = vpop.f32.mrf.mxu0  ;;  %v5884_v58 = vadd.f32 %v5883_v11, %v5757_v20 }
 0x222   : > { %v5085_v23 = vpop.f32.mrf.mxu1 }
 0x223   : > { %v5760_v30 = vadd.f32 %v7402_v61, %v5166_v47  ;;  %v5164_v60 = vadd.f32 %v5085_v23, %v9414_v25  ;;  %v5953_v41 = vadd.f32 %v5952_v62, %v5922_v1  ;;  %v7403_v50 = vpop.f32.mrf.mxu0 }
 0x224   : > { %v7355_v2 = vpop.f32.mrf.mxu1 }
 0x225   : > { %5856 = vst [vmem:[%s9479_s11 + $0x90] sm:$0xff] %v5760_v30  ;;  %v5758_v57 = vadd.f32 %v5679_v12, %v5164_v60  ;;  %v5167_v49 = vadd.f32 %v7355_v2, %v9417_v8  ;;  %v5682_v34 = vpop.f32.mrf.mxu0  ;;  %v5925_v53 = vmul.f32 %v5760_v30, %v5760_v30 }
 0x226   : > { %v5088_v17 = vpop.f32.mrf.mxu1 }
 0x227   : > { %5854 = vst [vmem:[%s9479_s11 + $0x80] sm:$0xff] %v5758_v57  ;;  %v5885_v7 = vadd.f32 %v5884_v58, %v5758_v57  ;;  %v5923_v31 = vmul.f32 %v5758_v57, %v5758_v57  ;;  %v5761_v48 = vadd.f32 %v7403_v50, %v5167_v49  ;;  %v5165_v51 = vadd.f32 %v5088_v17, %v9420_v13 }
 0x229   : > { %v5954_v37 = vadd.f32 %v5953_v41, %v5923_v31  ;;  %5857 = vst [vmem:[%s9479_s11 + $0x98] sm:$0xff] %v5761_v48  ;;  %v5759_v44 = vadd.f32 %v5682_v34, %v5165_v51  ;;  %v5926_v39 = vmul.f32 %v5761_v48, %v5761_v48 }
 0x22b   : > { %5855 = vst [vmem:[%s9479_s11 + $0x88] sm:$0xff] %v5759_v44  ;;  %v5886_v25 = vadd.f32 %v5885_v7, %v5759_v44  ;;  %v5924_v21 = vmul.f32 %v5759_v44, %v5759_v44 }
 0x22d   : > { %v5887_v63 = vadd.f32 %v5886_v25, %v5760_v30  ;;  %v5955_v15 = vadd.f32 %v5954_v37, %v5924_v21  ;;  %v7406_v33 = vpop.f32.mrf.mxu0 }
 0x22e   : > { %v7358_v8 = vpop.f32.mrf.mxu1 }
 0x22f   : > { %v5956_v40 = vadd.f32 %v5955_v15, %v5925_v53  ;;  %v5170_v55 = vadd.f32 %v7358_v8, %v9423_v45  ;;  %v5695_v0 = vpop.f32.mrf.mxu0  ;;  %v5888_v13 = vadd.f32 %v5887_v63, %v5761_v48 }
 0x230   : > { %v5101_v3 = vpop.f32.mrf.mxu1 }
 0x231   : > { %v5764_v36 = vadd.f32 %v7406_v33, %v5170_v55  ;;  %v5168_v9 = vadd.f32 %v5101_v3, %v9426_v29  ;;  %v5957_v10 = vadd.f32 %v5956_v40, %v5926_v39  ;;  %v7407_v27 = vpop.f32.mrf.mxu0 }
 0x232   : > { %v7359_v5 = vpop.f32.mrf.mxu1 }
 0x233   : > { %5860 = vst [vmem:[%s9479_s11 + $0xb0] sm:$0xff] %v5764_v36  ;;  %v5762_v35 = vadd.f32 %v5695_v0, %v5168_v9  ;;  %v5171_v20 = vadd.f32 %v7359_v5, %v9429_v56  ;;  %v5698_v24 = vpop.f32.mrf.mxu0  ;;  %v5929_v18 = vmul.f32 %v5764_v36, %v5764_v36 }
 0x234   : > { %v5104_v14 = vpop.f32.mrf.mxu1 }
 0x235   : > { %5858 = vst [vmem:[%s9479_s11 + $0xa0] sm:$0xff] %v5762_v35  ;;  %v5889_v6 = vadd.f32 %v5888_v13, %v5762_v35  ;;  %v5927_v19 = vmul.f32 %v5762_v35, %v5762_v35  ;;  %v5765_v45 = vadd.f32 %v7407_v27, %v5171_v20  ;;  %v5169_v22 = vadd.f32 %v5104_v14, %v9432_v46 }
 0x237   : > { %v5958_v43 = vadd.f32 %v5957_v10, %v5927_v19  ;;  %5861 = vst [vmem:[%s9479_s11 + $0xb8] sm:$0xff] %v5765_v45  ;;  %v5763_v28 = vadd.f32 %v5698_v24, %v5169_v22  ;;  %v5930_v62 = vmul.f32 %v5765_v45, %v5765_v45 }
 0x239   : > { %5859 = vst [vmem:[%s9479_s11 + $0xa8] sm:$0xff] %v5763_v28  ;;  %v5890_v29 = vadd.f32 %v5889_v6, %v5763_v28  ;;  %v5928_v11 = vmul.f32 %v5763_v28, %v5763_v28 }
 0x23b   : > { %v5891_v61 = vadd.f32 %v5890_v29, %v5764_v36  ;;  %v5959_v59 = vadd.f32 %v5958_v43, %v5928_v11  ;;  %v7410_v1 = vpop.f32.mrf.mxu0 }
 0x23c   : > { %v7362_v56 = vpop.f32.mrf.mxu1 }
 0x23d   : > { %v5960_v47 = vadd.f32 %v5959_v59, %v5929_v18  ;;  %v5174_v12 = vadd.f32 %v7362_v56, %v9435_v54  ;;  %v5711_v58 = vpop.f32.mrf.mxu0  ;;  %v5892_v46 = vadd.f32 %v5891_v61, %v5765_v45 }
 0x23e   : > { %v5117_v23 = vpop.f32.mrf.mxu1 }
 0x23f   : > { %v5768_v30 = vadd.f32 %v7410_v1, %v5174_v12  ;;  %v5172_v60 = vadd.f32 %v5117_v23, %v9438_v26  ;;  %v5961_v41 = vadd.f32 %v5960_v47, %v5930_v62  ;;  %v7411_v50 = vpop.f32.mrf.mxu0 }
 0x240   : > { %v7363_v2 = vpop.f32.mrf.mxu1 }
 0x241   : > { %5864 = vst [vmem:[%s9479_s11 + $0xd0] sm:$0xff] %v5768_v30  ;;  %v5766_v57 = vadd.f32 %v5711_v58, %v5172_v60  ;;  %v5175_v49 = vadd.f32 %v7363_v2, %v9441_v16  ;;  %v5714_v51 = vpop.f32.mrf.mxu0  ;;  %v5933_v25 = vmul.f32 %v5768_v30, %v5768_v30 }
 0x242   : > { %v5120_v17 = vpop.f32.mrf.mxu1 }
 0x243   : > { %5862 = vst [vmem:[%s9479_s11 + $0xc0] sm:$0xff] %v5766_v57  ;;  %v5893_v7 = vadd.f32 %v5892_v46, %v5766_v57  ;;  %v5931_v31 = vmul.f32 %v5766_v57, %v5766_v57  ;;  %v5769_v54 = vadd.f32 %v7411_v50, %v5175_v49  ;;  %v5173_v48 = vadd.f32 %v5120_v17, %v9446_v4 }
 0x245   : > { %v5962_v34 = vadd.f32 %v5961_v41, %v5931_v31  ;;  %5865 = vst [vmem:[%s9479_s11 + $0xd8] sm:$0xff] %v5769_v54  ;;  %v5767_v37 = vadd.f32 %v5714_v51, %v5173_v48  ;;  %v5934_v15 = vmul.f32 %v5769_v54, %v5769_v54 }
 0x247   : > { %5863 = vst [vmem:[%s9479_s11 + $0xc8] sm:$0xff] %v5767_v37  ;;  %v5894_v26 = vadd.f32 %v5893_v7, %v5767_v37  ;;  %v5932_v44 = vmul.f32 %v5767_v37, %v5767_v37 }
 0x249   : > { %v5895_v21 = vadd.f32 %v5894_v26, %v5768_v30  ;;  %v5963_v53 = vadd.f32 %v5962_v34, %v5932_v44  ;;  %v7414_v63 = vpop.f32.mrf.mxu0 }
 0x24a   : > { %v7366_v16 = vpop.f32.mrf.mxu1 }
 0x24b   : > { %v5964_v33 = vadd.f32 %v5963_v53, %v5933_v25  ;;  %v5178_v4 = vadd.f32 %v7366_v16, %v9451_v38  ;;  %v5727_v8 = vpop.f32.mrf.mxu0  ;;  %v5896_v39 = vadd.f32 %v5895_v21, %v5769_v54 }
 0x24c   : > { %v5133_v40 = vpop.f32.mrf.mxu1 }
 0x24d   : > { %v5772_v55 = vadd.f32 %v7414_v63, %v5178_v4  ;;  %v5176_v0 = vadd.f32 %v5133_v40, %v9460_v42  ;;  %v5965_v13 = vadd.f32 %v5964_v33, %v5934_v15  ;;  %v7415_v36 = vpop.f32.mrf.mxu0 }
 0x24e   : > { %v7367_v3 = vpop.f32.mrf.mxu1 }
 0x24f   : > { %5868 = vst [vmem:[%s9479_s11 + $0xf0] sm:$0xff] %v5772_v55  ;;  %v5770_v9 = vadd.f32 %v5727_v8, %v5176_v0  ;;  %v5179_v10 = vadd.f32 %v7367_v3, %v9465_v52  ;;  %v5730_v20 = vpop.f32.mrf.mxu0 }
 0x250   : > { %v5136_v5 = vpop.f32.mrf.mxu1 }
 0x251   : > { %5866 = vst [vmem:[%s9479_s11 + $0xe0] sm:$0xff] %v5770_v9  ;;  %v5897_v38 = vadd.f32 %v5896_v39, %v5770_v9  ;;  %v5935_v27 = vmul.f32 %v5770_v9, %v5770_v9  ;;  %v5773_v35 = vadd.f32 %v7415_v36, %v5179_v10  ;;  %v5177_v42 = vadd.f32 %v5136_v5, %v9471_v32 }
 0x253   : > { %v5966_v52 = vadd.f32 %v5965_v13, %v5935_v27  ;;  %5869 = vst [vmem:[%s9479_s11 + $0xf8] sm:$0xff] %v5773_v35  ;;  %v5771_v14 = vadd.f32 %v5730_v20, %v5177_v42 }
 0x255   : > { %5867 = vst [vmem:[%s9479_s11 + $0xe8] sm:$0xff] %v5771_v14  ;;  %v5898_v6 = vadd.f32 %v5897_v38, %v5771_v14  ;;  %v5936_v19 = vmul.f32 %v5771_v14, %v5771_v14 }
 0x256   : > { %7612 = shalt.err (!%p7609_p3)
}
 0x257   : > { %s7613_s4 = scalar_lea.hbm %s9553_s25, 4096  ;;  %s7617_s8 = scalar_lea.hbm %s9625_s2, 8192 }
 0x258   : > { %p7614_p4 = scmp.ne.s32.totalorder %s9553_s25, %s7613_s4  ;;  %p7618_p9 = scmp.lt.s32.totalorder %s9553_s25, %s9625_s2 }
 0x259   : > { %p7619_p10 = scmp.lt.s32.totalorder %s7617_s8, %s7613_s4 }
 0x25a   : > { %p7615_p7 = pnand %p7614_p4, %p7753_p5 }
 0x25b   : > { %p7620_p11 = por %p7619_p10, %p7618_p9 }
 0x25c   : > { %p7616_p8 = pneg %p7615_p7 }
 0x25e   : > { %p7621_p12 = pnand %p7620_p11, %p7616_p8 }
 0x260   : > { %7624 = shalt.err (!%p7621_p12)
}
 0x261   : > { %s7692_s11 = smov 128   ;;  %s7693_s17 = smov 8   ;;  %v5937_v32 = vmul.f32 %v5772_v55, %v5772_v55  ;;  %v5899_v45 = vadd.f32 %v5898_v6, %v5772_v55  ;;  %v5967_v22 = vadd.f32 %v5966_v52, %v5936_v19  ;;  %v5938_v24 = vmul.f32 %v5773_v35, %v5773_v35 }
 0x262   : > { %7433 = dma.vmem_to_hbm [thread:$0]  (%p7753_p5), %s9555_s19, 4096, %s9553_s25, %s5980_s26, %s7692_s11, %s7692_s11, %s7693_s17   ;;  %vm5976_vm6 = vcmask 1040384  }
 0x263   : > { %v5900_v43 = vadd.f32 %v5899_v45, %v5773_v35  ;;  %v5968_v28 = vadd.f32 %v5967_v22, %v5937_v32  ;;  %s6110_s20 = sshll.u32 %s9455_s7, 1  ;;  %s6764_s19 = sshll.u32 %s7736_s16, 5 }
 0x264   : > { %s174_s24 = scalar_lea.vmem [#allocation5], %s6110_s20  ;;  %s9587_s28 = scalar_lea.hbm %s9626_s3, %s6764_s19 }
 0x265   : > { %v5901_v29 = vrot.slane %v5900_v43, 4  ;;  %v5969_v11 = vadd.f32 %v5968_v28, %v5938_v24  ;;  %s6014_s25 = sshll.u32 %s174_s24, 4  ;;  %s5985_s29 = scalar_lea.sflag [#allocation6], %s9455_s7  ;;  %s6015_s25 = int_to_ptr.vmem [resolvable:$true] %s6014_s25 }
 0x266   : > { %s7625_s30 = scalar_lea.vmem %s6015_s25, 32  ;;  %s7694_s16 = smov [#allocation5]  }
 0x267   : > { %v5902_v18 = vadd.f32 %v5901_v29, %v5900_v43  ;;  %v5970_v61 = vrot.slane %v5969_v11, 4  ;;  %p7626_p13 = scmp.ne.s32.totalorder %s6015_s25, %s7625_s30  ;;  %s7629_s4 = sshll.u32 %s7694_s16, 4  ;;  %s7630_s4 = int_to_ptr.vmem [resolvable:$false] %s7629_s4 }
 0x268   : > { %s7631_s5 = scalar_lea.vmem %s7630_s4, 64  ;;  %p7632_p2 = scmp.lt.s32.totalorder %s6015_s25, %s7630_s4 }
 0x269   : > { %v5903_v59 = vrot.slane %v5902_v18, 2  ;;  %v5971_v1 = vadd.f32 %v5970_v61, %v5969_v11  ;;  %p7627_p0 = pnand %p7626_p13, %p7753_p5  ;;  %p7633_p3 = scmp.lt.s32.totalorder %s7631_s5, %s7625_s30 }
 0x26b   : > { %v5904_v56 = vadd.f32 %v5903_v59, %v5902_v18  ;;  %v5972_v62 = vrot.slane %v5971_v1, 2  ;;  %p7628_p1 = pneg %p7627_p0  ;;  %p7634_p4 = por %p7633_p3, %p7632_p2 }
 0x26d   : > { %v5905_v47 = vrot.slane %v5904_v56, 1  ;;  %v5973_v12 = vadd.f32 %v5972_v62, %v5971_v1  ;;  %p7635_p7 = pnand %p7634_p4, %p7628_p1 }
 0x26f   : > { %v5974_v58 = vrot.slane %v5973_v12, 1  ;;  %v5906_v46 = vadd.f32 %v5905_v47, %v5904_v56 }
 0x271   : > { %v5975_v23 = vadd.f32 %v5974_v58, %v5973_v12 }
 0x273   : > { %v5977_v30 = vsel %vm5976_vm6, %v5906_v46, %v5975_v23 }
 0x274   : > { %5978 = vst [vmem:[%s174_s24] sm:$0x3] %v5977_v30 }
 0x275   : > { %7638 = shalt.err (!%p7635_p7)
}
 0x276   : > { %s7639_s6 = scalar_lea.hbm %s9587_s28, 32  ;;  %s7643_s9 = scalar_lea.hbm %s9626_s3, 64 }
 0x277   : > { %p7640_p8 = scmp.ne.s32.totalorder %s9587_s28, %s7639_s6  ;;  %p7644_p11 = scmp.lt.s32.totalorder %s9587_s28, %s9626_s3 }
 0x278   : > { %p7645_p12 = scmp.lt.s32.totalorder %s7643_s9, %s7639_s6 }
 0x279   : > { %p7641_p9 = pnand %p7640_p8, %p7753_p5 }
 0x27a   : > { %p7646_p13 = por %p7645_p12, %p7644_p11 }
 0x27b   : > { %p7642_p10 = pneg %p7641_p9 }
 0x27d   : > { %p7647_p0 = pnand %p7646_p13, %p7642_p10 }
 0x27f   : > { %7650 = shalt.err (!%p7647_p0)
}
 0x280   : > { %7434 = dma.vmem_to_hbm [thread:$0]  (%p7753_p5), %s6015_s25, 32, %s9587_s28, %s5985_s29  }
 0x281 PF: > { %p7444_p1 = scmp.ge.s32.totalorder %s7689_s15, 2  ;;  %s6026_s17 = sand.u32 1, %s7677_s12  }
 0x282   : > { %s6027_s20 = scalar_lea.sflag [#allocation4], %s6026_s17 }
 0x283   : > { %p7438_p2 = pnand %p7444_p1, %p7757_p6 }
 0x285   : > { %p7439_p3 = pneg %p7438_p2 }
 0x287   : > { %7668 = dma.done.wait (%p7439_p3), %s6027_s20, 4096  }
 0x288   : > { %7670 = vsyncadd (%p7439_p3), %s6027_s20, 4294963200  ;;  %s6036_s19 = scalar_lea.sflag [#allocation6], %s6026_s17 }
 0x289   : > { %7672 = dma.done.wait (%p7439_p3), %s6036_s19, 32  }
 0x28a   : > { %7674 = vsyncadd (%p7439_p3), %s6036_s19, 4294967264  ;;  %p17_p5 = scmp.ge.s32.totalorder %s7740_s18, 4   ;;  %s9724_s12 = smov %s7681_s13 }
 0x28b   : > { %s9725_s13 = smov %s7685_s14  ;;  %s9726_s14 = smov %s7751_s21 }
 0x28c   : > { %s9727_s15 = smov %s7740_s18  ;;  %19 = sbr.rel (!%p17_p5) target bundleno = 5 (0x5), region = 90 }
 0x291   :  { %6041 = vsyncpa [#allocation4], 1 }
 0x292   :  { %6043 = vsyncpa [#allocation4 + $0x1], 1 }
 0x293   :  { %6044 = vsyncpa [#allocation6], 1 }
 0x294   :  { %6046 = vsyncpa [#allocation6 + $0x1], 1 }

</bundles_post_ra>
